<compile_context>
chip_gen: v7x
topology: tpu7x:2x2x1
jax: 0.10.0
libtpu: 0.0.40
codegen_flags: <defaults>
</compile_context>

<pallas_src>
import functools
import math

import jax
import jax.numpy as jnp
from jax.experimental import pallas as pl
from jax.experimental.pallas import tpu as pltpu


def decoder_kernel(emb_ref, ctx_ref, h0_ref, c0_ref,
                   w_ih0_ref, w_ihr_ref, w_hh_ref, b_gates_ref,
                   w_in_ref, b_in_ref, w_out_c_ref, w_out_h_ref, b_out_ref,
                   out_ref, attn_ref, h_state_ref, c_state_ref,
                   xs_ref,
                   *, num_layers, hidden_size, time_block, seq_len, mask_tail):
    H = hidden_size
    TS = time_block
    L = num_layers
    TB = emb_ref.shape[1]
    E = emb_ref.shape[2]
    t_blk = pl.program_id(1)

    # Recurrent state lives in the h_n / c_n output blocks (constant-in-time index_map ->
    # VMEM-resident across the sequential time axis). Re-init at the first time block of
    # each batch tile.
    @pl.when(t_blk == 0)
    def _():
        h_state_ref[...] = h0_ref[...]
        c_state_ref[...] = c0_ref[...]

    # ---- hoisted weight / bias / state reads (reused across the unrolled TS loop) -------
    w_hh = [w_hh_ref[l] for l in range(L)]                        # bf16 (H, 4H)
    w_ih = [None] + [w_ihr_ref[l - 1] for l in range(1, L)]       # bf16 (H, 4H), layers >= 1
    b_g = [b_gates_ref[l] for l in range(L)]                      # f32  (1, 4H)
    h = [h_state_ref[l] for l in range(L)]                        # f32  (TB, H) SSA carry
    c = [c_state_ref[l] for l in range(L)]

    # ---- layer-0 input projection for the whole time block: one big MXU matmul ----------
    x0_gates = jnp.dot(emb_ref[...].reshape(TS * TB, E), w_ih0_ref[...],
                       preferred_element_type=jnp.float32).reshape(TS, TB, 4 * H)

    # ---- sequential StackedLSTM recurrence (unrolled; TS small and static) --------------
    for i in range(TS):
        if mask_tail:
            keep = (t_blk * TS + i) < seq_len
        x_gates = x0_gates[i]                                     # (TB, 4H) f32
        x_bf = None
        for l in range(L):
            hh = jnp.dot(h[l].astype(jnp.bfloat16), w_hh[l],
                         preferred_element_type=jnp.float32)
            if l == 0:
                gates = x_gates + hh + b_g[l]
            else:
                gates = (jnp.dot(x_bf, w_ih[l], preferred_element_type=jnp.float32)
                         + hh + b_g[l])
            i_g = jax.nn.sigmoid(gates[:, 0 * H:1 * H])           # PyTorch gate order i,f,g,o
            f_g = jax.nn.sigmoid(gates[:, 1 * H:2 * H])
            g_g = jnp.tanh(gates[:, 2 * H:3 * H])
            o_g = jax.nn.sigmoid(gates[:, 3 * H:4 * H])
            c_new = f_g * c[l] + i_g * g_g
            h_new = o_g * jnp.tanh(c_new)
            if mask_tail:                                         # padded tail: hold state
                h_new = jnp.where(keep, h_new, h[l])
                c_new = jnp.where(keep, c_new, c[l])
            h[l] = h_new
            c[l] = c_new
            x_bf = h_new.astype(jnp.bfloat16)                     # inter-layer dropout = id
        xs_ref[i] = h[L - 1]                                      # top-layer hidden -> scratch

    # ---- write recurrent state back once per time block ---------------------------------
    for l in range(L):
        h_state_ref[l] = h[l]
        c_state_ref[l] = c[l]

    # ---- global attention for all TS steps at once (batched MXU matmuls) ----------------
    ctx = ctx_ref[...]                                            # (TB, T, H) bf16 already
    xs_b = jnp.transpose(xs_ref[...], (1, 0, 2)).astype(jnp.bfloat16)   # (TB, TS, H)
    xs_flat = xs_b.reshape(TB * TS, H)

    gamma = (jnp.dot(xs_flat, w_in_ref[...], preferred_element_type=jnp.float32)
             + b_in_ref[...])                                     # (TB*TS, H) f32
    gamma_b = gamma.reshape(TB, TS, H).astype(jnp.bfloat16)

    scores = jnp.einsum('bsh,bth->bst', gamma_b, ctx,
                        preferred_element_type=jnp.float32)       # (TB, TS, T)
    m = jnp.max(scores, axis=-1, keepdims=True)
    e = jnp.exp(scores - m)
    weights = e / jnp.sum(e, axis=-1, keepdims=True)              # exact softmax (returned)

    c_t = jnp.einsum('bst,bth->bsh', weights.astype(jnp.bfloat16), ctx,
                     preferred_element_type=jnp.float32)          # (TB, TS, H)

    # linear_out(cat([c_t, h])) split into two accumulated matmuls (no concat temporary)
    out = jnp.tanh(jnp.dot(c_t.reshape(TB * TS, H).astype(jnp.bfloat16), w_out_c_ref[...],
                           preferred_element_type=jnp.float32)
                   + jnp.dot(xs_flat, w_out_h_ref[...],
                             preferred_element_type=jnp.float32)
                   + b_out_ref[...])                              # (TB*TS, H) f32

    # outputs / attns stored batch-major for dense block writes; wrapper transposes back
    out_ref[...] = out.reshape(TB, TS, H).astype(out_ref.dtype)   # output dropout = identity
    attn_ref[...] = weights.astype(attn_ref.dtype)


def _round_up(x, m):
    return ((x + m - 1) // m) * m


def _nbytes(shape, dtype):
    return math.prod(shape) * jnp.dtype(dtype).itemsize


def _vmem_limit_bytes(working_set_bytes):
    """Block-size-derived VMEM request, clamped to ~3/4 of the chip's physical VMEM."""
    try:
        cap = int(pltpu.get_tpu_info().vmem_capacity_bytes)
    except Exception:   # conservative fallback (safe on v7x's 64 MiB)
        cap = 64 * 1024 * 1024
    want = int(working_set_bytes * 1.5)          # ~50% headroom for compiler temporaries
    return min(max(want, 32 * 1024 * 1024), cap * 3 // 4)


def rnn_decoder_forward(inputs_ids, init_state, contexts, params, *,
                        compute_dtype=jnp.bfloat16, max_time_block=8,
                        batch_tiles=1, out_dtype=jnp.float32):
    """Equivalent of rnn_decoder.forward (inference). Returns (outputs, state, attns).

    out_dtype=jnp.bfloat16 halves the outputs/attns HBM writeback if downstream tolerates it.
    batch_tiles>1 adds a 'parallel' batch grid axis (use on v7x's 2 TensorCores).
    """
    embs = params["embedding"][inputs_ids]                        # (S, B, E) gather = glue
    S, B, E = embs.shape
    h0, c0 = init_state
    L, _, H = h0.shape
    T = contexts.shape[1]

    # ---- time blocking: pad S up to a multiple of TS, mask the padded tail in-kernel ----
    mtb = max(8, (max_time_block // 8) * 8)
    TS = min(mtb, _round_up(S, 8))
    S_pad = _round_up(S, TS)
    mask_tail = S_pad != S
    if mask_tail:
        embs = jnp.pad(embs, ((0, S_pad - S), (0, 0), (0, 0)))

    assert B % batch_tiles == 0, "batch_tiles must divide the batch"
    TB = B // batch_tiles
    assert TB == B or TB % 8 == 0, "batch tile must be the full batch or a multiple of 8"
    assert L == 1 or params["w_ih"].shape[1] == H, "stacked w_ih layout needs emb==hidden for L>1"

    # matmul-only consumers are passed in the compute dtype (halves their DMA / residency)
    embs_p = embs.astype(compute_dtype)
    ctx = contexts.astype(compute_dtype)

    w_ih = params["w_ih"].astype(compute_dtype)                   # (L, E, 4H)
    w_ih0 = w_ih[0]                                               # (E, 4H), batched per block
    LR = max(L - 1, 1)
    if L > 1:
        w_ih_rest = w_ih[1:]                                      # (L-1, H, 4H)
    else:
        w_ih_rest = jnp.zeros((1, H, 4 * H), compute_dtype)       # never read
    w_hh = params["w_hh"].astype(compute_dtype)                   # (L, H, 4H)
    b_gates = params["b"].astype(jnp.float32)                     # (L, 1, 4H)
    w_in = params["w_in"].astype(compute_dtype)                   # (H, H)
    b_in = params["b_in"].astype(jnp.float32)                     # (1, H)
    w_out = params["w_out"].astype(compute_dtype)                 # (2H, H)
    w_out_c, w_out_h = w_out[:H], w_out[H:]                       # split: c_t part / h part
    b_out = params["b_out"].astype(jnp.float32)                   # (1, H)
    h0f = h0.astype(jnp.float32)
    c0f = c0.astype(jnp.float32)

    kernel = functools.partial(decoder_kernel, num_layers=L, hidden_size=H,
                               time_block=TS, seq_len=S, mask_tail=mask_tail)

    grid = (batch_tiles, S_pad // TS)

    in_specs = [
        pl.BlockSpec((TS, TB, E), lambda b, t: (t, b, 0)),        # embs (one time block)
        pl.BlockSpec((TB, T, H), lambda b, t: (b, 0, 0)),         # contexts (resident, bf16)
        pl.BlockSpec((L, TB, H), lambda b, t: (0, b, 0)),         # h0
        pl.BlockSpec((L, TB, H), lambda b, t: (0, b, 0)),         # c0
        pl.BlockSpec((E, 4 * H), lambda b, t: (0, 0)),            # W_ih layer 0
        pl.BlockSpec((LR, H, 4 * H), lambda b, t: (0, 0, 0)),     # W_ih layers >= 1
        pl.BlockSpec((L, H, 4 * H), lambda b, t: (0, 0, 0)),      # W_hh
        pl.BlockSpec((L, 1, 4 * H), lambda b, t: (0, 0, 0)),      # gate bias (b_ih + b_hh)
        pl.BlockSpec((H, H), lambda b, t: (0, 0)),                # attn linear_in W^T
        pl.BlockSpec((1, H), lambda b, t: (0, 0)),                # attn linear_in b
        pl.BlockSpec((H, H), lambda b, t: (0, 0)),                # attn linear_out W^T (c_t part)
        pl.BlockSpec((H, H), lambda b, t: (0, 0)),                # attn linear_out W^T (h part)
        pl.BlockSpec((1, H), lambda b, t: (0, 0)),                # attn linear_out b
    ]
    out_specs = [
        pl.BlockSpec((TB, TS, H), lambda b, t: (b, t, 0)),        # outputs (batch-major)
        pl.BlockSpec((TB, TS, T), lambda b, t: (b, t, 0)),        # attns   (batch-major)
        pl.BlockSpec((L, TB, H), lambda b, t: (0, b, 0)),         # h_n (resident state)
        pl.BlockSpec((L, TB, H), lambda b, t: (0, b, 0)),         # c_n (resident state)
    ]
    scratch_shapes = [pltpu.VMEM((TS, TB, H), jnp.float32)]       # top-layer hidden per step

    # ---- VMEM budget from actual block sizes (double-buffered) + in-kernel temporaries --
    working_set = (
        2 * _nbytes((TS, TB, E), compute_dtype)
        + 2 * _nbytes((TB, TS, H), out_dtype)
        + 2 * _nbytes((TB, TS, T), out_dtype)
        + 2 * _nbytes((TB, T, H), compute_dtype)
        + 2 * 4 * _nbytes((L, TB, H), jnp.float32)
        + 2 * (_nbytes((E, 4 * H), compute_dtype)
               + _nbytes((LR, H, 4 * H), compute_dtype)
               + _nbytes((L, H, 4 * H), compute_dtype)
               + _nbytes((L, 1, 4 * H), jnp.float32)
               + 3 * _nbytes((H, H), compute_dtype)
               + 2 * _nbytes((1, H), jnp.float32))
        + _nbytes((TS, TB, H), jnp.float32)
        + _nbytes((TS, TB, 4 * H), jnp.float32)
        + 3 * _nbytes((TB, TS, T), jnp.float32)
        + 2 * _nbytes((TB, TS, H), jnp.float32)
    )

    out_b, attn_b, h_n, c_n = pl.pallas_call(
        kernel,
        grid_spec=pltpu.PrefetchScalarGridSpec(
            num_scalar_prefetch=0,
            grid=grid,
            in_specs=in_specs,
            out_specs=out_specs,
            scratch_shapes=scratch_shapes),
        out_shape=[
            jax.ShapeDtypeStruct((B, S_pad, H), out_dtype),
            jax.ShapeDtypeStruct((B, S_pad, T), out_dtype),
            jax.ShapeDtypeStruct((L, B, H), jnp.float32),
            jax.ShapeDtypeStruct((L, B, H), jnp.float32),
        ],
        compiler_params=pltpu.CompilerParams(
            dimension_semantics=("parallel", "arbitrary"),  # batch parallel, time sequential
            vmem_limit_bytes=_vmem_limit_bytes(working_set)),
    )(embs_p, ctx, h0f, c0f, w_ih0, w_ih_rest, w_hh, b_gates,
      w_in, b_in, w_out_c, w_out_h, b_out)

    # back to the module's time-major layout; drop padded tail (layout plumbing only)
    outputs = jnp.transpose(out_b[:, :S], (1, 0, 2))
    attns = jnp.transpose(attn_b[:, :S], (1, 0, 2))
    return outputs, (h_n, c_n), attns


def reference_forward(inputs_ids, init_state, contexts, params):
    """Pure-JAX f32 reference of the same forward pass."""
    embs = params["embedding"][inputs_ids].astype(jnp.float32)
    h, c = init_state
    L, _, H = h.shape
    outs, attns = [], []
    for t in range(embs.shape[0]):
        x = embs[t]
        new_h, new_c = [], []
        for l in range(L):
            gates = x @ params["w_ih"][l] + h[l] @ params["w_hh"][l] + params["b"][l][0]
            i_g = jax.nn.sigmoid(gates[:, :H])
            f_g = jax.nn.sigmoid(gates[:, H:2 * H])
            g_g = jnp.tanh(gates[:, 2 * H:3 * H])
            o_g = jax.nn.sigmoid(gates[:, 3 * H:])
            cn = f_g * c[l] + i_g * g_g
            hn = o_g * jnp.tanh(cn)
            new_h.append(hn)
            new_c.append(cn)
            x = hn
        h = jnp.stack(new_h)
        c = jnp.stack(new_c)
        gamma = x @ params["w_in"] + params["b_in"][0]
        scores = jnp.einsum("bth,bh->bt", contexts, gamma)
        w = jax.nn.softmax(scores, axis=-1)
        ct = jnp.einsum("bt,bth->bh", w, contexts)
        out = jnp.tanh(jnp.concatenate([ct, x], axis=-1) @ params["w_out"]
                       + params["b_out"][0])
        outs.append(out)
        attns.append(w)
    return jnp.stack(outs), (h, c), jnp.stack(attns)


def init_params(key, vocab_size, emb_size, hidden_size, num_layers):
    H, E, L = hidden_size, emb_size, num_layers
    ks = jax.random.split(key, 8)
    scale = 1.0 / jnp.sqrt(H)
    return {
        "embedding": jax.random.normal(ks[0], (vocab_size, E), jnp.float32) * 0.1,
        # LSTMCell weights stored transposed so the kernel computes x @ W (gate order i,f,g,o).
        "w_ih": jax.random.uniform(ks[1], (L, E, 4 * H), jnp.float32, -scale, scale),
        "w_hh": jax.random.uniform(ks[2], (L, H, 4 * H), jnp.float32, -scale, scale),
        "b": jax.random.uniform(ks[3], (L, 1, 4 * H), jnp.float32, -scale, scale),
        # global_attention: linear_in (H->H) and linear_out (2H->H), transposed;
        # linear_out rows ordered [context ; hidden] to match cat([c_t, h]).
        "w_in": jax.random.uniform(ks[4], (H, H), jnp.float32, -scale, scale),
        "b_in": jax.random.uniform(ks[5], (1, H), jnp.float32, -scale, scale),
        "w_out": jax.random.uniform(ks[6], (2 * H, H), jnp.float32, -scale, scale),
        "b_out": jax.random.uniform(ks[7], (1, H), jnp.float32, -scale, scale),
    }


if __name__ == "__main__":
    VOCAB, EMB, HID, LAYERS = 50, 32, 32, 2
    SEQ, BATCH, T_CTX = 8, 2, 10

    key = jax.random.PRNGKey(0)
    kp, ki, kh, kc, kx = jax.random.split(key, 5)

    params = init_params(kp, VOCAB, EMB, HID, LAYERS)
    inputs_ids = jax.random.randint(ki, (SEQ, BATCH), 0, VOCAB, jnp.int32)
    h0 = jax.random.normal(kh, (LAYERS, BATCH, HID), jnp.float32) * 0.1
    c0 = jax.random.normal(kc, (LAYERS, BATCH, HID), jnp.float32) * 0.1
    contexts = jax.random.normal(kx, (BATCH, T_CTX, HID), jnp.float32)

    outputs, (h_n, c_n), attns = rnn_decoder_forward(inputs_ids, (h0, c0), contexts, params)
    jax.block_until_ready((outputs, h_n, c_n, attns))

    ref_out, (ref_h, ref_c), ref_attn = reference_forward(inputs_ids, (h0, c0), contexts, params)
    # bf16 MXU matmuls inside the kernel -> compare against the f32 reference with a
    # correspondingly loose tolerance.
    assert jnp.allclose(outputs, ref_out, atol=2e-2, rtol=2e-2), \
        float(jnp.max(jnp.abs(outputs - ref_out)))
    assert jnp.allclose(attns, ref_attn, atol=2e-2, rtol=2e-2), \
        float(jnp.max(jnp.abs(attns - ref_attn)))
    assert jnp.allclose(h_n, ref_h, atol=2e-2, rtol=2e-2), \
        float(jnp.max(jnp.abs(h_n - ref_h)))
    assert jnp.allclose(c_n, ref_c, atol=2e-2, rtol=2e-2), \
        float(jnp.max(jnp.abs(c_n - ref_c)))

    print("KERNEL_OK")
</pallas_src>

<mosaic_0001>
module attributes {stable_mosaic.version = 11 : i64} {
  func.func @decoder_kernel(%arg0: i32, %arg1: i32, %arg2: memref<8x2x32xbf16, #tpu.memory_space<vmem>>, %arg3: memref<2x10x32xbf16, #tpu.memory_space<vmem>>, %arg4: memref<2x2x32xf32, #tpu.memory_space<vmem>>, %arg5: memref<2x2x32xf32, #tpu.memory_space<vmem>>, %arg6: memref<32x128xbf16, #tpu.memory_space<vmem>>, %arg7: memref<1x32x128xbf16, #tpu.memory_space<vmem>>, %arg8: memref<2x32x128xbf16, #tpu.memory_space<vmem>>, %arg9: memref<2x1x128xf32, #tpu.memory_space<vmem>>, %arg10: memref<32x32xbf16, #tpu.memory_space<vmem>>, %arg11: memref<1x32xf32, #tpu.memory_space<vmem>>, %arg12: memref<32x32xbf16, #tpu.memory_space<vmem>>, %arg13: memref<32x32xbf16, #tpu.memory_space<vmem>>, %arg14: memref<1x32xf32, #tpu.memory_space<vmem>>, %arg15: memref<2x8x32xf32, #tpu.memory_space<vmem>>, %arg16: memref<2x8x10xf32, #tpu.memory_space<vmem>>, %arg17: memref<2x2x32xf32, #tpu.memory_space<vmem>>, %arg18: memref<2x2x32xf32, #tpu.memory_space<vmem>>, %arg19: memref<8x2x32xf32, #tpu.memory_space<vmem>>) attributes {dimension_semantics = [#tpu.dimension_semantics<parallel>, #tpu.dimension_semantics<arbitrary>], iteration_bounds = array<i64: 1, 1>, scalar_prefetch = 0 : i64, scratch_operands = 1 : i64, tpu.core_type = #tpu.core_type<tc>, window_params = [{transform_indices = @transform_0, window_bounds = array<i64: 8, 2, 32>}, {transform_indices = @transform_1, window_bounds = array<i64: 2, 10, 32>}, {transform_indices = @transform_2, window_bounds = array<i64: 2, 2, 32>}, {transform_indices = @transform_3, window_bounds = array<i64: 2, 2, 32>}, {pipeline_mode = #tpu.pipeline_mode<synchronous>, transform_indices = @transform_4, window_bounds = array<i64: 32, 128>}, {pipeline_mode = #tpu.pipeline_mode<synchronous>, transform_indices = @transform_5, window_bounds = array<i64: 1, 32, 128>}, {pipeline_mode = #tpu.pipeline_mode<synchronous>, transform_indices = @transform_6, window_bounds = array<i64: 2, 32, 128>}, {pipeline_mode = #tpu.pipeline_mode<synchronous>, transform_indices = @transform_7, window_bounds = array<i64: 2, 1, 128>}, {pipeline_mode = #tpu.pipeline_mode<synchronous>, transform_indices = @transform_8, window_bounds = array<i64: 32, 32>}, {pipeline_mode = #tpu.pipeline_mode<synchronous>, transform_indices = @transform_9, window_bounds = array<i64: 1, 32>}, {pipeline_mode = #tpu.pipeline_mode<synchronous>, transform_indices = @transform_10, window_bounds = array<i64: 32, 32>}, {pipeline_mode = #tpu.pipeline_mode<synchronous>, transform_indices = @transform_11, window_bounds = array<i64: 32, 32>}, {pipeline_mode = #tpu.pipeline_mode<synchronous>, transform_indices = @transform_12, window_bounds = array<i64: 1, 32>}, {transform_indices = @transform_13, window_bounds = array<i64: 2, 8, 32>}, {transform_indices = @transform_14, window_bounds = array<i64: 2, 8, 10>}, {transform_indices = @transform_15, window_bounds = array<i64: 2, 2, 32>}, {transform_indices = @transform_16, window_bounds = array<i64: 2, 2, 32>}]} {
    %c0_i32 = arith.constant 0 : i32
    %0 = arith.cmpi eq, %arg1, %c0_i32 : i32
    %1 = arith.extui %0 : i1 to i32
    %c0_i32_0 = arith.constant 0 : i32
    %2 = arith.cmpi ne, %1, %c0_i32_0 : i32
    scf.if %2 {
      %c0_162 = arith.constant 0 : index
      %c0_163 = arith.constant 0 : index
      %c0_164 = arith.constant 0 : index
      %612 = vector.load %arg4[%c0_162, %c0_163, %c0_164] : memref<2x2x32xf32, #tpu.memory_space<vmem>>, vector<2x2x32xf32>
      %c0_165 = arith.constant 0 : index
      %c0_166 = arith.constant 0 : index
      %c0_167 = arith.constant 0 : index
      %613 = vector.load %arg17[%c0_165, %c0_166, %c0_167] : memref<2x2x32xf32, #tpu.memory_space<vmem>>, vector<2x2x32xf32>
      tpu.vector_store %arg17[%c0_165, %c0_166, %c0_167], %612 {strides = array<i32>} : memref<2x2x32xf32, #tpu.memory_space<vmem>>, vector<2x2x32xf32>,
      %c0_168 = arith.constant 0 : index
      %c0_169 = arith.constant 0 : index
      %c0_170 = arith.constant 0 : index
      %614 = vector.load %arg5[%c0_168, %c0_169, %c0_170] : memref<2x2x32xf32, #tpu.memory_space<vmem>>, vector<2x2x32xf32>
      %c0_171 = arith.constant 0 : index
      %c0_172 = arith.constant 0 : index
      %c0_173 = arith.constant 0 : index
      %615 = vector.load %arg18[%c0_171, %c0_172, %c0_173] : memref<2x2x32xf32, #tpu.memory_space<vmem>>, vector<2x2x32xf32>
      tpu.vector_store %arg18[%c0_171, %c0_172, %c0_173], %614 {strides = array<i32>} : memref<2x2x32xf32, #tpu.memory_space<vmem>>, vector<2x2x32xf32>,
    } else {
    }
    %c0 = arith.constant 0 : index
    %c0_1 = arith.constant 0 : index
    %c0_2 = arith.constant 0 : index
    %3 = vector.load %arg8[%c0, %c0_1, %c0_2] : memref<2x32x128xbf16, #tpu.memory_space<vmem>>, vector<1x32x128xbf16>
    %4 = vector.shape_cast %3 : vector<1x32x128xbf16> to vector<32x128xbf16>
    %c1 = arith.constant 1 : index
    %c0_3 = arith.constant 0 : index
    %c0_4 = arith.constant 0 : index
    %5 = vector.load %arg8[%c1, %c0_3, %c0_4] : memref<2x32x128xbf16, #tpu.memory_space<vmem>>, vector<1x32x128xbf16>
    %6 = vector.shape_cast %5 : vector<1x32x128xbf16> to vector<32x128xbf16>
    %c0_5 = arith.constant 0 : index
    %c0_6 = arith.constant 0 : index
    %c0_7 = arith.constant 0 : index
    %7 = vector.load %arg7[%c0_5, %c0_6, %c0_7] : memref<1x32x128xbf16, #tpu.memory_space<vmem>>, vector<1x32x128xbf16>
    %8 = vector.shape_cast %7 : vector<1x32x128xbf16> to vector<32x128xbf16>
    %c0_8 = arith.constant 0 : index
    %c0_9 = arith.constant 0 : index
    %c0_10 = arith.constant 0 : index
    %9 = vector.load %arg9[%c0_8, %c0_9, %c0_10] : memref<2x1x128xf32, #tpu.memory_space<vmem>>, vector<1x1x128xf32>
    %10 = vector.shape_cast %9 : vector<1x1x128xf32> to vector<1x128xf32>
    %c1_11 = arith.constant 1 : index
    %c0_12 = arith.constant 0 : index
    %c0_13 = arith.constant 0 : index
    %11 = vector.load %arg9[%c1_11, %c0_12, %c0_13] : memref<2x1x128xf32, #tpu.memory_space<vmem>>, vector<1x1x128xf32>
    %12 = vector.shape_cast %11 : vector<1x1x128xf32> to vector<1x128xf32>
    %c0_14 = arith.constant 0 : index
    %c0_15 = arith.constant 0 : index
    %c0_16 = arith.constant 0 : index
    %13 = vector.load %arg17[%c0_14, %c0_15, %c0_16] : memref<2x2x32xf32, #tpu.memory_space<vmem>>, vector<1x2x32xf32>
    %14 = vector.shape_cast %13 : vector<1x2x32xf32> to vector<2x32xf32>
    %c1_17 = arith.constant 1 : index
    %c0_18 = arith.constant 0 : index
    %c0_19 = arith.constant 0 : index
    %15 = vector.load %arg17[%c1_17, %c0_18, %c0_19] : memref<2x2x32xf32, #tpu.memory_space<vmem>>, vector<1x2x32xf32>
    %16 = vector.shape_cast %15 : vector<1x2x32xf32> to vector<2x32xf32>
    %c0_20 = arith.constant 0 : index
    %c0_21 = arith.constant 0 : index
    %c0_22 = arith.constant 0 : index
    %17 = vector.load %arg18[%c0_20, %c0_21, %c0_22] : memref<2x2x32xf32, #tpu.memory_space<vmem>>, vector<1x2x32xf32>
    %18 = vector.shape_cast %17 : vector<1x2x32xf32> to vector<2x32xf32>
    %c1_23 = arith.constant 1 : index
    %c0_24 = arith.constant 0 : index
    %c0_25 = arith.constant 0 : index
    %19 = vector.load %arg18[%c1_23, %c0_24, %c0_25] : memref<2x2x32xf32, #tpu.memory_space<vmem>>, vector<1x2x32xf32>
    %20 = vector.shape_cast %19 : vector<1x2x32xf32> to vector<2x32xf32>
    %c0_26 = arith.constant 0 : index
    %c0_27 = arith.constant 0 : index
    %c0_28 = arith.constant 0 : index
    %21 = vector.load %arg2[%c0_26, %c0_27, %c0_28] : memref<8x2x32xbf16, #tpu.memory_space<vmem>>, vector<8x2x32xbf16>
    %22 = vector.shape_cast %21 : vector<8x2x32xbf16> to vector<16x32xbf16>
    %c0_29 = arith.constant 0 : index
    %c0_30 = arith.constant 0 : index
    %23 = vector.load %arg6[%c0_29, %c0_30] : memref<32x128xbf16, #tpu.memory_space<vmem>>, vector<32x128xbf16>
    %cst = arith.constant dense<0.000000e+00> : vector<16x128xf32>
    %24 = tpu.matmul %22, %23, %cst {dimension_numbers = #tpu.dot_dimension_numbers<[1], [0], [0], [1], [0, 0, 1, 1], [], []>} : vector<16x32xbf16>, vector<32x128xbf16>, vector<16x128xf32> -> vector<16x128xf32>
    %25 = vector.shape_cast %24 : vector<16x128xf32> to vector<8x2x128xf32>
    %26 = vector.extract_strided_slice %25 {offsets = [0, 0, 0], sizes = [1, 2, 128], strides = [1, 1, 1]} : vector<8x2x128xf32> to vector<1x2x128xf32>
    %27 = vector.shape_cast %26 : vector<1x2x128xf32> to vector<2x128xf32>
    %28 = arith.truncf %14 : vector<2x32xf32> to vector<2x32xbf16>
    %cst_31 = arith.constant dense<0.000000e+00> : vector<2x128xf32>
    %29 = tpu.matmul %28, %4, %cst_31 {dimension_numbers = #tpu.dot_dimension_numbers<[1], [0], [0], [1], [0, 0, 1, 1], [], []>} : vector<2x32xbf16>, vector<32x128xbf16>, vector<2x128xf32> -> vector<2x128xf32>
    %30 = arith.addf %27, %29 : vector<2x128xf32>
    %31 = vector.broadcast %10 : vector<1x128xf32> to vector<2x128xf32>
    %32 = arith.addf %30, %31 : vector<2x128xf32>
    %33 = vector.extract_strided_slice %32 {offsets = [0, 0], sizes = [2, 32], strides = [1, 1]} : vector<2x128xf32> to vector<2x32xf32>
    %34 = arith.negf %33 : vector<2x32xf32>
    %35 = math.exp %34 : vector<2x32xf32>
    %cst_32 = arith.constant 1.000000e+00 : f32
    %36 = vector.broadcast %cst_32 : f32 to vector<2x32xf32>
    %37 = arith.addf %36, %35 : vector<2x32xf32>
    %38 = arith.divf %36, %37 : vector<2x32xf32>
    %39 = vector.extract_strided_slice %32 {offsets = [0, 32], sizes = [2, 32], strides = [1, 1]} : vector<2x128xf32> to vector<2x32xf32>
    %40 = arith.negf %39 : vector<2x32xf32>
    %41 = math.exp %40 : vector<2x32xf32>
    %cst_33 = arith.constant 1.000000e+00 : f32
    %42 = vector.broadcast %cst_33 : f32 to vector<2x32xf32>
    %43 = arith.addf %42, %41 : vector<2x32xf32>
    %44 = arith.divf %42, %43 : vector<2x32xf32>
    %45 = vector.extract_strided_slice %32 {offsets = [0, 64], sizes = [2, 32], strides = [1, 1]} : vector<2x128xf32> to vector<2x32xf32>
    %46 = math.tanh %45 : vector<2x32xf32>
    %47 = vector.extract_strided_slice %32 {offsets = [0, 96], sizes = [2, 32], strides = [1, 1]} : vector<2x128xf32> to vector<2x32xf32>
    %48 = arith.negf %47 : vector<2x32xf32>
    %49 = math.exp %48 : vector<2x32xf32>
    %cst_34 = arith.constant 1.000000e+00 : f32
    %50 = vector.broadcast %cst_34 : f32 to vector<2x32xf32>
    %51 = arith.addf %50, %49 : vector<2x32xf32>
    %52 = arith.divf %50, %51 : vector<2x32xf32>
    %53 = arith.mulf %44, %18 : vector<2x32xf32>
    %54 = arith.mulf %38, %46 : vector<2x32xf32>
    %55 = arith.addf %53, %54 : vector<2x32xf32>
    %56 = math.tanh %55 : vector<2x32xf32>
    %57 = arith.mulf %52, %56 : vector<2x32xf32>
    %58 = arith.truncf %57 : vector<2x32xf32> to vector<2x32xbf16>
    %59 = arith.truncf %16 : vector<2x32xf32> to vector<2x32xbf16>
    %cst_35 = arith.constant dense<0.000000e+00> : vector<2x128xf32>
    %60 = tpu.matmul %59, %6, %cst_35 {dimension_numbers = #tpu.dot_dimension_numbers<[1], [0], [0], [1], [0, 0, 1, 1], [], []>} : vector<2x32xbf16>, vector<32x128xbf16>, vector<2x128xf32> -> vector<2x128xf32>
    %cst_36 = arith.constant dense<0.000000e+00> : vector<2x128xf32>
    %61 = tpu.matmul %58, %8, %cst_36 {dimension_numbers = #tpu.dot_dimension_numbers<[1], [0], [0], [1], [0, 0, 1, 1], [], []>} : vector<2x32xbf16>, vector<32x128xbf16>, vector<2x128xf32> -> vector<2x128xf32>
    %62 = arith.addf %61, %60 : vector<2x128xf32>
    %63 = vector.broadcast %12 : vector<1x128xf32> to vector<2x128xf32>
    %64 = arith.addf %62, %63 : vector<2x128xf32>
    %65 = vector.extract_strided_slice %64 {offsets = [0, 0], sizes = [2, 32], strides = [1, 1]} : vector<2x128xf32> to vector<2x32xf32>
    %66 = arith.negf %65 : vector<2x32xf32>
    %67 = math.exp %66 : vector<2x32xf32>
    %cst_37 = arith.constant 1.000000e+00 : f32
    %68 = vector.broadcast %cst_37 : f32 to vector<2x32xf32>
    %69 = arith.addf %68, %67 : vector<2x32xf32>
    %70 = arith.divf %68, %69 : vector<2x32xf32>
    %71 = vector.extract_strided_slice %64 {offsets = [0, 32], sizes = [2, 32], strides = [1, 1]} : vector<2x128xf32> to vector<2x32xf32>
    %72 = arith.negf %71 : vector<2x32xf32>
    %73 = math.exp %72 : vector<2x32xf32>
    %cst_38 = arith.constant 1.000000e+00 : f32
    %74 = vector.broadcast %cst_38 : f32 to vector<2x32xf32>
    %75 = arith.addf %74, %73 : vector<2x32xf32>
    %76 = arith.divf %74, %75 : vector<2x32xf32>
    %77 = vector.extract_strided_slice %64 {offsets = [0, 64], sizes = [2, 32], strides = [1, 1]} : vector<2x128xf32> to vector<2x32xf32>
    %78 = math.tanh %77 : vector<2x32xf32>
    %79 = vector.extract_strided_slice %64 {offsets = [0, 96], sizes = [2, 32], strides = [1, 1]} : vector<2x128xf32> to vector<2x32xf32>
    %80 = arith.negf %79 : vector<2x32xf32>
    %81 = math.exp %80 : vector<2x32xf32>
    %cst_39 = arith.constant 1.000000e+00 : f32
    %82 = vector.broadcast %cst_39 : f32 to vector<2x32xf32>
    %83 = arith.addf %82, %81 : vector<2x32xf32>
    %84 = arith.divf %82, %83 : vector<2x32xf32>
    %85 = arith.mulf %76, %20 : vector<2x32xf32>
    %86 = arith.mulf %70, %78 : vector<2x32xf32>
    %87 = arith.addf %85, %86 : vector<2x32xf32>
    %88 = math.tanh %87 : vector<2x32xf32>
    %89 = arith.mulf %84, %88 : vector<2x32xf32>
    %c0_40 = arith.constant 0 : index
    %c0_41 = arith.constant 0 : index
    %c0_42 = arith.constant 0 : index
    %90 = vector.load %arg19[%c0_40, %c0_41, %c0_42] : memref<8x2x32xf32, #tpu.memory_space<vmem>>, vector<1x2x32xf32>
    %91 = vector.shape_cast %90 : vector<1x2x32xf32> to vector<2x32xf32>
    %92 = vector.shape_cast %89 : vector<2x32xf32> to vector<1x2x32xf32>
    tpu.vector_store %arg19[%c0_40, %c0_41, %c0_42], %92 {strides = array<i32>} : memref<8x2x32xf32, #tpu.memory_space<vmem>>, vector<1x2x32xf32>,
    %93 = vector.extract_strided_slice %25 {offsets = [1, 0, 0], sizes = [1, 2, 128], strides = [1, 1, 1]} : vector<8x2x128xf32> to vector<1x2x128xf32>
    %94 = vector.shape_cast %93 : vector<1x2x128xf32> to vector<2x128xf32>
    %95 = arith.truncf %57 : vector<2x32xf32> to vector<2x32xbf16>
    %cst_43 = arith.constant dense<0.000000e+00> : vector<2x128xf32>
    %96 = tpu.matmul %95, %4, %cst_43 {dimension_numbers = #tpu.dot_dimension_numbers<[1], [0], [0], [1], [0, 0, 1, 1], [], []>} : vector<2x32xbf16>, vector<32x128xbf16>, vector<2x128xf32> -> vector<2x128xf32>
    %97 = arith.addf %94, %96 : vector<2x128xf32>
    %98 = vector.broadcast %10 : vector<1x128xf32> to vector<2x128xf32>
    %99 = arith.addf %97, %98 : vector<2x128xf32>
    %100 = vector.extract_strided_slice %99 {offsets = [0, 0], sizes = [2, 32], strides = [1, 1]} : vector<2x128xf32> to vector<2x32xf32>
    %101 = arith.negf %100 : vector<2x32xf32>
    %102 = math.exp %101 : vector<2x32xf32>
    %cst_44 = arith.constant 1.000000e+00 : f32
    %103 = vector.broadcast %cst_44 : f32 to vector<2x32xf32>
    %104 = arith.addf %103, %102 : vector<2x32xf32>
    %105 = arith.divf %103, %104 : vector<2x32xf32>
    %106 = vector.extract_strided_slice %99 {offsets = [0, 32], sizes = [2, 32], strides = [1, 1]} : vector<2x128xf32> to vector<2x32xf32>
    %107 = arith.negf %106 : vector<2x32xf32>
    %108 = math.exp %107 : vector<2x32xf32>
    %cst_45 = arith.constant 1.000000e+00 : f32
    %109 = vector.broadcast %cst_45 : f32 to vector<2x32xf32>
    %110 = arith.addf %109, %108 : vector<2x32xf32>
    %111 = arith.divf %109, %110 : vector<2x32xf32>
    %112 = vector.extract_strided_slice %99 {offsets = [0, 64], sizes = [2, 32], strides = [1, 1]} : vector<2x128xf32> to vector<2x32xf32>
    %113 = math.tanh %112 : vector<2x32xf32>
    %114 = vector.extract_strided_slice %99 {offsets = [0, 96], sizes = [2, 32], strides = [1, 1]} : vector<2x128xf32> to vector<2x32xf32>
    %115 = arith.negf %114 : vector<2x32xf32>
    %116 = math.exp %115 : vector<2x32xf32>
    %cst_46 = arith.constant 1.000000e+00 : f32
    %117 = vector.broadcast %cst_46 : f32 to vector<2x32xf32>
    %118 = arith.addf %117, %116 : vector<2x32xf32>
    %119 = arith.divf %117, %118 : vector<2x32xf32>
    %120 = arith.mulf %111, %55 : vector<2x32xf32>
    %121 = arith.mulf %105, %113 : vector<2x32xf32>
    %122 = arith.addf %120, %121 : vector<2x32xf32>
    %123 = math.tanh %122 : vector<2x32xf32>
    %124 = arith.mulf %119, %123 : vector<2x32xf32>
    %125 = arith.truncf %124 : vector<2x32xf32> to vector<2x32xbf16>
    %126 = arith.truncf %89 : vector<2x32xf32> to vector<2x32xbf16>
    %cst_47 = arith.constant dense<0.000000e+00> : vector<2x128xf32>
    %127 = tpu.matmul %126, %6, %cst_47 {dimension_numbers = #tpu.dot_dimension_numbers<[1], [0], [0], [1], [0, 0, 1, 1], [], []>} : vector<2x32xbf16>, vector<32x128xbf16>, vector<2x128xf32> -> vector<2x128xf32>
    %cst_48 = arith.constant dense<0.000000e+00> : vector<2x128xf32>
    %128 = tpu.matmul %125, %8, %cst_48 {dimension_numbers = #tpu.dot_dimension_numbers<[1], [0], [0], [1], [0, 0, 1, 1], [], []>} : vector<2x32xbf16>, vector<32x128xbf16>, vector<2x128xf32> -> vector<2x128xf32>
    %129 = arith.addf %128, %127 : vector<2x128xf32>
    %130 = vector.broadcast %12 : vector<1x128xf32> to vector<2x128xf32>
    %131 = arith.addf %129, %130 : vector<2x128xf32>
    %132 = vector.extract_strided_slice %131 {offsets = [0, 0], sizes = [2, 32], strides = [1, 1]} : vector<2x128xf32> to vector<2x32xf32>
    %133 = arith.negf %132 : vector<2x32xf32>
    %134 = math.exp %133 : vector<2x32xf32>
    %cst_49 = arith.constant 1.000000e+00 : f32
    %135 = vector.broadcast %cst_49 : f32 to vector<2x32xf32>
    %136 = arith.addf %135, %134 : vector<2x32xf32>
    %137 = arith.divf %135, %136 : vector<2x32xf32>
    %138 = vector.extract_strided_slice %131 {offsets = [0, 32], sizes = [2, 32], strides = [1, 1]} : vector<2x128xf32> to vector<2x32xf32>
    %139 = arith.negf %138 : vector<2x32xf32>
    %140 = math.exp %139 : vector<2x32xf32>
    %cst_50 = arith.constant 1.000000e+00 : f32
    %141 = vector.broadcast %cst_50 : f32 to vector<2x32xf32>
    %142 = arith.addf %141, %140 : vector<2x32xf32>
    %143 = arith.divf %141, %142 : vector<2x32xf32>
    %144 = vector.extract_strided_slice %131 {offsets = [0, 64], sizes = [2, 32], strides = [1, 1]} : vector<2x128xf32> to vector<2x32xf32>
    %145 = math.tanh %144 : vector<2x32xf32>
    %146 = vector.extract_strided_slice %131 {offsets = [0, 96], sizes = [2, 32], strides = [1, 1]} : vector<2x128xf32> to vector<2x32xf32>
    %147 = arith.negf %146 : vector<2x32xf32>
    %148 = math.exp %147 : vector<2x32xf32>
    %cst_51 = arith.constant 1.000000e+00 : f32
    %149 = vector.broadcast %cst_51 : f32 to vector<2x32xf32>
    %150 = arith.addf %149, %148 : vector<2x32xf32>
    %151 = arith.divf %149, %150 : vector<2x32xf32>
    %152 = arith.mulf %143, %87 : vector<2x32xf32>
    %153 = arith.mulf %137, %145 : vector<2x32xf32>
    %154 = arith.addf %152, %153 : vector<2x32xf32>
    %155 = math.tanh %154 : vector<2x32xf32>
    %156 = arith.mulf %151, %155 : vector<2x32xf32>
    %c1_52 = arith.constant 1 : index
    %c0_53 = arith.constant 0 : index
    %c0_54 = arith.constant 0 : index
    %157 = vector.load %arg19[%c1_52, %c0_53, %c0_54] : memref<8x2x32xf32, #tpu.memory_space<vmem>>, vector<1x2x32xf32>
    %158 = vector.shape_cast %157 : vector<1x2x32xf32> to vector<2x32xf32>
    %159 = vector.shape_cast %156 : vector<2x32xf32> to vector<1x2x32xf32>
    tpu.vector_store %arg19[%c1_52, %c0_53, %c0_54], %159 {strides = array<i32>} : memref<8x2x32xf32, #tpu.memory_space<vmem>>, vector<1x2x32xf32>,
    %160 = vector.extract_strided_slice %25 {offsets = [2, 0, 0], sizes = [1, 2, 128], strides = [1, 1, 1]} : vector<8x2x128xf32> to vector<1x2x128xf32>
    %161 = vector.shape_cast %160 : vector<1x2x128xf32> to vector<2x128xf32>
    %162 = arith.truncf %124 : vector<2x32xf32> to vector<2x32xbf16>
    %cst_55 = arith.constant dense<0.000000e+00> : vector<2x128xf32>
    %163 = tpu.matmul %162, %4, %cst_55 {dimension_numbers = #tpu.dot_dimension_numbers<[1], [0], [0], [1], [0, 0, 1, 1], [], []>} : vector<2x32xbf16>, vector<32x128xbf16>, vector<2x128xf32> -> vector<2x128xf32>
    %164 = arith.addf %161, %163 : vector<2x128xf32>
    %165 = vector.broadcast %10 : vector<1x128xf32> to vector<2x128xf32>
    %166 = arith.addf %164, %165 : vector<2x128xf32>
    %167 = vector.extract_strided_slice %166 {offsets = [0, 0], sizes = [2, 32], strides = [1, 1]} : vector<2x128xf32> to vector<2x32xf32>
    %168 = arith.negf %167 : vector<2x32xf32>
    %169 = math.exp %168 : vector<2x32xf32>
    %cst_56 = arith.constant 1.000000e+00 : f32
    %170 = vector.broadcast %cst_56 : f32 to vector<2x32xf32>
    %171 = arith.addf %170, %169 : vector<2x32xf32>
    %172 = arith.divf %170, %171 : vector<2x32xf32>
    %173 = vector.extract_strided_slice %166 {offsets = [0, 32], sizes = [2, 32], strides = [1, 1]} : vector<2x128xf32> to vector<2x32xf32>
    %174 = arith.negf %173 : vector<2x32xf32>
    %175 = math.exp %174 : vector<2x32xf32>
    %cst_57 = arith.constant 1.000000e+00 : f32
    %176 = vector.broadcast %cst_57 : f32 to vector<2x32xf32>
    %177 = arith.addf %176, %175 : vector<2x32xf32>
    %178 = arith.divf %176, %177 : vector<2x32xf32>
    %179 = vector.extract_strided_slice %166 {offsets = [0, 64], sizes = [2, 32], strides = [1, 1]} : vector<2x128xf32> to vector<2x32xf32>
    %180 = math.tanh %179 : vector<2x32xf32>
    %181 = vector.extract_strided_slice %166 {offsets = [0, 96], sizes = [2, 32], strides = [1, 1]} : vector<2x128xf32> to vector<2x32xf32>
    %182 = arith.negf %181 : vector<2x32xf32>
    %183 = math.exp %182 : vector<2x32xf32>
    %cst_58 = arith.constant 1.000000e+00 : f32
    %184 = vector.broadcast %cst_58 : f32 to vector<2x32xf32>
    %185 = arith.addf %184, %183 : vector<2x32xf32>
    %186 = arith.divf %184, %185 : vector<2x32xf32>
    %187 = arith.mulf %178, %122 : vector<2x32xf32>
    %188 = arith.mulf %172, %180 : vector<2x32xf32>
    %189 = arith.addf %187, %188 : vector<2x32xf32>
    %190 = math.tanh %189 : vector<2x32xf32>
    %191 = arith.mulf %186, %190 : vector<2x32xf32>
    %192 = arith.truncf %191 : vector<2x32xf32> to vector<2x32xbf16>
    %193 = arith.truncf %156 : vector<2x32xf32> to vector<2x32xbf16>
    %cst_59 = arith.constant dense<0.000000e+00> : vector<2x128xf32>
    %194 = tpu.matmul %193, %6, %cst_59 {dimension_numbers = #tpu.dot_dimension_numbers<[1], [0], [0], [1], [0, 0, 1, 1], [], []>} : vector<2x32xbf16>, vector<32x128xbf16>, vector<2x128xf32> -> vector<2x128xf32>
    %cst_60 = arith.constant dense<0.000000e+00> : vector<2x128xf32>
    %195 = tpu.matmul %192, %8, %cst_60 {dimension_numbers = #tpu.dot_dimension_numbers<[1], [0], [0], [1], [0, 0, 1, 1], [], []>} : vector<2x32xbf16>, vector<32x128xbf16>, vector<2x128xf32> -> vector<2x128xf32>
    %196 = arith.addf %195, %194 : vector<2x128xf32>
    %197 = vector.broadcast %12 : vector<1x128xf32> to vector<2x128xf32>
    %198 = arith.addf %196, %197 : vector<2x128xf32>
    %199 = vector.extract_strided_slice %198 {offsets = [0, 0], sizes = [2, 32], strides = [1, 1]} : vector<2x128xf32> to vector<2x32xf32>
    %200 = arith.negf %199 : vector<2x32xf32>
    %201 = math.exp %200 : vector<2x32xf32>
    %cst_61 = arith.constant 1.000000e+00 : f32
    %202 = vector.broadcast %cst_61 : f32 to vector<2x32xf32>
    %203 = arith.addf %202, %201 : vector<2x32xf32>
    %204 = arith.divf %202, %203 : vector<2x32xf32>
    %205 = vector.extract_strided_slice %198 {offsets = [0, 32], sizes = [2, 32], strides = [1, 1]} : vector<2x128xf32> to vector<2x32xf32>
    %206 = arith.negf %205 : vector<2x32xf32>
    %207 = math.exp %206 : vector<2x32xf32>
    %cst_62 = arith.constant 1.000000e+00 : f32
    %208 = vector.broadcast %cst_62 : f32 to vector<2x32xf32>
    %209 = arith.addf %208, %207 : vector<2x32xf32>
    %210 = arith.divf %208, %209 : vector<2x32xf32>
    %211 = vector.extract_strided_slice %198 {offsets = [0, 64], sizes = [2, 32], strides = [1, 1]} : vector<2x128xf32> to vector<2x32xf32>
    %212 = math.tanh %211 : vector<2x32xf32>
    %213 = vector.extract_strided_slice %198 {offsets = [0, 96], sizes = [2, 32], strides = [1, 1]} : vector<2x128xf32> to vector<2x32xf32>
    %214 = arith.negf %213 : vector<2x32xf32>
    %215 = math.exp %214 : vector<2x32xf32>
    %cst_63 = arith.constant 1.000000e+00 : f32
    %216 = vector.broadcast %cst_63 : f32 to vector<2x32xf32>
    %217 = arith.addf %216, %215 : vector<2x32xf32>
    %218 = arith.divf %216, %217 : vector<2x32xf32>
    %219 = arith.mulf %210, %154 : vector<2x32xf32>
    %220 = arith.mulf %204, %212 : vector<2x32xf32>
    %221 = arith.addf %219, %220 : vector<2x32xf32>
    %222 = math.tanh %221 : vector<2x32xf32>
    %223 = arith.mulf %218, %222 : vector<2x32xf32>
    %c2 = arith.constant 2 : index
    %c0_64 = arith.constant 0 : index
    %c0_65 = arith.constant 0 : index
    %224 = vector.load %arg19[%c2, %c0_64, %c0_65] : memref<8x2x32xf32, #tpu.memory_space<vmem>>, vector<1x2x32xf32>
    %225 = vector.shape_cast %224 : vector<1x2x32xf32> to vector<2x32xf32>
    %226 = vector.shape_cast %223 : vector<2x32xf32> to vector<1x2x32xf32>
    tpu.vector_store %arg19[%c2, %c0_64, %c0_65], %226 {strides = array<i32>} : memref<8x2x32xf32, #tpu.memory_space<vmem>>, vector<1x2x32xf32>,
    %227 = vector.extract_strided_slice %25 {offsets = [3, 0, 0], sizes = [1, 2, 128], strides = [1, 1, 1]} : vector<8x2x128xf32> to vector<1x2x128xf32>
    %228 = vector.shape_cast %227 : vector<1x2x128xf32> to vector<2x128xf32>
    %229 = arith.truncf %191 : vector<2x32xf32> to vector<2x32xbf16>
    %cst_66 = arith.constant dense<0.000000e+00> : vector<2x128xf32>
    %230 = tpu.matmul %229, %4, %cst_66 {dimension_numbers = #tpu.dot_dimension_numbers<[1], [0], [0], [1], [0, 0, 1, 1], [], []>} : vector<2x32xbf16>, vector<32x128xbf16>, vector<2x128xf32> -> vector<2x128xf32>
    %231 = arith.addf %228, %230 : vector<2x128xf32>
    %232 = vector.broadcast %10 : vector<1x128xf32> to vector<2x128xf32>
    %233 = arith.addf %231, %232 : vector<2x128xf32>
    %234 = vector.extract_strided_slice %233 {offsets = [0, 0], sizes = [2, 32], strides = [1, 1]} : vector<2x128xf32> to vector<2x32xf32>
    %235 = arith.negf %234 : vector<2x32xf32>
    %236 = math.exp %235 : vector<2x32xf32>
    %cst_67 = arith.constant 1.000000e+00 : f32
    %237 = vector.broadcast %cst_67 : f32 to vector<2x32xf32>
    %238 = arith.addf %237, %236 : vector<2x32xf32>
    %239 = arith.divf %237, %238 : vector<2x32xf32>
    %240 = vector.extract_strided_slice %233 {offsets = [0, 32], sizes = [2, 32], strides = [1, 1]} : vector<2x128xf32> to vector<2x32xf32>
    %241 = arith.negf %240 : vector<2x32xf32>
    %242 = math.exp %241 : vector<2x32xf32>
    %cst_68 = arith.constant 1.000000e+00 : f32
    %243 = vector.broadcast %cst_68 : f32 to vector<2x32xf32>
    %244 = arith.addf %243, %242 : vector<2x32xf32>
    %245 = arith.divf %243, %244 : vector<2x32xf32>
    %246 = vector.extract_strided_slice %233 {offsets = [0, 64], sizes = [2, 32], strides = [1, 1]} : vector<2x128xf32> to vector<2x32xf32>
    %247 = math.tanh %246 : vector<2x32xf32>
    %248 = vector.extract_strided_slice %233 {offsets = [0, 96], sizes = [2, 32], strides = [1, 1]} : vector<2x128xf32> to vector<2x32xf32>
    %249 = arith.negf %248 : vector<2x32xf32>
    %250 = math.exp %249 : vector<2x32xf32>
    %cst_69 = arith.constant 1.000000e+00 : f32
    %251 = vector.broadcast %cst_69 : f32 to vector<2x32xf32>
    %252 = arith.addf %251, %250 : vector<2x32xf32>
    %253 = arith.divf %251, %252 : vector<2x32xf32>
    %254 = arith.mulf %245, %189 : vector<2x32xf32>
    %255 = arith.mulf %239, %247 : vector<2x32xf32>
    %256 = arith.addf %254, %255 : vector<2x32xf32>
    %257 = math.tanh %256 : vector<2x32xf32>
    %258 = arith.mulf %253, %257 : vector<2x32xf32>
    %259 = arith.truncf %258 : vector<2x32xf32> to vector<2x32xbf16>
    %260 = arith.truncf %223 : vector<2x32xf32> to vector<2x32xbf16>
    %cst_70 = arith.constant dense<0.000000e+00> : vector<2x128xf32>
    %261 = tpu.matmul %260, %6, %cst_70 {dimension_numbers = #tpu.dot_dimension_numbers<[1], [0], [0], [1], [0, 0, 1, 1], [], []>} : vector<2x32xbf16>, vector<32x128xbf16>, vector<2x128xf32> -> vector<2x128xf32>
    %cst_71 = arith.constant dense<0.000000e+00> : vector<2x128xf32>
    %262 = tpu.matmul %259, %8, %cst_71 {dimension_numbers = #tpu.dot_dimension_numbers<[1], [0], [0], [1], [0, 0, 1, 1], [], []>} : vector<2x32xbf16>, vector<32x128xbf16>, vector<2x128xf32> -> vector<2x128xf32>
    %263 = arith.addf %262, %261 : vector<2x128xf32>
    %264 = vector.broadcast %12 : vector<1x128xf32> to vector<2x128xf32>
    %265 = arith.addf %263, %264 : vector<2x128xf32>
    %266 = vector.extract_strided_slice %265 {offsets = [0, 0], sizes = [2, 32], strides = [1, 1]} : vector<2x128xf32> to vector<2x32xf32>
    %267 = arith.negf %266 : vector<2x32xf32>
    %268 = math.exp %267 : vector<2x32xf32>
    %cst_72 = arith.constant 1.000000e+00 : f32
    %269 = vector.broadcast %cst_72 : f32 to vector<2x32xf32>
    %270 = arith.addf %269, %268 : vector<2x32xf32>
    %271 = arith.divf %269, %270 : vector<2x32xf32>
    %272 = vector.extract_strided_slice %265 {offsets = [0, 32], sizes = [2, 32], strides = [1, 1]} : vector<2x128xf32> to vector<2x32xf32>
    %273 = arith.negf %272 : vector<2x32xf32>
    %274 = math.exp %273 : vector<2x32xf32>
    %cst_73 = arith.constant 1.000000e+00 : f32
    %275 = vector.broadcast %cst_73 : f32 to vector<2x32xf32>
    %276 = arith.addf %275, %274 : vector<2x32xf32>
    %277 = arith.divf %275, %276 : vector<2x32xf32>
    %278 = vector.extract_strided_slice %265 {offsets = [0, 64], sizes = [2, 32], strides = [1, 1]} : vector<2x128xf32> to vector<2x32xf32>
    %279 = math.tanh %278 : vector<2x32xf32>
    %280 = vector.extract_strided_slice %265 {offsets = [0, 96], sizes = [2, 32], strides = [1, 1]} : vector<2x128xf32> to vector<2x32xf32>
    %281 = arith.negf %280 : vector<2x32xf32>
    %282 = math.exp %281 : vector<2x32xf32>
    %cst_74 = arith.constant 1.000000e+00 : f32
    %283 = vector.broadcast %cst_74 : f32 to vector<2x32xf32>
    %284 = arith.addf %283, %282 : vector<2x32xf32>
    %285 = arith.divf %283, %284 : vector<2x32xf32>
    %286 = arith.mulf %277, %221 : vector<2x32xf32>
    %287 = arith.mulf %271, %279 : vector<2x32xf32>
    %288 = arith.addf %286, %287 : vector<2x32xf32>
    %289 = math.tanh %288 : vector<2x32xf32>
    %290 = arith.mulf %285, %289 : vector<2x32xf32>
    %c3 = arith.constant 3 : index
    %c0_75 = arith.constant 0 : index
    %c0_76 = arith.constant 0 : index
    %291 = vector.load %arg19[%c3, %c0_75, %c0_76] : memref<8x2x32xf32, #tpu.memory_space<vmem>>, vector<1x2x32xf32>
    %292 = vector.shape_cast %291 : vector<1x2x32xf32> to vector<2x32xf32>
    %293 = vector.shape_cast %290 : vector<2x32xf32> to vector<1x2x32xf32>
    tpu.vector_store %arg19[%c3, %c0_75, %c0_76], %293 {strides = array<i32>} : memref<8x2x32xf32, #tpu.memory_space<vmem>>, vector<1x2x32xf32>,
    %294 = vector.extract_strided_slice %25 {offsets = [4, 0, 0], sizes = [1, 2, 128], strides = [1, 1, 1]} : vector<8x2x128xf32> to vector<1x2x128xf32>
    %295 = vector.shape_cast %294 : vector<1x2x128xf32> to vector<2x128xf32>
    %296 = arith.truncf %258 : vector<2x32xf32> to vector<2x32xbf16>
    %cst_77 = arith.constant dense<0.000000e+00> : vector<2x128xf32>
    %297 = tpu.matmul %296, %4, %cst_77 {dimension_numbers = #tpu.dot_dimension_numbers<[1], [0], [0], [1], [0, 0, 1, 1], [], []>} : vector<2x32xbf16>, vector<32x128xbf16>, vector<2x128xf32> -> vector<2x128xf32>
    %298 = arith.addf %295, %297 : vector<2x128xf32>
    %299 = vector.broadcast %10 : vector<1x128xf32> to vector<2x128xf32>
    %300 = arith.addf %298, %299 : vector<2x128xf32>
    %301 = vector.extract_strided_slice %300 {offsets = [0, 0], sizes = [2, 32], strides = [1, 1]} : vector<2x128xf32> to vector<2x32xf32>
    %302 = arith.negf %301 : vector<2x32xf32>
    %303 = math.exp %302 : vector<2x32xf32>
    %cst_78 = arith.constant 1.000000e+00 : f32
    %304 = vector.broadcast %cst_78 : f32 to vector<2x32xf32>
    %305 = arith.addf %304, %303 : vector<2x32xf32>
    %306 = arith.divf %304, %305 : vector<2x32xf32>
    %307 = vector.extract_strided_slice %300 {offsets = [0, 32], sizes = [2, 32], strides = [1, 1]} : vector<2x128xf32> to vector<2x32xf32>
    %308 = arith.negf %307 : vector<2x32xf32>
    %309 = math.exp %308 : vector<2x32xf32>
    %cst_79 = arith.constant 1.000000e+00 : f32
    %310 = vector.broadcast %cst_79 : f32 to vector<2x32xf32>
    %311 = arith.addf %310, %309 : vector<2x32xf32>
    %312 = arith.divf %310, %311 : vector<2x32xf32>
    %313 = vector.extract_strided_slice %300 {offsets = [0, 64], sizes = [2, 32], strides = [1, 1]} : vector<2x128xf32> to vector<2x32xf32>
    %314 = math.tanh %313 : vector<2x32xf32>
    %315 = vector.extract_strided_slice %300 {offsets = [0, 96], sizes = [2, 32], strides = [1, 1]} : vector<2x128xf32> to vector<2x32xf32>
    %316 = arith.negf %315 : vector<2x32xf32>
    %317 = math.exp %316 : vector<2x32xf32>
    %cst_80 = arith.constant 1.000000e+00 : f32
    %318 = vector.broadcast %cst_80 : f32 to vector<2x32xf32>
    %319 = arith.addf %318, %317 : vector<2x32xf32>
    %320 = arith.divf %318, %319 : vector<2x32xf32>
    %321 = arith.mulf %312, %256 : vector<2x32xf32>
    %322 = arith.mulf %306, %314 : vector<2x32xf32>
    %323 = arith.addf %321, %322 : vector<2x32xf32>
    %324 = math.tanh %323 : vector<2x32xf32>
    %325 = arith.mulf %320, %324 : vector<2x32xf32>
    %326 = arith.truncf %325 : vector<2x32xf32> to vector<2x32xbf16>
    %327 = arith.truncf %290 : vector<2x32xf32> to vector<2x32xbf16>
    %cst_81 = arith.constant dense<0.000000e+00> : vector<2x128xf32>
    %328 = tpu.matmul %327, %6, %cst_81 {dimension_numbers = #tpu.dot_dimension_numbers<[1], [0], [0], [1], [0, 0, 1, 1], [], []>} : vector<2x32xbf16>, vector<32x128xbf16>, vector<2x128xf32> -> vector<2x128xf32>
    %cst_82 = arith.constant dense<0.000000e+00> : vector<2x128xf32>
    %329 = tpu.matmul %326, %8, %cst_82 {dimension_numbers = #tpu.dot_dimension_numbers<[1], [0], [0], [1], [0, 0, 1, 1], [], []>} : vector<2x32xbf16>, vector<32x128xbf16>, vector<2x128xf32> -> vector<2x128xf32>
    %330 = arith.addf %329, %328 : vector<2x128xf32>
    %331 = vector.broadcast %12 : vector<1x128xf32> to vector<2x128xf32>
    %332 = arith.addf %330, %331 : vector<2x128xf32>
    %333 = vector.extract_strided_slice %332 {offsets = [0, 0], sizes = [2, 32], strides = [1, 1]} : vector<2x128xf32> to vector<2x32xf32>
    %334 = arith.negf %333 : vector<2x32xf32>
    %335 = math.exp %334 : vector<2x32xf32>
    %cst_83 = arith.constant 1.000000e+00 : f32
    %336 = vector.broadcast %cst_83 : f32 to vector<2x32xf32>
    %337 = arith.addf %336, %335 : vector<2x32xf32>
    %338 = arith.divf %336, %337 : vector<2x32xf32>
    %339 = vector.extract_strided_slice %332 {offsets = [0, 32], sizes = [2, 32], strides = [1, 1]} : vector<2x128xf32> to vector<2x32xf32>
    %340 = arith.negf %339 : vector<2x32xf32>
    %341 = math.exp %340 : vector<2x32xf32>
    %cst_84 = arith.constant 1.000000e+00 : f32
    %342 = vector.broadcast %cst_84 : f32 to vector<2x32xf32>
    %343 = arith.addf %342, %341 : vector<2x32xf32>
    %344 = arith.divf %342, %343 : vector<2x32xf32>
    %345 = vector.extract_strided_slice %332 {offsets = [0, 64], sizes = [2, 32], strides = [1, 1]} : vector<2x128xf32> to vector<2x32xf32>
    %346 = math.tanh %345 : vector<2x32xf32>
    %347 = vector.extract_strided_slice %332 {offsets = [0, 96], sizes = [2, 32], strides = [1, 1]} : vector<2x128xf32> to vector<2x32xf32>
    %348 = arith.negf %347 : vector<2x32xf32>
    %349 = math.exp %348 : vector<2x32xf32>
    %cst_85 = arith.constant 1.000000e+00 : f32
    %350 = vector.broadcast %cst_85 : f32 to vector<2x32xf32>
    %351 = arith.addf %350, %349 : vector<2x32xf32>
    %352 = arith.divf %350, %351 : vector<2x32xf32>
    %353 = arith.mulf %344, %288 : vector<2x32xf32>
    %354 = arith.mulf %338, %346 : vector<2x32xf32>
    %355 = arith.addf %353, %354 : vector<2x32xf32>
    %356 = math.tanh %355 : vector<2x32xf32>
    %357 = arith.mulf %352, %356 : vector<2x32xf32>
    %c4 = arith.constant 4 : index
    %c0_86 = arith.constant 0 : index
    %c0_87 = arith.constant 0 : index
    %358 = vector.load %arg19[%c4, %c0_86, %c0_87] : memref<8x2x32xf32, #tpu.memory_space<vmem>>, vector<1x2x32xf32>
    %359 = vector.shape_cast %358 : vector<1x2x32xf32> to vector<2x32xf32>
    %360 = vector.shape_cast %357 : vector<2x32xf32> to vector<1x2x32xf32>
    tpu.vector_store %arg19[%c4, %c0_86, %c0_87], %360 {strides = array<i32>} : memref<8x2x32xf32, #tpu.memory_space<vmem>>, vector<1x2x32xf32>,
    %361 = vector.extract_strided_slice %25 {offsets = [5, 0, 0], sizes = [1, 2, 128], strides = [1, 1, 1]} : vector<8x2x128xf32> to vector<1x2x128xf32>
    %362 = vector.shape_cast %361 : vector<1x2x128xf32> to vector<2x128xf32>
    %363 = arith.truncf %325 : vector<2x32xf32> to vector<2x32xbf16>
    %cst_88 = arith.constant dense<0.000000e+00> : vector<2x128xf32>
    %364 = tpu.matmul %363, %4, %cst_88 {dimension_numbers = #tpu.dot_dimension_numbers<[1], [0], [0], [1], [0, 0, 1, 1], [], []>} : vector<2x32xbf16>, vector<32x128xbf16>, vector<2x128xf32> -> vector<2x128xf32>
    %365 = arith.addf %362, %364 : vector<2x128xf32>
    %366 = vector.broadcast %10 : vector<1x128xf32> to vector<2x128xf32>
    %367 = arith.addf %365, %366 : vector<2x128xf32>
    %368 = vector.extract_strided_slice %367 {offsets = [0, 0], sizes = [2, 32], strides = [1, 1]} : vector<2x128xf32> to vector<2x32xf32>
    %369 = arith.negf %368 : vector<2x32xf32>
    %370 = math.exp %369 : vector<2x32xf32>
    %cst_89 = arith.constant 1.000000e+00 : f32
    %371 = vector.broadcast %cst_89 : f32 to vector<2x32xf32>
    %372 = arith.addf %371, %370 : vector<2x32xf32>
    %373 = arith.divf %371, %372 : vector<2x32xf32>
    %374 = vector.extract_strided_slice %367 {offsets = [0, 32], sizes = [2, 32], strides = [1, 1]} : vector<2x128xf32> to vector<2x32xf32>
    %375 = arith.negf %374 : vector<2x32xf32>
    %376 = math.exp %375 : vector<2x32xf32>
    %cst_90 = arith.constant 1.000000e+00 : f32
    %377 = vector.broadcast %cst_90 : f32 to vector<2x32xf32>
    %378 = arith.addf %377, %376 : vector<2x32xf32>
    %379 = arith.divf %377, %378 : vector<2x32xf32>
    %380 = vector.extract_strided_slice %367 {offsets = [0, 64], sizes = [2, 32], strides = [1, 1]} : vector<2x128xf32> to vector<2x32xf32>
    %381 = math.tanh %380 : vector<2x32xf32>
    %382 = vector.extract_strided_slice %367 {offsets = [0, 96], sizes = [2, 32], strides = [1, 1]} : vector<2x128xf32> to vector<2x32xf32>
    %383 = arith.negf %382 : vector<2x32xf32>
    %384 = math.exp %383 : vector<2x32xf32>
    %cst_91 = arith.constant 1.000000e+00 : f32
    %385 = vector.broadcast %cst_91 : f32 to vector<2x32xf32>
    %386 = arith.addf %385, %384 : vector<2x32xf32>
    %387 = arith.divf %385, %386 : vector<2x32xf32>
    %388 = arith.mulf %379, %323 : vector<2x32xf32>
    %389 = arith.mulf %373, %381 : vector<2x32xf32>
    %390 = arith.addf %388, %389 : vector<2x32xf32>
    %391 = math.tanh %390 : vector<2x32xf32>
    %392 = arith.mulf %387, %391 : vector<2x32xf32>
    %393 = arith.truncf %392 : vector<2x32xf32> to vector<2x32xbf16>
    %394 = arith.truncf %357 : vector<2x32xf32> to vector<2x32xbf16>
    %cst_92 = arith.constant dense<0.000000e+00> : vector<2x128xf32>
    %395 = tpu.matmul %394, %6, %cst_92 {dimension_numbers = #tpu.dot_dimension_numbers<[1], [0], [0], [1], [0, 0, 1, 1], [], []>} : vector<2x32xbf16>, vector<32x128xbf16>, vector<2x128xf32> -> vector<2x128xf32>
    %cst_93 = arith.constant dense<0.000000e+00> : vector<2x128xf32>
    %396 = tpu.matmul %393, %8, %cst_93 {dimension_numbers = #tpu.dot_dimension_numbers<[1], [0], [0], [1], [0, 0, 1, 1], [], []>} : vector<2x32xbf16>, vector<32x128xbf16>, vector<2x128xf32> -> vector<2x128xf32>
    %397 = arith.addf %396, %395 : vector<2x128xf32>
    %398 = vector.broadcast %12 : vector<1x128xf32> to vector<2x128xf32>
    %399 = arith.addf %397, %398 : vector<2x128xf32>
    %400 = vector.extract_strided_slice %399 {offsets = [0, 0], sizes = [2, 32], strides = [1, 1]} : vector<2x128xf32> to vector<2x32xf32>
    %401 = arith.negf %400 : vector<2x32xf32>
    %402 = math.exp %401 : vector<2x32xf32>
    %cst_94 = arith.constant 1.000000e+00 : f32
    %403 = vector.broadcast %cst_94 : f32 to vector<2x32xf32>
    %404 = arith.addf %403, %402 : vector<2x32xf32>
    %405 = arith.divf %403, %404 : vector<2x32xf32>
    %406 = vector.extract_strided_slice %399 {offsets = [0, 32], sizes = [2, 32], strides = [1, 1]} : vector<2x128xf32> to vector<2x32xf32>
    %407 = arith.negf %406 : vector<2x32xf32>
    %408 = math.exp %407 : vector<2x32xf32>
    %cst_95 = arith.constant 1.000000e+00 : f32
    %409 = vector.broadcast %cst_95 : f32 to vector<2x32xf32>
    %410 = arith.addf %409, %408 : vector<2x32xf32>
    %411 = arith.divf %409, %410 : vector<2x32xf32>
    %412 = vector.extract_strided_slice %399 {offsets = [0, 64], sizes = [2, 32], strides = [1, 1]} : vector<2x128xf32> to vector<2x32xf32>
    %413 = math.tanh %412 : vector<2x32xf32>
    %414 = vector.extract_strided_slice %399 {offsets = [0, 96], sizes = [2, 32], strides = [1, 1]} : vector<2x128xf32> to vector<2x32xf32>
    %415 = arith.negf %414 : vector<2x32xf32>
    %416 = math.exp %415 : vector<2x32xf32>
    %cst_96 = arith.constant 1.000000e+00 : f32
    %417 = vector.broadcast %cst_96 : f32 to vector<2x32xf32>
    %418 = arith.addf %417, %416 : vector<2x32xf32>
    %419 = arith.divf %417, %418 : vector<2x32xf32>
    %420 = arith.mulf %411, %355 : vector<2x32xf32>
    %421 = arith.mulf %405, %413 : vector<2x32xf32>
    %422 = arith.addf %420, %421 : vector<2x32xf32>
    %423 = math.tanh %422 : vector<2x32xf32>
    %424 = arith.mulf %419, %423 : vector<2x32xf32>
    %c5 = arith.constant 5 : index
    %c0_97 = arith.constant 0 : index
    %c0_98 = arith.constant 0 : index
    %425 = vector.load %arg19[%c5, %c0_97, %c0_98] : memref<8x2x32xf32, #tpu.memory_space<vmem>>, vector<1x2x32xf32>
    %426 = vector.shape_cast %425 : vector<1x2x32xf32> to vector<2x32xf32>
    %427 = vector.shape_cast %424 : vector<2x32xf32> to vector<1x2x32xf32>
    tpu.vector_store %arg19[%c5, %c0_97, %c0_98], %427 {strides = array<i32>} : memref<8x2x32xf32, #tpu.memory_space<vmem>>, vector<1x2x32xf32>,
    %428 = vector.extract_strided_slice %25 {offsets = [6, 0, 0], sizes = [1, 2, 128], strides = [1, 1, 1]} : vector<8x2x128xf32> to vector<1x2x128xf32>
    %429 = vector.shape_cast %428 : vector<1x2x128xf32> to vector<2x128xf32>
    %430 = arith.truncf %392 : vector<2x32xf32> to vector<2x32xbf16>
    %cst_99 = arith.constant dense<0.000000e+00> : vector<2x128xf32>
    %431 = tpu.matmul %430, %4, %cst_99 {dimension_numbers = #tpu.dot_dimension_numbers<[1], [0], [0], [1], [0, 0, 1, 1], [], []>} : vector<2x32xbf16>, vector<32x128xbf16>, vector<2x128xf32> -> vector<2x128xf32>
    %432 = arith.addf %429, %431 : vector<2x128xf32>
    %433 = vector.broadcast %10 : vector<1x128xf32> to vector<2x128xf32>
    %434 = arith.addf %432, %433 : vector<2x128xf32>
    %435 = vector.extract_strided_slice %434 {offsets = [0, 0], sizes = [2, 32], strides = [1, 1]} : vector<2x128xf32> to vector<2x32xf32>
    %436 = arith.negf %435 : vector<2x32xf32>
    %437 = math.exp %436 : vector<2x32xf32>
    %cst_100 = arith.constant 1.000000e+00 : f32
    %438 = vector.broadcast %cst_100 : f32 to vector<2x32xf32>
    %439 = arith.addf %438, %437 : vector<2x32xf32>
    %440 = arith.divf %438, %439 : vector<2x32xf32>
    %441 = vector.extract_strided_slice %434 {offsets = [0, 32], sizes = [2, 32], strides = [1, 1]} : vector<2x128xf32> to vector<2x32xf32>
    %442 = arith.negf %441 : vector<2x32xf32>
    %443 = math.exp %442 : vector<2x32xf32>
    %cst_101 = arith.constant 1.000000e+00 : f32
    %444 = vector.broadcast %cst_101 : f32 to vector<2x32xf32>
    %445 = arith.addf %444, %443 : vector<2x32xf32>
    %446 = arith.divf %444, %445 : vector<2x32xf32>
    %447 = vector.extract_strided_slice %434 {offsets = [0, 64], sizes = [2, 32], strides = [1, 1]} : vector<2x128xf32> to vector<2x32xf32>
    %448 = math.tanh %447 : vector<2x32xf32>
    %449 = vector.extract_strided_slice %434 {offsets = [0, 96], sizes = [2, 32], strides = [1, 1]} : vector<2x128xf32> to vector<2x32xf32>
    %450 = arith.negf %449 : vector<2x32xf32>
    %451 = math.exp %450 : vector<2x32xf32>
    %cst_102 = arith.constant 1.000000e+00 : f32
    %452 = vector.broadcast %cst_102 : f32 to vector<2x32xf32>
    %453 = arith.addf %452, %451 : vector<2x32xf32>
    %454 = arith.divf %452, %453 : vector<2x32xf32>
    %455 = arith.mulf %446, %390 : vector<2x32xf32>
    %456 = arith.mulf %440, %448 : vector<2x32xf32>
    %457 = arith.addf %455, %456 : vector<2x32xf32>
    %458 = math.tanh %457 : vector<2x32xf32>
    %459 = arith.mulf %454, %458 : vector<2x32xf32>
    %460 = arith.truncf %459 : vector<2x32xf32> to vector<2x32xbf16>
    %461 = arith.truncf %424 : vector<2x32xf32> to vector<2x32xbf16>
    %cst_103 = arith.constant dense<0.000000e+00> : vector<2x128xf32>
    %462 = tpu.matmul %461, %6, %cst_103 {dimension_numbers = #tpu.dot_dimension_numbers<[1], [0], [0], [1], [0, 0, 1, 1], [], []>} : vector<2x32xbf16>, vector<32x128xbf16>, vector<2x128xf32> -> vector<2x128xf32>
    %cst_104 = arith.constant dense<0.000000e+00> : vector<2x128xf32>
    %463 = tpu.matmul %460, %8, %cst_104 {dimension_numbers = #tpu.dot_dimension_numbers<[1], [0], [0], [1], [0, 0, 1, 1], [], []>} : vector<2x32xbf16>, vector<32x128xbf16>, vector<2x128xf32> -> vector<2x128xf32>
    %464 = arith.addf %463, %462 : vector<2x128xf32>
    %465 = vector.broadcast %12 : vector<1x128xf32> to vector<2x128xf32>
    %466 = arith.addf %464, %465 : vector<2x128xf32>
    %467 = vector.extract_strided_slice %466 {offsets = [0, 0], sizes = [2, 32], strides = [1, 1]} : vector<2x128xf32> to vector<2x32xf32>
    %468 = arith.negf %467 : vector<2x32xf32>
    %469 = math.exp %468 : vector<2x32xf32>
    %cst_105 = arith.constant 1.000000e+00 : f32
    %470 = vector.broadcast %cst_105 : f32 to vector<2x32xf32>
    %471 = arith.addf %470, %469 : vector<2x32xf32>
    %472 = arith.divf %470, %471 : vector<2x32xf32>
    %473 = vector.extract_strided_slice %466 {offsets = [0, 32], sizes = [2, 32], strides = [1, 1]} : vector<2x128xf32> to vector<2x32xf32>
    %474 = arith.negf %473 : vector<2x32xf32>
    %475 = math.exp %474 : vector<2x32xf32>
    %cst_106 = arith.constant 1.000000e+00 : f32
    %476 = vector.broadcast %cst_106 : f32 to vector<2x32xf32>
    %477 = arith.addf %476, %475 : vector<2x32xf32>
    %478 = arith.divf %476, %477 : vector<2x32xf32>
    %479 = vector.extract_strided_slice %466 {offsets = [0, 64], sizes = [2, 32], strides = [1, 1]} : vector<2x128xf32> to vector<2x32xf32>
    %480 = math.tanh %479 : vector<2x32xf32>
    %481 = vector.extract_strided_slice %466 {offsets = [0, 96], sizes = [2, 32], strides = [1, 1]} : vector<2x128xf32> to vector<2x32xf32>
    %482 = arith.negf %481 : vector<2x32xf32>
    %483 = math.exp %482 : vector<2x32xf32>
    %cst_107 = arith.constant 1.000000e+00 : f32
    %484 = vector.broadcast %cst_107 : f32 to vector<2x32xf32>
    %485 = arith.addf %484, %483 : vector<2x32xf32>
    %486 = arith.divf %484, %485 : vector<2x32xf32>
    %487 = arith.mulf %478, %422 : vector<2x32xf32>
    %488 = arith.mulf %472, %480 : vector<2x32xf32>
    %489 = arith.addf %487, %488 : vector<2x32xf32>
    %490 = math.tanh %489 : vector<2x32xf32>
    %491 = arith.mulf %486, %490 : vector<2x32xf32>
    %c6 = arith.constant 6 : index
    %c0_108 = arith.constant 0 : index
    %c0_109 = arith.constant 0 : index
    %492 = vector.load %arg19[%c6, %c0_108, %c0_109] : memref<8x2x32xf32, #tpu.memory_space<vmem>>, vector<1x2x32xf32>
    %493 = vector.shape_cast %492 : vector<1x2x32xf32> to vector<2x32xf32>
    %494 = vector.shape_cast %491 : vector<2x32xf32> to vector<1x2x32xf32>
    tpu.vector_store %arg19[%c6, %c0_108, %c0_109], %494 {strides = array<i32>} : memref<8x2x32xf32, #tpu.memory_space<vmem>>, vector<1x2x32xf32>,
    %495 = vector.extract_strided_slice %25 {offsets = [7, 0, 0], sizes = [1, 2, 128], strides = [1, 1, 1]} : vector<8x2x128xf32> to vector<1x2x128xf32>
    %496 = vector.shape_cast %495 : vector<1x2x128xf32> to vector<2x128xf32>
    %497 = arith.truncf %459 : vector<2x32xf32> to vector<2x32xbf16>
    %cst_110 = arith.constant dense<0.000000e+00> : vector<2x128xf32>
    %498 = tpu.matmul %497, %4, %cst_110 {dimension_numbers = #tpu.dot_dimension_numbers<[1], [0], [0], [1], [0, 0, 1, 1], [], []>} : vector<2x32xbf16>, vector<32x128xbf16>, vector<2x128xf32> -> vector<2x128xf32>
    %499 = arith.addf %496, %498 : vector<2x128xf32>
    %500 = vector.broadcast %10 : vector<1x128xf32> to vector<2x128xf32>
    %501 = arith.addf %499, %500 : vector<2x128xf32>
    %502 = vector.extract_strided_slice %501 {offsets = [0, 0], sizes = [2, 32], strides = [1, 1]} : vector<2x128xf32> to vector<2x32xf32>
    %503 = arith.negf %502 : vector<2x32xf32>
    %504 = math.exp %503 : vector<2x32xf32>
    %cst_111 = arith.constant 1.000000e+00 : f32
    %505 = vector.broadcast %cst_111 : f32 to vector<2x32xf32>
    %506 = arith.addf %505, %504 : vector<2x32xf32>
    %507 = arith.divf %505, %506 : vector<2x32xf32>
    %508 = vector.extract_strided_slice %501 {offsets = [0, 32], sizes = [2, 32], strides = [1, 1]} : vector<2x128xf32> to vector<2x32xf32>
    %509 = arith.negf %508 : vector<2x32xf32>
    %510 = math.exp %509 : vector<2x32xf32>
    %cst_112 = arith.constant 1.000000e+00 : f32
    %511 = vector.broadcast %cst_112 : f32 to vector<2x32xf32>
    %512 = arith.addf %511, %510 : vector<2x32xf32>
    %513 = arith.divf %511, %512 : vector<2x32xf32>
    %514 = vector.extract_strided_slice %501 {offsets = [0, 64], sizes = [2, 32], strides = [1, 1]} : vector<2x128xf32> to vector<2x32xf32>
    %515 = math.tanh %514 : vector<2x32xf32>
    %516 = vector.extract_strided_slice %501 {offsets = [0, 96], sizes = [2, 32], strides = [1, 1]} : vector<2x128xf32> to vector<2x32xf32>
    %517 = arith.negf %516 : vector<2x32xf32>
    %518 = math.exp %517 : vector<2x32xf32>
    %cst_113 = arith.constant 1.000000e+00 : f32
    %519 = vector.broadcast %cst_113 : f32 to vector<2x32xf32>
    %520 = arith.addf %519, %518 : vector<2x32xf32>
    %521 = arith.divf %519, %520 : vector<2x32xf32>
    %522 = arith.mulf %513, %457 : vector<2x32xf32>
    %523 = arith.mulf %507, %515 : vector<2x32xf32>
    %524 = arith.addf %522, %523 : vector<2x32xf32>
    %525 = math.tanh %524 : vector<2x32xf32>
    %526 = arith.mulf %521, %525 : vector<2x32xf32>
    %527 = arith.truncf %526 : vector<2x32xf32> to vector<2x32xbf16>
    %528 = arith.truncf %491 : vector<2x32xf32> to vector<2x32xbf16>
    %cst_114 = arith.constant dense<0.000000e+00> : vector<2x128xf32>
    %529 = tpu.matmul %528, %6, %cst_114 {dimension_numbers = #tpu.dot_dimension_numbers<[1], [0], [0], [1], [0, 0, 1, 1], [], []>} : vector<2x32xbf16>, vector<32x128xbf16>, vector<2x128xf32> -> vector<2x128xf32>
    %cst_115 = arith.constant dense<0.000000e+00> : vector<2x128xf32>
    %530 = tpu.matmul %527, %8, %cst_115 {dimension_numbers = #tpu.dot_dimension_numbers<[1], [0], [0], [1], [0, 0, 1, 1], [], []>} : vector<2x32xbf16>, vector<32x128xbf16>, vector<2x128xf32> -> vector<2x128xf32>
    %531 = arith.addf %530, %529 : vector<2x128xf32>
    %532 = vector.broadcast %12 : vector<1x128xf32> to vector<2x128xf32>
    %533 = arith.addf %531, %532 : vector<2x128xf32>
    %534 = vector.extract_strided_slice %533 {offsets = [0, 0], sizes = [2, 32], strides = [1, 1]} : vector<2x128xf32> to vector<2x32xf32>
    %535 = arith.negf %534 : vector<2x32xf32>
    %536 = math.exp %535 : vector<2x32xf32>
    %cst_116 = arith.constant 1.000000e+00 : f32
    %537 = vector.broadcast %cst_116 : f32 to vector<2x32xf32>
    %538 = arith.addf %537, %536 : vector<2x32xf32>
    %539 = arith.divf %537, %538 : vector<2x32xf32>
    %540 = vector.extract_strided_slice %533 {offsets = [0, 32], sizes = [2, 32], strides = [1, 1]} : vector<2x128xf32> to vector<2x32xf32>
    %541 = arith.negf %540 : vector<2x32xf32>
    %542 = math.exp %541 : vector<2x32xf32>
    %cst_117 = arith.constant 1.000000e+00 : f32
    %543 = vector.broadcast %cst_117 : f32 to vector<2x32xf32>
    %544 = arith.addf %543, %542 : vector<2x32xf32>
    %545 = arith.divf %543, %544 : vector<2x32xf32>
    %546 = vector.extract_strided_slice %533 {offsets = [0, 64], sizes = [2, 32], strides = [1, 1]} : vector<2x128xf32> to vector<2x32xf32>
    %547 = math.tanh %546 : vector<2x32xf32>
    %548 = vector.extract_strided_slice %533 {offsets = [0, 96], sizes = [2, 32], strides = [1, 1]} : vector<2x128xf32> to vector<2x32xf32>
    %549 = arith.negf %548 : vector<2x32xf32>
    %550 = math.exp %549 : vector<2x32xf32>
    %cst_118 = arith.constant 1.000000e+00 : f32
    %551 = vector.broadcast %cst_118 : f32 to vector<2x32xf32>
    %552 = arith.addf %551, %550 : vector<2x32xf32>
    %553 = arith.divf %551, %552 : vector<2x32xf32>
    %554 = arith.mulf %545, %489 : vector<2x32xf32>
    %555 = arith.mulf %539, %547 : vector<2x32xf32>
    %556 = arith.addf %554, %555 : vector<2x32xf32>
    %557 = math.tanh %556 : vector<2x32xf32>
    %558 = arith.mulf %553, %557 : vector<2x32xf32>
    %c7 = arith.constant 7 : index
    %c0_119 = arith.constant 0 : index
    %c0_120 = arith.constant 0 : index
    %559 = vector.load %arg19[%c7, %c0_119, %c0_120] : memref<8x2x32xf32, #tpu.memory_space<vmem>>, vector<1x2x32xf32>
    %560 = vector.shape_cast %559 : vector<1x2x32xf32> to vector<2x32xf32>
    %561 = vector.shape_cast %558 : vector<2x32xf32> to vector<1x2x32xf32>
    tpu.vector_store %arg19[%c7, %c0_119, %c0_120], %561 {strides = array<i32>} : memref<8x2x32xf32, #tpu.memory_space<vmem>>, vector<1x2x32xf32>,
    %c0_121 = arith.constant 0 : index
    %c0_122 = arith.constant 0 : index
    %c0_123 = arith.constant 0 : index
    %562 = vector.load %arg17[%c0_121, %c0_122, %c0_123] : memref<2x2x32xf32, #tpu.memory_space<vmem>>, vector<1x2x32xf32>
    %563 = vector.shape_cast %562 : vector<1x2x32xf32> to vector<2x32xf32>
    %564 = vector.shape_cast %526 : vector<2x32xf32> to vector<1x2x32xf32>
    tpu.vector_store %arg17[%c0_121, %c0_122, %c0_123], %564 {strides = array<i32>} : memref<2x2x32xf32, #tpu.memory_space<vmem>>, vector<1x2x32xf32>,
    %c0_124 = arith.constant 0 : index
    %c0_125 = arith.constant 0 : index
    %c0_126 = arith.constant 0 : index
    %565 = vector.load %arg18[%c0_124, %c0_125, %c0_126] : memref<2x2x32xf32, #tpu.memory_space<vmem>>, vector<1x2x32xf32>
    %566 = vector.shape_cast %565 : vector<1x2x32xf32> to vector<2x32xf32>
    %567 = vector.shape_cast %524 : vector<2x32xf32> to vector<1x2x32xf32>
    tpu.vector_store %arg18[%c0_124, %c0_125, %c0_126], %567 {strides = array<i32>} : memref<2x2x32xf32, #tpu.memory_space<vmem>>, vector<1x2x32xf32>,
    %c1_127 = arith.constant 1 : index
    %c0_128 = arith.constant 0 : index
    %c0_129 = arith.constant 0 : index
    %568 = vector.load %arg17[%c1_127, %c0_128, %c0_129] : memref<2x2x32xf32, #tpu.memory_space<vmem>>, vector<1x2x32xf32>
    %569 = vector.shape_cast %568 : vector<1x2x32xf32> to vector<2x32xf32>
    %570 = vector.shape_cast %558 : vector<2x32xf32> to vector<1x2x32xf32>
    tpu.vector_store %arg17[%c1_127, %c0_128, %c0_129], %570 {strides = array<i32>} : memref<2x2x32xf32, #tpu.memory_space<vmem>>, vector<1x2x32xf32>,
    %c1_130 = arith.constant 1 : index
    %c0_131 = arith.constant 0 : index
    %c0_132 = arith.constant 0 : index
    %571 = vector.load %arg18[%c1_130, %c0_131, %c0_132] : memref<2x2x32xf32, #tpu.memory_space<vmem>>, vector<1x2x32xf32>
    %572 = vector.shape_cast %571 : vector<1x2x32xf32> to vector<2x32xf32>
    %573 = vector.shape_cast %556 : vector<2x32xf32> to vector<1x2x32xf32>
    tpu.vector_store %arg18[%c1_130, %c0_131, %c0_132], %573 {strides = array<i32>} : memref<2x2x32xf32, #tpu.memory_space<vmem>>, vector<1x2x32xf32>,
    %c0_133 = arith.constant 0 : index
    %c0_134 = arith.constant 0 : index
    %c0_135 = arith.constant 0 : index
    %574 = vector.load %arg3[%c0_133, %c0_134, %c0_135] : memref<2x10x32xbf16, #tpu.memory_space<vmem>>, vector<2x10x32xbf16>
    %c0_136 = arith.constant 0 : index
    %c0_137 = arith.constant 0 : index
    %c0_138 = arith.constant 0 : index
    %575 = vector.load %arg19[%c0_136, %c0_137, %c0_138] : memref<8x2x32xf32, #tpu.memory_space<vmem>>, vector<8x2x32xf32>
    %576 = tpu.transpose %575, [1, 0, 2] : vector<8x2x32xf32> -> vector<2x8x32xf32>
    %577 = arith.truncf %576 : vector<2x8x32xf32> to vector<2x8x32xbf16>
    %578 = vector.shape_cast %577 : vector<2x8x32xbf16> to vector<16x32xbf16>
    %c0_139 = arith.constant 0 : index
    %c0_140 = arith.constant 0 : index
    %579 = vector.load %arg10[%c0_139, %c0_140] : memref<32x32xbf16, #tpu.memory_space<vmem>>, vector<32x32xbf16>
    %cst_141 = arith.constant dense<0.000000e+00> : vector<16x32xf32>
    %580 = tpu.matmul %578, %579, %cst_141 {dimension_numbers = #tpu.dot_dimension_numbers<[1], [0], [0], [1], [0, 0, 1, 1], [], []>} : vector<16x32xbf16>, vector<32x32xbf16>, vector<16x32xf32> -> vector<16x32xf32>
    %c0_142 = arith.constant 0 : index
    %c0_143 = arith.constant 0 : index
    %581 = vector.load %arg11[%c0_142, %c0_143] : memref<1x32xf32, #tpu.memory_space<vmem>>, vector<1x32xf32>
    %582 = vector.broadcast %581 : vector<1x32xf32> to vector<16x32xf32>
    %583 = arith.addf %580, %582 : vector<16x32xf32>
    %584 = vector.shape_cast %583 : vector<16x32xf32> to vector<2x8x32xf32>
    %585 = arith.truncf %584 : vector<2x8x32xf32> to vector<2x8x32xbf16>
    "tpu.trace_start"() <{level = 10 : i32, message = "bsh,bth->bst"}> : () -> ()
    %cst_144 = arith.constant dense<0.000000e+00> : vector<2x8x10xf32>
    %586 = tpu.matmul %585, %574, %cst_144 {dimension_numbers = #tpu.dot_dimension_numbers<[2], [2], [1], [1], [0, 0, 0, 1, 1, 1], [0], [0]>} : vector<2x8x32xbf16>, vector<2x10x32xbf16>, vector<2x8x10xf32> -> vector<2x8x10xf32>
    "tpu.trace_stop"() : () -> ()
    %cst_145 = arith.constant dense<0xFF800000> : vector<2x8xf32>
    %587 = vector.multi_reduction <maximumf>, %586, %cst_145 [2] : vector<2x8x10xf32> to vector<2x8xf32>
    %588 = vector.shape_cast %587 : vector<2x8xf32> to vector<2x8x1xf32>
    %589 = vector.broadcast %588 : vector<2x8x1xf32> to vector<2x8x10xf32>
    %590 = arith.subf %586, %589 : vector<2x8x10xf32>
    %591 = math.exp %590 : vector<2x8x10xf32>
    %cst_146 = arith.constant dense<0.000000e+00> : vector<2x8xf32>
    %592 = vector.multi_reduction <add>, %591, %cst_146 [2] : vector<2x8x10xf32> to vector<2x8xf32>
    %593 = vector.shape_cast %592 : vector<2x8xf32> to vector<2x8x1xf32>
    %594 = vector.broadcast %593 : vector<2x8x1xf32> to vector<2x8x10xf32>
    %595 = arith.divf %591, %594 : vector<2x8x10xf32>
    %596 = arith.truncf %595 : vector<2x8x10xf32> to vector<2x8x10xbf16>
    "tpu.trace_start"() <{level = 10 : i32, message = "bst,bth->bsh"}> : () -> ()
    %cst_147 = arith.constant dense<0.000000e+00> : vector<2x8x32xf32>
    %597 = tpu.matmul %596, %574, %cst_147 {dimension_numbers = #tpu.dot_dimension_numbers<[2], [1], [1], [2], [0, 0, 0, 1, 1, 2], [0], [0]>} : vector<2x8x10xbf16>, vector<2x10x32xbf16>, vector<2x8x32xf32> -> vector<2x8x32xf32>
    "tpu.trace_stop"() : () -> ()
    %598 = vector.shape_cast %597 : vector<2x8x32xf32> to vector<16x32xf32>
    %599 = arith.truncf %598 : vector<16x32xf32> to vector<16x32xbf16>
    %c0_148 = arith.constant 0 : index
    %c0_149 = arith.constant 0 : index
    %600 = vector.load %arg12[%c0_148, %c0_149] : memref<32x32xbf16, #tpu.memory_space<vmem>>, vector<32x32xbf16>
    %cst_150 = arith.constant dense<0.000000e+00> : vector<16x32xf32>
    %601 = tpu.matmul %599, %600, %cst_150 {dimension_numbers = #tpu.dot_dimension_numbers<[1], [0], [0], [1], [0, 0, 1, 1], [], []>} : vector<16x32xbf16>, vector<32x32xbf16>, vector<16x32xf32> -> vector<16x32xf32>
    %c0_151 = arith.constant 0 : index
    %c0_152 = arith.constant 0 : index
    %602 = vector.load %arg13[%c0_151, %c0_152] : memref<32x32xbf16, #tpu.memory_space<vmem>>, vector<32x32xbf16>
    %cst_153 = arith.constant dense<0.000000e+00> : vector<16x32xf32>
    %603 = tpu.matmul %578, %602, %cst_153 {dimension_numbers = #tpu.dot_dimension_numbers<[1], [0], [0], [1], [0, 0, 1, 1], [], []>} : vector<16x32xbf16>, vector<32x32xbf16>, vector<16x32xf32> -> vector<16x32xf32>
    %604 = arith.addf %601, %603 : vector<16x32xf32>
    %c0_154 = arith.constant 0 : index
    %c0_155 = arith.constant 0 : index
    %605 = vector.load %arg14[%c0_154, %c0_155] : memref<1x32xf32, #tpu.memory_space<vmem>>, vector<1x32xf32>
    %606 = vector.broadcast %605 : vector<1x32xf32> to vector<16x32xf32>
    %607 = arith.addf %604, %606 : vector<16x32xf32>
    %608 = math.tanh %607 : vector<16x32xf32>
    %609 = vector.shape_cast %608 : vector<16x32xf32> to vector<2x8x32xf32>
    %c0_156 = arith.constant 0 : index
    %c0_157 = arith.constant 0 : index
    %c0_158 = arith.constant 0 : index
    %610 = vector.load %arg15[%c0_156, %c0_157, %c0_158] : memref<2x8x32xf32, #tpu.memory_space<vmem>>, vector<2x8x32xf32>
    tpu.vector_store %arg15[%c0_156, %c0_157, %c0_158], %609 {strides = array<i32>} : memref<2x8x32xf32, #tpu.memory_space<vmem>>, vector<2x8x32xf32>,
    %c0_159 = arith.constant 0 : index
    %c0_160 = arith.constant 0 : index
    %c0_161 = arith.constant 0 : index
    %611 = vector.load %arg16[%c0_159, %c0_160, %c0_161] : memref<2x8x10xf32, #tpu.memory_space<vmem>>, vector<2x8x10xf32>
    tpu.vector_store %arg16[%c0_159, %c0_160, %c0_161], %595 {strides = array<i32>} : memref<2x8x10xf32, #tpu.memory_space<vmem>>, vector<2x8x10xf32>,
    return
  }
  func.func @transform_0(%arg0: i32, %arg1: i32) -> (i32, i32, i32) {
    %c0_i32 = arith.constant 0 : i32
    %c0_i32_0 = arith.constant 0 : i32
    return %arg1, %arg0, %c0_i32 : i32, i32, i32
  }
  func.func @transform_1(%arg0: i32, %arg1: i32) -> (i32, i32, i32) {
    %c0_i32 = arith.constant 0 : i32
    %c0_i32_0 = arith.constant 0 : i32
    %c0_i32_1 = arith.constant 0 : i32
    return %arg0, %c0_i32, %c0_i32_0 : i32, i32, i32
  }
  func.func @transform_2(%arg0: i32, %arg1: i32) -> (i32, i32, i32) {
    %c0_i32 = arith.constant 0 : i32
    %c0_i32_0 = arith.constant 0 : i32
    %c0_i32_1 = arith.constant 0 : i32
    return %c0_i32, %arg0, %c0_i32_0 : i32, i32, i32
  }
  func.func @transform_3(%arg0: i32, %arg1: i32) -> (i32, i32, i32) {
    %c0_i32 = arith.constant 0 : i32
    %c0_i32_0 = arith.constant 0 : i32
    %c0_i32_1 = arith.constant 0 : i32
    return %c0_i32, %arg0, %c0_i32_0 : i32, i32, i32
  }
  func.func @transform_4(%arg0: i32, %arg1: i32) -> (i32, i32) {
    %c0_i32 = arith.constant 0 : i32
    %c0_i32_0 = arith.constant 0 : i32
    %c0_i32_1 = arith.constant 0 : i32
    return %c0_i32, %c0_i32_0 : i32, i32
  }
  func.func @transform_5(%arg0: i32, %arg1: i32) -> (i32, i32, i32) {
    %c0_i32 = arith.constant 0 : i32
    %c0_i32_0 = arith.constant 0 : i32
    %c0_i32_1 = arith.constant 0 : i32
    %c0_i32_2 = arith.constant 0 : i32
    return %c0_i32, %c0_i32_0, %c0_i32_1 : i32, i32, i32
  }
  func.func @transform_6(%arg0: i32, %arg1: i32) -> (i32, i32, i32) {
    %c0_i32 = arith.constant 0 : i32
    %c0_i32_0 = arith.constant 0 : i32
    %c0_i32_1 = arith.constant 0 : i32
    %c0_i32_2 = arith.constant 0 : i32
    return %c0_i32, %c0_i32_0, %c0_i32_1 : i32, i32, i32
  }
  func.func @transform_7(%arg0: i32, %arg1: i32) -> (i32, i32, i32) {
    %c0_i32 = arith.constant 0 : i32
    %c0_i32_0 = arith.constant 0 : i32
    %c0_i32_1 = arith.constant 0 : i32
    %c0_i32_2 = arith.constant 0 : i32
    return %c0_i32, %c0_i32_0, %c0_i32_1 : i32, i32, i32
  }
  func.func @transform_8(%arg0: i32, %arg1: i32) -> (i32, i32) {
    %c0_i32 = arith.constant 0 : i32
    %c0_i32_0 = arith.constant 0 : i32
    %c0_i32_1 = arith.constant 0 : i32
    return %c0_i32, %c0_i32_0 : i32, i32
  }
  func.func @transform_9(%arg0: i32, %arg1: i32) -> (i32, i32) {
    %c0_i32 = arith.constant 0 : i32
    %c0_i32_0 = arith.constant 0 : i32
    %c0_i32_1 = arith.constant 0 : i32
    return %c0_i32, %c0_i32_0 : i32, i32
  }
  func.func @transform_10(%arg0: i32, %arg1: i32) -> (i32, i32) {
    %c0_i32 = arith.constant 0 : i32
    %c0_i32_0 = arith.constant 0 : i32
    %c0_i32_1 = arith.constant 0 : i32
    return %c0_i32, %c0_i32_0 : i32, i32
  }
  func.func @transform_11(%arg0: i32, %arg1: i32) -> (i32, i32) {
    %c0_i32 = arith.constant 0 : i32
    %c0_i32_0 = arith.constant 0 : i32
    %c0_i32_1 = arith.constant 0 : i32
    return %c0_i32, %c0_i32_0 : i32, i32
  }
  func.func @transform_12(%arg0: i32, %arg1: i32) -> (i32, i32) {
    %c0_i32 = arith.constant 0 : i32
    %c0_i32_0 = arith.constant 0 : i32
    %c0_i32_1 = arith.constant 0 : i32
    return %c0_i32, %c0_i32_0 : i32, i32
  }
  func.func @transform_13(%arg0: i32, %arg1: i32) -> (i32, i32, i32) {
    %c0_i32 = arith.constant 0 : i32
    %c0_i32_0 = arith.constant 0 : i32
    return %arg0, %arg1, %c0_i32 : i32, i32, i32
  }
  func.func @transform_14(%arg0: i32, %arg1: i32) -> (i32, i32, i32) {
    %c0_i32 = arith.constant 0 : i32
    %c0_i32_0 = arith.constant 0 : i32
    return %arg0, %arg1, %c0_i32 : i32, i32, i32
  }
  func.func @transform_15(%arg0: i32, %arg1: i32) -> (i32, i32, i32) {
    %c0_i32 = arith.constant 0 : i32
    %c0_i32_0 = arith.constant 0 : i32
    %c0_i32_1 = arith.constant 0 : i32
    return %c0_i32, %arg0, %c0_i32_0 : i32, i32, i32
  }
  func.func @transform_16(%arg0: i32, %arg1: i32) -> (i32, i32, i32) {
    %c0_i32 = arith.constant 0 : i32
    %c0_i32_0 = arith.constant 0 : i32
    %c0_i32_1 = arith.constant 0 : i32
    return %c0_i32, %arg0, %c0_i32_0 : i32, i32, i32
  }
}

</mosaic_0001>

<bundles_post_ra>
// kernel: tpu_custom_call.1
= control target key start
LH: loop header
LB: loop body
LE: loop exit
PB: predicated region body
PF: predicated region fallthrough
CT: control target
= control target key end

     0   :  { %s4159_s0 = inlined_call_operand.hbm [shape: bf16[8,2,32], index: 0, kind: input, shape index: {}]   ;;  %s4160_s1 = inlined_call_operand.vmem [shape: bf16[2,10,32], index: 1, kind: input, shape index: {}]   ;;  %s4161_s2 = inlined_call_operand.hbm [shape: f32[2,2,32], index: 2, kind: input, shape index: {}]   ;;  %s4162_s3 = inlined_call_operand.hbm [shape: f32[2,2,32], index: 3, kind: input, shape index: {}]   ;;  %s4163_s4 = inlined_call_operand.vmem [shape: bf16[32,128], index: 4, kind: input, shape index: {}]   ;;  %s4164_s5 = inlined_call_operand.hbm [shape: bf16[1,32,128], index: 5, kind: input, shape index: {}]   ;;  %s4165_s6 = inlined_call_operand.vmem [shape: bf16[2,32,128], index: 6, kind: input, shape index: {}]   ;;  %s4166_s7 = inlined_call_operand.vmem [shape: f32[2,1,128], index: 7, kind: input, shape index: {}]   ;;  %s4167_s8 = inlined_call_operand.hbm [shape: bf16[32,32], index: 8, kind: input, shape index: {}]   ;;  %s4168_s9 = inlined_call_operand.vmem [shape: f32[1,32], index: 9, kind: input, shape index: {}]   ;;  %s4169_s10 = inlined_call_operand.hbm [shape: bf16[32,32], index: 10, kind: input, shape index: {}]   ;;  %s4170_s11 = inlined_call_operand.vmem [shape: bf16[32,32], index: 11, kind: input, shape index: {}]   ;;  %s4171_s12 = inlined_call_operand.vmem [shape: f32[1,32], index: 12, kind: input, shape index: {}]   ;;  %s4172_s13 = inlined_call_operand.hbm [shape: f32[2,8,32], index: 13, kind: output, shape index: {0}]   ;;  %s4173_s14 = inlined_call_operand.hbm [shape: f32[2,8,10], index: 14, kind: output, shape index: {1}]   ;;  %s4174_s15 = inlined_call_operand.hbm [shape: f32[2,2,32], index: 15, kind: output, shape index: {2}]   ;;  %s4175_s16 = inlined_call_operand.hbm [shape: f32[2,2,32], index: 16, kind: output, shape index: {3}]  }
   0x1   :  { %4185 = sst [smem:[#allocation27_spill]] %s4159_s0 }
   0x2   :  { %22 = vsyncpa [#allocation4], 0 }
   0x3   :  { %23 = vsyncpa [#allocation7], 0 }
   0x4   :  { %24 = vsyncpa [#allocation10], 0 }
   0x5   :  { %25 = vsyncpa [#allocation13], 0 }
   0x6   :  { %26 = vsyncpa [#allocation5], 0 }
   0x7   :  { %27 = vsyncpa [#allocation16], 0 }
   0x8   :  { %28 = vsyncpa [#allocation19], 0  ;;  %s3363_s21 = smov [#allocation6]   ;;  %s3129_s25 = scalar_lea.hbm %s4161_s2, 64 }
   0x9   :  { %s48_s22 = sshll.u32 %s3363_s21, 4  ;;  %p3130_p0 = scmp.ne.s32.totalorder %s4161_s2, %s3129_s25  ;;  %s49_s22 = int_to_ptr.vmem [resolvable:$true] %s48_s22 }
   0xa   :  { %p3133_p1 = scmp.lt.u32.totalorder %s3129_s25, %s4161_s2 }
   0xc   :  { %p3135_p2 = pnand %p3133_p1, %p3130_p0 }
   0xe   :  { %3138 = shalt.err (!%p3135_p2)
}
   0xf   :  { %s3139_s30 = scalar_lea.vmem %s49_s22, 64  ;;  %p3144_p4 = scmp.lt.s32.totalorder %s49_s22, %s49_s22 }
  0x10   :  { %p3140_p3 = scmp.ne.s32.totalorder %s49_s22, %s3139_s30  ;;  %p3145_p5 = scmp.lt.s32.totalorder %s3139_s30, %s3139_s30 }
  0x12   :  { %p3146_p6 = por %p3145_p5, %p3144_p4 }
  0x14   :  { %p3147_p7 = pnand %p3146_p6, %p3140_p3 }
  0x16   :  { %3150 = shalt.err (!%p3147_p7)
}
  0x17   :  { %s4177_s0 = smov 32   ;;  %s4179_s17 = smov 2  }
  0x18   :  { %54 = dma.hbm_to_vmem [thread:$0]  %s4161_s2, 64, %s49_s22, [#allocation7], %s4177_s0, %s4177_s0, %s4179_s17  }
  0x19   :  { %s3366_s20 = smov [#allocation9]   ;;  %s3151_s25 = scalar_lea.hbm %s4164_s5, 256 }
  0x1a   :  { %s74_s21 = sshll.u32 %s3366_s20, 4  ;;  %p3152_p8 = scmp.ne.s32.totalorder %s4164_s5, %s3151_s25  ;;  %s75_s21 = int_to_ptr.vmem [resolvable:$true] %s74_s21 }
  0x1b   :  { %p3155_p9 = scmp.lt.u32.totalorder %s3151_s25, %s4164_s5 }
  0x1d   :  { %p3157_p10 = pnand %p3155_p9, %p3152_p8 }
  0x1f   :  { %3160 = shalt.err (!%p3157_p10)
}
  0x20   :  { %s3161_s30 = scalar_lea.vmem %s75_s21, 256  ;;  %p3166_p12 = scmp.lt.s32.totalorder %s75_s21, %s75_s21 }
  0x21   :  { %p3162_p11 = scmp.ne.s32.totalorder %s75_s21, %s3161_s30  ;;  %p3167_p13 = scmp.lt.s32.totalorder %s3161_s30, %s3161_s30 }
  0x23   :  { %p3168_p0 = por %p3167_p13, %p3166_p12 }
  0x25   :  { %p3169_p1 = pnand %p3168_p0, %p3162_p11 }
  0x27   :  { %3172 = shalt.err (!%p3169_p1)
}
  0x28   :  { %s4181_s2 = smov 64   ;;  %s4183_s22 = smov 4  }
  0x29   :  { %80 = dma.hbm_to_vmem [thread:$0]  %s4164_s5, 256, %s75_s21, [#allocation10], %s4181_s2, %s4181_s2, %s4183_s22  }
  0x2a   :  { %s3369_s20 = smov [#allocation3]   ;;  %s4186_s26 = sld [smem:[#allocation27_spill]] }
  0x2b   :  { %s34_s23 = sshll.u32 %s3369_s20, 4  ;;  %s35_s23 = int_to_ptr.vmem [resolvable:$true] %s34_s23 }
  0x30   :  { %s3173_s27 = scalar_lea.hbm %s4186_s26, 128 }
  0x31   :  { %p3174_p2 = scmp.ne.s32.totalorder %s4186_s26, %s3173_s27  ;;  %p3177_p3 = scmp.lt.u32.totalorder %s3173_s27, %s4186_s26 }
  0x33   :  { %p3179_p4 = pnand %p3177_p3, %p3174_p2 }
  0x35   :  { %3182 = shalt.err (!%p3179_p4)
}
  0x36   :  { %s3183_s17 = scalar_lea.vmem %s35_s23, 128  ;;  %p3188_p6 = scmp.lt.s32.totalorder %s35_s23, %s35_s23 }
  0x37   :  { %p3184_p5 = scmp.ne.s32.totalorder %s35_s23, %s3183_s17  ;;  %p3189_p7 = scmp.lt.s32.totalorder %s3183_s17, %s3183_s17 }
  0x39   :  { %p3190_p8 = por %p3189_p7, %p3188_p6 }
  0x3b   :  { %p3191_p9 = pnand %p3190_p8, %p3184_p5 }
  0x3d   :  { %3194 = shalt.err (!%p3191_p9)
}
  0x3e   :  { %s3370_s5 = smov 16   ;;  %s3371_s21 = smov 1  }
  0x3f   :  { %40 = dma.hbm_to_vmem [thread:$0]  %s4186_s26, 128, %s35_s23, [#allocation4], %s3370_s5, %s3370_s5, %s3371_s21  }
  0x40   :  { %s3372_s20 = smov [#allocation8]   ;;  %s3373_s0 = smov [#allocation11]  }
  0x41   :  { %s60_s24 = sshll.u32 %s3372_s20, 4  ;;  %s90_s25 = sshll.u32 %s3373_s0, 4  ;;  %s61_s24 = int_to_ptr.vmem [resolvable:$true] %s60_s24  ;;  %s91_s25 = int_to_ptr.vmem [resolvable:$true] %s90_s25 }
  0x42   :  { %s3195_s29 = scalar_lea.hbm %s4162_s3, 64 }
  0x43   :  { %p3196_p10 = scmp.ne.s32.totalorder %s4162_s3, %s3195_s29  ;;  %p3199_p11 = scmp.lt.u32.totalorder %s3195_s29, %s4162_s3 }
  0x45   :  { %p3201_p12 = pnand %p3199_p11, %p3196_p10 }
  0x47   :  { %3204 = shalt.err (!%p3201_p12)
}
  0x48   :  { %s3205_s23 = scalar_lea.vmem %s61_s24, 64  ;;  %p3210_p0 = scmp.lt.s32.totalorder %s61_s24, %s61_s24 }
  0x49   :  { %p3206_p13 = scmp.ne.s32.totalorder %s61_s24, %s3205_s23  ;;  %p3211_p1 = scmp.lt.s32.totalorder %s3205_s23, %s3205_s23 }
  0x4b   :  { %p3212_p2 = por %p3211_p1, %p3210_p0 }
  0x4d   :  { %p3213_p3 = pnand %p3212_p2, %p3206_p13 }
  0x4f   :  { %3216 = shalt.err (!%p3213_p3)
}
  0x50   :  { %s4187_s26 = smov 2   ;;  %s4188_s5 = smov 32  }
  0x51   :  { %66 = dma.hbm_to_vmem [thread:$0]  %s4162_s3, 64, %s61_s24, [#allocation7], %s4188_s5, %s4188_s5, %s4187_s26  }
  0x52   :  { %s3217_s22 = scalar_lea.hbm %s4167_s8, 256 }
  0x53   :  { %p3218_p4 = scmp.ne.s32.totalorder %s4167_s8, %s3217_s22  ;;  %p3221_p5 = scmp.lt.u32.totalorder %s3217_s22, %s4167_s8 }
  0x55   :  { %p3223_p6 = pnand %p3221_p5, %p3218_p4 }
  0x57   :  { %3226 = shalt.err (!%p3223_p6)
}
  0x58   :  { %s3227_s29 = scalar_lea.vmem %s91_s25, 256  ;;  %p3232_p8 = scmp.lt.s32.totalorder %s91_s25, %s91_s25 }
  0x59   :  { %p3228_p7 = scmp.ne.s32.totalorder %s91_s25, %s3227_s29  ;;  %p3233_p9 = scmp.lt.s32.totalorder %s3227_s29, %s3227_s29 }
  0x5b   :  { %p3234_p10 = por %p3233_p9, %p3232_p8 }
  0x5d   :  { %p3235_p11 = pnand %p3234_p10, %p3228_p7 }
  0x5f   :  { %3238 = shalt.err (!%p3235_p11)
}
  0x60   :  { %s4189_s3 = smov 4   ;;  %s4190_s24 = smov 64  }
  0x61   :  { %96 = dma.hbm_to_vmem [thread:$0]  %s4167_s8, 256, %s91_s25, [#allocation10], %s4190_s24, %s4190_s24, %s4189_s3  }
  0x62   :  { %s3374_s23 = smov [#allocation12]   ;;  %s3239_s2 = scalar_lea.hbm %s4169_s10, 256 }
  0x63   :  { %s104_s21 = sshll.u32 %s3374_s23, 4  ;;  %p3240_p12 = scmp.ne.s32.totalorder %s4169_s10, %s3239_s2  ;;  %s105_s21 = int_to_ptr.vmem [resolvable:$true] %s104_s21 }
  0x64   :  { %p3243_p13 = scmp.lt.u32.totalorder %s3239_s2, %s4169_s10 }
  0x66   :  { %p3245_p0 = pnand %p3243_p13, %p3240_p12 }
  0x68   :  { %3248 = shalt.err (!%p3245_p0)
}
  0x69   :  { %s3249_s28 = scalar_lea.vmem %s105_s21, 256  ;;  %p3254_p2 = scmp.lt.s32.totalorder %s105_s21, %s105_s21 }
  0x6a   :  { %p3250_p1 = scmp.ne.s32.totalorder %s105_s21, %s3249_s28  ;;  %p3255_p3 = scmp.lt.s32.totalorder %s3249_s28, %s3249_s28 }
  0x6c   :  { %p3256_p4 = por %p3255_p3, %p3254_p2 }
  0x6e   :  { %p3257_p5 = pnand %p3256_p4, %p3250_p1 }
  0x70   :  { %3260 = shalt.err (!%p3257_p5)
}
  0x71   :  { %110 = dma.hbm_to_vmem [thread:$0]  %s4169_s10, 256, %s105_s21, [#allocation13], %s4190_s24, %s4190_s24, %s4189_s3  }
  0x72   :  { %3349 = dma.done.wait [#allocation4], 128  }
  0x73   :  { %3350 = vsyncadd [#allocation4], 4294967168 }
  0x74   :  { %3351 = dma.done.wait [#allocation7], 128  }
  0x75   :  { %3352 = vsyncadd [#allocation7], 4294967168 }
  0x76   :  { %3353 = dma.done.wait [#allocation10], 512  }
  0x77   :  { %3354 = vsyncadd [#allocation10], 4294966784 }
  0x78   :  { %3355 = dma.done.wait [#allocation13], 256  }
  0x79   :  { %3356 = vsyncadd [#allocation13], 4294967040  ;;  %v3375_v0 = vmov 0.0   ;;  %vm3376_vm0 = vmmov 0   ;;  %v3377_v1 = vmov 1966171168   ;;  %v196_v3 = vlaneseq }
  0x7a   :  { %2685 = vmatprep.subr.bf16.mxu0 %v3375_v0  ;;  %2693 = vmatprep.subr.bf16.mxu1 %v3375_v0  ;;  %v194_v2 = vunpack.c.l.s4 %v3377_v1  ;;  %v2957_v6 = vld [vmem:[%s4163_s4] sm:$0xff]   ;;  %v2959_v8 = vld [vmem:[%s4163_s4 + $0x8] sm:$0xff]   ;;  %vm140_vm1 = vcmask 254976   ;;  %v169_v11 = vld [vmem:[#allocation3] sm:$0x1]  ;;  %vm250_vm2 = vcmask 261120  }
  0x7b   :  { %2689 = vmatprep.mubr.msk.bf16.mxu0 %vm3376_vm0, %v3375_v0  ;;  %2697 = vmatprep.mubr.msk.bf16.mxu1 %vm3376_vm0, %v3375_v0  ;;  %v3565_v5 = vshrl.u32 %v196_v3, 7  ;;  %v3573_v7 = vld [vmem:[%s4165_s6] sm:$0xff]   ;;  %v3583_v9 = vld [vmem:[%s4165_s6 + $0x8] sm:$0xff]   ;;  %v170_v12 = vld [vmem:[#allocation3 + $0x1] sm:$0x1]  ;;  %vm2201_vm3 = vcmask 80896  }
  0x7c   :  { %v195_v4 = vunpack.c.0.s8 %v194_v2  ;;  %2686 = vmatpush3.bf16.msra.mxu0 %v2957_v6  ;;  %2694 = vmatpush3.bf16.msra.mxu1 %v3573_v7  ;;  %v171_v13 = vld [vmem:[#allocation3 + $0x2] sm:$0x1]  ;;  %v172_v14 = vld [vmem:[#allocation3 + $0x3] sm:$0x1]  ;;  %v173_v15 = vld [vmem:[#allocation3 + $0x4] sm:$0x1]  ;;  %v189_v17 = vcombine.low %v169_v11, %v170_v12 }
  0x7d   :  { %2687 = vmatprep.subr.bf16.mxu0 %v3375_v0  ;;  %2695 = vmatprep.subr.bf16.mxu1 %v3375_v0  ;;  %v174_v16 = vld [vmem:[#allocation3 + $0x5] sm:$0x1]  ;;  %v175_v18 = vld [vmem:[#allocation3 + $0x6] sm:$0x1]  ;;  %v176_v19 = vld [vmem:[#allocation3 + $0x7] sm:$0x1]  ;;  %v190_v20 = vcombine.low %v171_v13, %v172_v14 }
  0x7e   :  { %v198_v10 = vsub.s32 %v195_v4, %v3565_v5  ;;  %v191_v21 = vcombine.low %v173_v15, %v174_v16  ;;  %v138_v22 = vld [vmem:[#allocation6] sm:$0x3]  ;;  %v192_v23 = vcombine.low %v175_v18, %v176_v19  ;;  %v143_v35 = vld [vmem:[#allocation8] sm:$0x3]  ;;  %v3378_v36 = vmov 1983009808  }
  0x7f   :  { %141 = vst.msk [vmem:[#allocation17] sm:$0x3] %vm140_vm1, %v138_v22  ;;  %145 = vst.msk [vmem:[#allocation18] sm:$0x3] %vm140_vm1, %v143_v35  ;;  %v299_v37 = vunpack.c.l.s4 %v3378_v36  ;;  %v3610_v45 = vld [vmem:[%s4166_s7] ss:$0 sm:$0xff] }
  0x80   :  { %2688 = vmatpush3.bf16.msra.mxu0 %v2959_v8  ;;  %2696 = vmatpush3.bf16.msra.mxu1 %v3583_v9  ;;  %v199_v24 = vrot.slane %v189_v17, %v198_v10  ;;  %v206_v25 = vrot.slane %v190_v20, %v198_v10  ;;  %v213_v26 = vrot.slane %v191_v21, %v198_v10  ;;  %v3625_v1 = vld [vmem:[%s4165_s6 + $0x10] sm:$0xff]   ;;  %v139_v2 = vld [vmem:[#allocation6 + $0x2] sm:$0x3]  ;;  %v3628_v3 = vld [vmem:[#allocation9] sm:$0xff]   ;;  %vm2229_vm4 = vcmask 1044480  }
  0x81   :  { %2701 = vmatprep.subr.bf16.mxu0 %v3375_v0  ;;  %2709 = vmatprep.subr.bf16.mxu1 %v3375_v0  ;;  %v220_v27 = vrot.slane %v192_v23, %v198_v10  ;;  %v300_v38 = vunpack.c.0.s8 %v299_v37  ;;  %142 = vst.msk [vmem:[#allocation17 + $0x2] sm:$0x3] %vm140_vm1, %v139_v2  ;;  %v3634_v4 = vld [vmem:[%s4165_s6 + $0x18] sm:$0xff]   ;;  %v3638_v6 = vld [vmem:[#allocation9 + $0x8] sm:$0xff]   ;;  %v3674_v22 = vld [vmem:[%s4166_s7 + $0x1] ss:$0 sm:$0xff] }
  0x82   :  { %v221_v28 = vcombine.low %v199_v24, %v206_v25  ;;  %v144_v20 = vld [vmem:[#allocation8 + $0x2] sm:$0x3] }
  0x83   :  { %v222_v29 = vcombine.low %v213_v26, %v220_v27  ;;  %v3599_v39 = vsub.s32 %v300_v38, %v3565_v5  ;;  %146 = vst.msk [vmem:[#allocation18 + $0x2] sm:$0x3] %vm140_vm1, %v144_v20 }
  0x84   :  { %v229_v30 = vrot.slane %v221_v28, %v198_v10 }
  0x85   :  { %v236_v31 = vrot.slane %v222_v29, %v198_v10 }
  0x86   :  { %v163_v32 = vld [vmem:[#allocation17] sm:$0x3]  ;;  %v2530_v53 = vld.sshfl [vmem:[#allocation18] sm:$0x3 pattern:$0x76325410] }
  0x87   :  { %v237_v33 = vcombine.low %v229_v30, %v236_v31  ;;  %v339_v34 = vpack.c.bf16 %v163_v32, %v163_v32 }
  0x88   :  { %v165_v10 = vld [vmem:[#allocation17 + $0x2] sm:$0x3] }
  0x89   :  { %2690 = vmatmul.mubr.msk.bf16.vlgmr.msra.gmra.mrb[0].mxu0 %vm250_vm2, %v237_v33  ;;  %2698 = vmatmul.mubr.msk.bf16.vlgmr.msra.gmra.mrb[0].mxu1 %vm250_vm2, %v339_v34  ;;  %v439_v11 = vpack.c.bf16 %v165_v10, %v165_v10 }
  0x8a   :  { %2705 = vmatprep.mubr.msk.bf16.mxu0 %vm3376_vm0, %v3375_v0  ;;  %2713 = vmatprep.mubr.msk.bf16.mxu1 %vm3376_vm0, %v3375_v0  ;;  %v168_v37 = vld [vmem:[#allocation18 + $0x2] sm:$0x3] }
  0x8b   :  { %2702 = vmatpush3.bf16.msra.mxu0 %v3625_v1  ;;  %2710 = vmatpush3.bf16.msra.mxu1 %v3628_v3 }
  0x8c   :  { %2703 = vmatprep.subr.bf16.mxu0 %v3375_v0  ;;  %2711 = vmatprep.subr.bf16.mxu1 %v3375_v0 }
  0x8f   :  { %2704 = vmatpush3.bf16.msra.mxu0 %v3634_v4  ;;  %2712 = vmatpush3.bf16.msra.mxu1 %v3638_v6 }
  0x90   :  { %2717 = vmatprep.subr.bf16.mxu0 %v3375_v0  ;;  %2725 = vmatprep.subr.bf16.mxu1 %v3375_v0 }
  0x92   :  { %2706 = vmatmul.mubr.msk.bf16.vlgmr.msra.gmra.mrb[4].mxu0 %vm250_vm2, %v439_v11 }
  0x93   :  { %2718 = vmatpush3.bf16.msra.mxu0 %v3573_v7  ;;  %2721 = vmatprep.mubr.msk.bf16.mxu0 %vm3376_vm0, %v3375_v0 }
  0x94   :  { %2719 = vmatprep.subr.bf16.mxu0 %v3375_v0 }
  0x97   :  { %2720 = vmatpush3.bf16.msra.mxu0 %v3583_v9 }
  0x98   :  { %2733 = vmatprep.subr.bf16.mxu0 %v3375_v0 }
 0x15c   :  { %v3601_v40 = vpop.f32.mrb[0].mxu0  ;;  %v389_v41 = vpop.f32.mrb[0].mxu1 }
 0x15d   :  { %v3605_v42 = vrot.slane %v3601_v40, %v3599_v39  ;;  %v2691_v43 = vpop.f32.mrb[1].mxu0  ;;  %v2699_v44 = vpop.f32.mrb[1].mxu1 }
 0x15e   :  { %v3612_v46 = vpop.f32.mrb[2].mxu0  ;;  %v392_v47 = vpop.f32.mrb[2].mxu1 }
 0x15f   :  { %v395_v48 = vadd.f32 %v389_v41, %v3605_v42  ;;  %v2692_v49 = vpop.f32.mrb[3].mxu0  ;;  %v2700_v50 = vpop.f32.mrb[3].mxu1  ;;  %v312_v21 = vcombine.high %v3605_v42, %v3605_v42 }
 0x161   :  { %v402_v51 = vadd.f32 %v3610_v45, %v395_v48 }
 0x163   :  { %2977 = vtanh.f32 %v402_v51  ;;  %v2529_v54 = vmul.f32 -1.442695, %v402_v51 }
 0x165   :  { %2979 = vpow2.f32 %v2529_v54  ;;  %v489_v15 = vpop.f32.mrb[4].mxu0 }
 0x166   :  { %v2707_v16 = vpop.f32.mrb[5].mxu0 }
 0x167   :  { %v492_v17 = vpop.f32.mrb[6].mxu0 }
 0x168   :  { %v2708_v18 = vpop.f32.mrb[7].mxu0 }
 0x16d   :  { %v2978_v52 = vpop.eup %2977 }
 0x16e   :  { %423 = vrot.lane.b32.xlu0 %v2978_v52, %s4190_s24 }
 0x16f   :  { %v2980_v55 = vpop.eup %2979 }
 0x170   :  { %v406_v56 = vadd.f32 1.0, %v2980_v55 }
 0x172   :  { %418 = vrot.lane.b32.xlu0 %v2530_v53, %s4188_s5  ;;  %2981 = vrcp.f32 %v406_v56 }
 0x17c   :  { %v2982_v57 = vpop.eup %2981 }
 0x1e0   :  { %v424_v58 = vpop.permute.xlu0 %423 }
 0x1e1   :  { %v426_v59 = vmul.f32 %v2982_v57, %v424_v58 }
 0x1e3   :  { %428 = vrot.lane.b32.xlu1 %v426_v59, %s4188_s5 }
 0x1e4   :  { %v419_v60 = vpop.permute.xlu0 %418 }
 0x1e5   :  { %v421_v61 = vmul.f32 %v2982_v57, %v419_v60 }
 0x255   :  { %v429_v62 = vpop.permute.xlu1 %428 }
 0x256   :  { %v3619_v63 = vadd.f32 %v429_v62, %v421_v61 }
 0x258   :  { %2983 = vtanh.f32 %v3619_v63 }
 0x262   :  { %v2984_v8 = vpop.eup %2983 }
 0x263   :  { %434 = vrot.lane.b32.xlu1 %v2984_v8, %s4190_s24 }
 0x2d5   :  { %v435_v12 = vpop.permute.xlu1 %434 }
 0x2d6   :  { %v437_v13 = vmul.f32 %v2982_v57, %v435_v12 }
 0x2d8   :  { %v438_v14 = vpack.c.bf16 %v437_v13, %v437_v13 }
 0x2da   :  { %496 = vrot.lane.b32.xlu0 %v438_v14, %s4188_s5 }
 0x34c   :  { %v497_v19 = vpop.permute.xlu0 %496 }
 0x34d   :  { %2714 = vmatmul.mubr.msk.bf16.vlgmr.msra.gmra.mrb[4].mxu1 %vm250_vm2, %v497_v19  ;;  %2722 = vmatmul.mubr.msk.bf16.vlgmr.msra.gmra.mrb[8].mxu0 %vm250_vm2, %v497_v19 }
 0x34e   :  { %2726 = vmatpush3.bf16.msra.mxu1 %v3625_v1  ;;  %2734 = vmatpush3.bf16.msra.mxu0 %v3628_v3 }
 0x34f   :  { %2727 = vmatprep.subr.bf16.mxu1 %v3375_v0  ;;  %2735 = vmatprep.subr.bf16.mxu0 %v3375_v0 }
 0x350   :  { %2729 = vmatprep.mubr.msk.bf16.mxu1 %vm3376_vm0, %v3375_v0  ;;  %2737 = vmatprep.mubr.msk.bf16.mxu0 %vm3376_vm0, %v3375_v0 }
 0x352   :  { %2728 = vmatpush3.bf16.msra.mxu1 %v3634_v4  ;;  %2736 = vmatpush3.bf16.msra.mxu0 %v3638_v6 }
 0x353   :  { %2741 = vmatprep.subr.bf16.mxu1 %v3375_v0  ;;  %2749 = vmatprep.subr.bf16.mxu0 %v3375_v0 }
 0x420   :  { %v547_v23 = vpop.f32.mrb[4].mxu1  ;;  %v628_v24 = vpop.f32.mrb[8].mxu0 }
 0x421   :  { %v548_v25 = vadd.f32 %v547_v23, %v489_v15  ;;  %v634_v26 = vadd.f32 %v628_v24, %v312_v21  ;;  %v2715_v27 = vpop.f32.mrb[5].mxu1  ;;  %v2723_v28 = vpop.f32.mrb[9].mxu0  ;;  %v297_v21 = vcombine.high %v3601_v40, %v3601_v40 }
 0x422   :  { %v550_v29 = vpop.f32.mrb[6].mxu1  ;;  %v631_v30 = vpop.f32.mrb[10].mxu0 }
 0x423   :  { %v559_v31 = vadd.f32 %v3674_v22, %v548_v25  ;;  %v635_v32 = vadd.f32 %v3610_v45, %v634_v26  ;;  %v2716_v33 = vpop.f32.mrb[7].mxu1  ;;  %v2724_v34 = vpop.f32.mrb[11].mxu0  ;;  %v3723_v27 = vrot.slane %v297_v21, %v3599_v39 }
 0x425   :  { %2985 = vtanh.f32 %v559_v31  ;;  %v2538_v38 = vmul.f32 -1.442695, %v559_v31  ;;  %v2540_v41 = vmul.f32 -1.442695, %v635_v32 }
 0x426   :  { %2987 = vtanh.f32 %v635_v32 }
 0x427   :  { %2989 = vpow2.f32 %v2538_v38 }
 0x428   :  { %2991 = vpow2.f32 %v2540_v41 }
 0x42f   :  { %v2986_v35 = vpop.eup %2985 }
 0x430   :  { %v2988_v36 = vpop.eup %2987  ;;  %573 = vrot.lane.b32.xlu1 %v2986_v35, %s4190_s24 }
 0x431   :  { %645 = vrot.lane.b32.xlu0 %v2988_v36, %s4190_s24  ;;  %v2990_v42 = vpop.eup %2989 }
 0x432   :  { %v2992_v43 = vpop.eup %2991  ;;  %v563_v44 = vadd.f32 1.0, %v2990_v42 }
 0x433   :  { %v639_v47 = vadd.f32 1.0, %v2992_v43 }
 0x434   :  { %568 = vrot.lane.b32.xlu1 %v168_v37, %s4188_s5  ;;  %2993 = vrcp.f32 %v563_v44 }
 0x435   :  { %2995 = vrcp.f32 %v639_v47 }
 0x43e   :  { %v2994_v48 = vpop.eup %2993 }
 0x43f   :  { %v2996_v50 = vpop.eup %2995 }
 0x440   :  { %v643_v56 = vmul.f32 %v2996_v50, %v3619_v63 }
 0x4a2   :  { %v574_v49 = vpop.permute.xlu1 %573 }
 0x4a3   :  { %v646_v51 = vpop.permute.xlu0 %645  ;;  %v576_v52 = vmul.f32 %v2994_v48, %v574_v49 }
 0x4a4   :  { %v648_v53 = vmul.f32 %v2996_v50, %v646_v51 }
 0x4a5   :  { %578 = vrot.lane.b32.xlu0 %v576_v52, %s4188_s5 }
 0x4a6   :  { %650 = vrot.lane.b32.xlu1 %v648_v53, %s4188_s5  ;;  %v569_v54 = vpop.permute.xlu1 %568 }
 0x4a7   :  { %v571_v55 = vmul.f32 %v2994_v48, %v569_v54 }
 0x517   :  { %v579_v57 = vpop.permute.xlu0 %578 }
 0x518   :  { %v651_v58 = vpop.permute.xlu1 %650  ;;  %v3684_v59 = vadd.f32 %v579_v57, %v571_v55 }
 0x519   :  { %v3686_v60 = vadd.f32 %v651_v58, %v643_v56 }
 0x51a   :  { %2997 = vtanh.f32 %v3684_v59 }
 0x51b   :  { %2999 = vtanh.f32 %v3686_v60 }
 0x524   :  { %v2998_v61 = vpop.eup %2997 }
 0x525   :  { %v3000_v62 = vpop.eup %2999  ;;  %584 = vrot.lane.b32.xlu0 %v2998_v61, %s4190_s24 }
 0x526   :  { %656 = vrot.lane.b32.xlu1 %v3000_v62, %s4190_s24 }
 0x597   :  { %v585_v2 = vpop.permute.xlu0 %584 }
 0x598   :  { %v657_v8 = vpop.permute.xlu1 %656  ;;  %v3692_v10 = vmul.f32 %v2994_v48, %v585_v2 }
 0x599   :  { %v659_v63 = vmul.f32 %v2996_v50, %v657_v8 }
 0x59a   :  { %v661_v11 = vpack.c.bf16 %v3692_v10, %v3692_v10 }
 0x59b   :  { %v660_v12 = vpack.c.bf16 %v659_v63, %v659_v63 }
 0x59c   :  { %663 = vrot.lane.b32.xlu0 %v661_v11, %s4188_s5 }
 0x59d   :  { %709 = vrot.lane.b32.xlu1 %v660_v12, %s4188_s5 }
 0x60e   :  { %v664_v13 = vpop.permute.xlu0 %663 }
 0x60f   :  { %v710_v14 = vpop.permute.xlu1 %709  ;;  %2730 = vmatmul.mubr.msk.bf16.vlgmr.msra.gmra.mrb[8].mxu1 %vm250_vm2, %v664_v13 }
 0x610   :  { %2738 = vmatmul.mubr.msk.bf16.vlgmr.msra.gmra.mrb[12].mxu0 %vm250_vm2, %v710_v14  ;;  %2742 = vmatpush3.bf16.msra.mxu1 %v3573_v7 }
 0x611   :  { %2743 = vmatprep.subr.bf16.mxu1 %v3375_v0  ;;  %2745 = vmatprep.mubr.msk.bf16.mxu1 %vm3376_vm0, %v3375_v0 }
 0x612   :  { %2750 = vmatpush3.bf16.msra.mxu0 %v3625_v1  ;;  %2753 = vmatprep.mubr.msk.bf16.mxu0 %vm3376_vm0, %v3375_v0 }
 0x613   :  { %2751 = vmatprep.subr.bf16.mxu0 %v3375_v0 }
 0x614   :  { %2744 = vmatpush3.bf16.msra.mxu1 %v3583_v9 }
 0x615   :  { %2757 = vmatprep.subr.bf16.mxu1 %v3375_v0 }
 0x616   :  { %2752 = vmatpush3.bf16.msra.mxu0 %v3634_v4 }
 0x617   :  { %2746 = vmatmul.mubr.msk.bf16.vlgmr.msra.gmra.mrb[12].mxu1 %vm250_vm2, %v710_v14  ;;  %2765 = vmatprep.subr.bf16.mxu0 %v3375_v0 }
 0x618   :  { %2758 = vmatpush3.bf16.msra.mxu1 %v3628_v3  ;;  %2761 = vmatprep.mubr.msk.bf16.mxu1 %vm3376_vm0, %v3375_v0 }
 0x619   :  { %2759 = vmatprep.subr.bf16.mxu1 %v3375_v0 }
 0x61c   :  { %2760 = vmatpush3.bf16.msra.mxu1 %v3638_v6 }
 0x61d   :  { %2773 = vmatprep.subr.bf16.mxu1 %v3375_v0 }
 0x6e2   :  { %v702_v15 = vpop.f32.mrb[8].mxu1 }
 0x6e3   :  { %v748_v16 = vpop.f32.mrb[12].mxu0  ;;  %v2731_v17 = vpop.f32.mrb[9].mxu1 }
 0x6e4   :  { %v749_v18 = vadd.f32 %v748_v16, %v702_v15  ;;  %v2739_v19 = vpop.f32.mrb[13].mxu0  ;;  %v705_v20 = vpop.f32.mrb[10].mxu1  ;;  %v313_v17 = vcombine.high %v3723_v27, %v3723_v27 }
 0x6e5   :  { %v751_v23 = vpop.f32.mrb[14].mxu0  ;;  %v2732_v24 = vpop.f32.mrb[11].mxu1 }
 0x6e6   :  { %v754_v25 = vadd.f32 %v3674_v22, %v749_v18  ;;  %v2740_v26 = vpop.f32.mrb[15].mxu0 }
 0x6e8   :  { %3001 = vtanh.f32 %v754_v25  ;;  %v2543_v35 = vmul.f32 -1.442695, %v754_v25 }
 0x6ea   :  { %v819_v28 = vpop.f32.mrb[12].mxu1 }
 0x6eb   :  { %v825_v29 = vadd.f32 %v819_v28, %v3723_v27  ;;  %v2747_v30 = vpop.f32.mrb[13].mxu1 }
 0x6ec   :  { %v822_v31 = vpop.f32.mrb[14].mxu1 }
 0x6ed   :  { %v826_v32 = vadd.f32 %v3610_v45, %v825_v29  ;;  %v2748_v33 = vpop.f32.mrb[15].mxu1 }
 0x6ef   :  { %3003 = vtanh.f32 %v826_v32  ;;  %v2545_v36 = vmul.f32 -1.442695, %v826_v32 }
 0x6f0   :  { %3005 = vpow2.f32 %v2543_v35 }
 0x6f1   :  { %3007 = vpow2.f32 %v2545_v36 }
 0x6f2   :  { %v3002_v34 = vpop.eup %3001 }
 0x6f3   :  { %764 = vrot.lane.b32.xlu0 %v3002_v34, %s4190_s24 }
 0x6f9   :  { %v3004_v40 = vpop.eup %3003 }
 0x6fa   :  { %836 = vrot.lane.b32.xlu1 %v3004_v40, %s4190_s24  ;;  %v3006_v37 = vpop.eup %3005 }
 0x6fb   :  { %v758_v38 = vadd.f32 1.0, %v3006_v37  ;;  %v3008_v41 = vpop.eup %3007 }
 0x6fc   :  { %v830_v42 = vadd.f32 1.0, %v3008_v41 }
 0x6fd   :  { %3009 = vrcp.f32 %v758_v38 }
 0x6fe   :  { %3011 = vrcp.f32 %v830_v42 }
 0x707   :  { %v3010_v43 = vpop.eup %3009 }
 0x708   :  { %v3012_v48 = vpop.eup %3011  ;;  %v762_v51 = vmul.f32 %v3010_v43, %v3684_v59 }
 0x709   :  { %v834_v54 = vmul.f32 %v3012_v48, %v3686_v60 }
 0x765   :  { %v765_v44 = vpop.permute.xlu0 %764 }
 0x766   :  { %v767_v47 = vmul.f32 %v3010_v43, %v765_v44 }
 0x768   :  { %769 = vrot.lane.b32.xlu0 %v767_v47, %s4188_s5 }
 0x76c   :  { %v837_v49 = vpop.permute.xlu1 %836 }
 0x76d   :  { %v839_v50 = vmul.f32 %v3012_v48, %v837_v49 }
 0x76f   :  { %841 = vrot.lane.b32.xlu1 %v839_v50, %s4188_s5 }
 0x7da   :  { %v770_v52 = vpop.permute.xlu0 %769 }
 0x7db   :  { %v3732_v53 = vadd.f32 %v770_v52, %v762_v51 }
 0x7dd   :  { %3013 = vtanh.f32 %v3732_v53 }
 0x7e1   :  { %v842_v55 = vpop.permute.xlu1 %841 }
 0x7e2   :  { %v3736_v56 = vadd.f32 %v842_v55, %v834_v54 }
 0x7e4   :  { %3015 = vtanh.f32 %v3736_v56 }
 0x7e7   :  { %v3014_v57 = vpop.eup %3013 }
 0x7e8   :  { %775 = vrot.lane.b32.xlu0 %v3014_v57, %s4190_s24 }
 0x7ee   :  { %v3016_v58 = vpop.eup %3015 }
 0x7ef   :  { %847 = vrot.lane.b32.xlu1 %v3016_v58, %s4190_s24 }
 0x85a   :  { %v776_v61 = vpop.permute.xlu0 %775 }
 0x85b   :  { %v3741_v59 = vmul.f32 %v3010_v43, %v776_v61 }
 0x85d   :  { %v852_v62 = vpack.c.bf16 %v3741_v59, %v3741_v59 }
 0x85f   :  { %854 = vrot.lane.b32.xlu0 %v852_v62, %s4188_s5 }
 0x861   :  { %v848_v60 = vpop.permute.xlu1 %847 }
 0x862   :  { %v850_v2 = vmul.f32 %v3012_v48, %v848_v60 }
 0x864   :  { %v851_v8 = vpack.c.bf16 %v850_v2, %v850_v2 }
 0x866   :  { %900 = vrot.lane.b32.xlu1 %v851_v8, %s4188_s5 }
 0x8d1   :  { %v855_v63 = vpop.permute.xlu0 %854 }
 0x8d2   :  { %2754 = vmatmul.mubr.msk.bf16.vlgmr.msra.gmra.mrb[16].mxu0 %vm250_vm2, %v855_v63 }
 0x8d3   :  { %2766 = vmatpush3.bf16.msra.mxu0 %v3573_v7  ;;  %2769 = vmatprep.mubr.msk.bf16.mxu0 %vm3376_vm0, %v3375_v0 }
 0x8d4   :  { %2767 = vmatprep.subr.bf16.mxu0 %v3375_v0 }
 0x8d7   :  { %2768 = vmatpush3.bf16.msra.mxu0 %v3583_v9 }
 0x8d8   :  { %v901_v11 = vpop.permute.xlu1 %900  ;;  %2781 = vmatprep.subr.bf16.mxu0 %v3375_v0 }
 0x8d9   :  { %2762 = vmatmul.mubr.msk.bf16.vlgmr.msra.gmra.mrb[16].mxu1 %vm250_vm2, %v901_v11 }
 0x8da   :  { %2770 = vmatmul.mubr.msk.bf16.vlgmr.msra.gmra.mrb[20].mxu0 %vm250_vm2, %v901_v11  ;;  %2774 = vmatpush3.bf16.msra.mxu1 %v3625_v1 }
 0x8db   :  { %2782 = vmatpush3.bf16.msra.mxu0 %v3628_v3  ;;  %2775 = vmatprep.subr.bf16.mxu1 %v3375_v0 }
 0x8dc   :  { %2783 = vmatprep.subr.bf16.mxu0 %v3375_v0  ;;  %2785 = vmatprep.mubr.msk.bf16.mxu0 %vm3376_vm0, %v3375_v0 }
 0x8dd   :  { %2777 = vmatprep.mubr.msk.bf16.mxu1 %vm3376_vm0, %v3375_v0 }
 0x8de   :  { %2776 = vmatpush3.bf16.msra.mxu1 %v3634_v4 }
 0x8df   :  { %2784 = vmatpush3.bf16.msra.mxu0 %v3638_v6  ;;  %2789 = vmatprep.subr.bf16.mxu1 %v3375_v0 }
 0x8e0   :  { %2797 = vmatprep.subr.bf16.mxu0 %v3375_v0 }
 0x9a5   :  { %v893_v12 = vpop.f32.mrb[16].mxu0 }
 0x9a6   :  { %v2755_v13 = vpop.f32.mrb[17].mxu0 }
 0x9a7   :  { %v896_v14 = vpop.f32.mrb[18].mxu0 }
 0x9a8   :  { %v2756_v15 = vpop.f32.mrb[19].mxu0 }
 0x9ac   :  { %v939_v16 = vpop.f32.mrb[16].mxu1 }
 0x9ad   :  { %v940_v18 = vadd.f32 %v939_v16, %v893_v12  ;;  %v1010_v19 = vpop.f32.mrb[20].mxu0  ;;  %v2763_v20 = vpop.f32.mrb[17].mxu1 }
 0x9ae   :  { %v1016_v21 = vadd.f32 %v1010_v19, %v313_v17  ;;  %v2771_v23 = vpop.f32.mrb[21].mxu0  ;;  %v942_v24 = vpop.f32.mrb[18].mxu1  ;;  %v3816_v19 = vrot.slane %v3612_v46, %v3599_v39 }
 0x9af   :  { %v945_v25 = vadd.f32 %v3674_v22, %v940_v18  ;;  %v1013_v26 = vpop.f32.mrb[22].mxu0  ;;  %v2764_v28 = vpop.f32.mrb[19].mxu1 }
 0x9b0   :  { %v1017_v29 = vadd.f32 %v3610_v45, %v1016_v21  ;;  %v2772_v30 = vpop.f32.mrb[23].mxu0 }
 0x9b1   :  { %3017 = vtanh.f32 %v945_v25  ;;  %v2548_v27 = vmul.f32 -1.442695, %v945_v25 }
 0x9b2   :  { %3019 = vtanh.f32 %v1017_v29  ;;  %v2550_v33 = vmul.f32 -1.442695, %v1017_v29 }
 0x9b3   :  { %3021 = vpow2.f32 %v2548_v27 }
 0x9b4   :  { %3023 = vpow2.f32 %v2550_v33 }
 0x9bb   :  { %v3018_v31 = vpop.eup %3017 }
 0x9bc   :  { %v3020_v32 = vpop.eup %3019  ;;  %955 = vrot.lane.b32.xlu0 %v3018_v31, %s4190_s24 }
 0x9bd   :  { %1027 = vrot.lane.b32.xlu1 %v3020_v32, %s4190_s24  ;;  %v3022_v34 = vpop.eup %3021 }
 0x9be   :  { %v3024_v40 = vpop.eup %3023  ;;  %v949_v35 = vadd.f32 1.0, %v3022_v34 }
 0x9bf   :  { %v1021_v36 = vadd.f32 1.0, %v3024_v40 }
 0x9c0   :  { %3025 = vrcp.f32 %v949_v35 }
 0x9c1   :  { %3027 = vrcp.f32 %v1021_v36 }
 0x9ca   :  { %v3026_v37 = vpop.eup %3025 }
 0x9cb   :  { %v3028_v41 = vpop.eup %3027  ;;  %v953_v47 = vmul.f32 %v3026_v37, %v3732_v53 }
 0x9cc   :  { %v1025_v48 = vmul.f32 %v3028_v41, %v3736_v56 }
 0xa2e   :  { %v956_v38 = vpop.permute.xlu0 %955 }
 0xa2f   :  { %v1028_v42 = vpop.permute.xlu1 %1027  ;;  %v958_v43 = vmul.f32 %v3026_v37, %v956_v38 }
 0xa30   :  { %v1030_v44 = vmul.f32 %v3028_v41, %v1028_v42 }
 0xa31   :  { %960 = vrot.lane.b32.xlu0 %v958_v43, %s4188_s5 }
 0xa32   :  { %1032 = vrot.lane.b32.xlu1 %v1030_v44, %s4188_s5 }
 0xaa3   :  { %v961_v49 = vpop.permute.xlu0 %960 }
 0xaa4   :  { %v1033_v50 = vpop.permute.xlu1 %1032  ;;  %v3778_v51 = vadd.f32 %v961_v49, %v953_v47 }
 0xaa5   :  { %v3780_v52 = vadd.f32 %v1033_v50, %v1025_v48 }
 0xaa6   :  { %3029 = vtanh.f32 %v3778_v51 }
 0xaa7   :  { %3031 = vtanh.f32 %v3780_v52 }
 0xab0   :  { %v3030_v54 = vpop.eup %3029 }
 0xab1   :  { %v3032_v55 = vpop.eup %3031  ;;  %966 = vrot.lane.b32.xlu0 %v3030_v54, %s4190_s24 }
 0xab2   :  { %1038 = vrot.lane.b32.xlu1 %v3032_v55, %s4190_s24 }
 0xb23   :  { %v967_v57 = vpop.permute.xlu0 %966 }
 0xb24   :  { %v1039_v53 = vpop.permute.xlu1 %1038  ;;  %v3786_v58 = vmul.f32 %v3026_v37, %v967_v57 }
 0xb25   :  { %v1041_v56 = vmul.f32 %v3028_v41, %v1039_v53 }
 0xb26   :  { %v1043_v61 = vpack.c.bf16 %v3786_v58, %v3786_v58 }
 0xb27   :  { %v1042_v62 = vpack.c.bf16 %v1041_v56, %v1041_v56 }
 0xb28   :  { %1045 = vrot.lane.b32.xlu0 %v1043_v61, %s4188_s5 }
 0xb29   :  { %1091 = vrot.lane.b32.xlu1 %v1042_v62, %s4188_s5 }
 0xb9a   :  { %v1046_v60 = vpop.permute.xlu0 %1045 }
 0xb9b   :  { %v1092_v2 = vpop.permute.xlu1 %1091  ;;  %2778 = vmatmul.mubr.msk.bf16.vlgmr.msra.gmra.mrb[20].mxu1 %vm250_vm2, %v1046_v60 }
 0xb9c   :  { %2786 = vmatmul.mubr.msk.bf16.vlgmr.msra.gmra.mrb[24].mxu0 %vm250_vm2, %v1092_v2  ;;  %2790 = vmatpush3.bf16.msra.mxu1 %v3573_v7 }
 0xb9d   :  { %2791 = vmatprep.subr.bf16.mxu1 %v3375_v0  ;;  %2793 = vmatprep.mubr.msk.bf16.mxu1 %vm3376_vm0, %v3375_v0 }
 0xb9e   :  { %2798 = vmatpush3.bf16.msra.mxu0 %v3625_v1  ;;  %2801 = vmatprep.mubr.msk.bf16.mxu0 %vm3376_vm0, %v3375_v0 }
 0xb9f   :  { %2799 = vmatprep.subr.bf16.mxu0 %v3375_v0 }
 0xba0   :  { %2792 = vmatpush3.bf16.msra.mxu1 %v3583_v9 }
 0xba1   :  { %2805 = vmatprep.subr.bf16.mxu1 %v3375_v0 }
 0xba2   :  { %2800 = vmatpush3.bf16.msra.mxu0 %v3634_v4 }
 0xba3   :  { %2794 = vmatmul.mubr.msk.bf16.vlgmr.msra.gmra.mrb[24].mxu1 %vm250_vm2, %v1092_v2  ;;  %2813 = vmatprep.subr.bf16.mxu0 %v3375_v0 }
 0xba4   :  { %2806 = vmatpush3.bf16.msra.mxu1 %v3628_v3  ;;  %2809 = vmatprep.mubr.msk.bf16.mxu1 %vm3376_vm0, %v3375_v0 }
 0xba5   :  { %2807 = vmatprep.subr.bf16.mxu1 %v3375_v0 }
 0xba8   :  { %2808 = vmatpush3.bf16.msra.mxu1 %v3638_v6 }
 0xba9   :  { %2821 = vmatprep.subr.bf16.mxu1 %v3375_v0 }
 0xc6e   :  { %v1084_v8 = vpop.f32.mrb[20].mxu1 }
 0xc6f   :  { %v1130_v63 = vpop.f32.mrb[24].mxu0  ;;  %v2779_v11 = vpop.f32.mrb[21].mxu1 }
 0xc70   :  { %v1131_v12 = vadd.f32 %v1130_v63, %v1084_v8  ;;  %v2787_v13 = vpop.f32.mrb[25].mxu0  ;;  %v1087_v14 = vpop.f32.mrb[22].mxu1  ;;  %v329_v63 = vcombine.high %v3816_v19, %v3816_v19 }
 0xc71   :  { %v1133_v15 = vpop.f32.mrb[26].mxu0  ;;  %v2780_v16 = vpop.f32.mrb[23].mxu1 }
 0xc72   :  { %v1136_v17 = vadd.f32 %v3674_v22, %v1131_v12  ;;  %v2788_v18 = vpop.f32.mrb[27].mxu0 }
 0xc74   :  { %3033 = vtanh.f32 %v1136_v17  ;;  %v2553_v30 = vmul.f32 -1.442695, %v1136_v17 }
 0xc76   :  { %v1201_v20 = vpop.f32.mrb[24].mxu1 }
 0xc77   :  { %v1207_v21 = vadd.f32 %v1201_v20, %v3816_v19  ;;  %v2795_v23 = vpop.f32.mrb[25].mxu1 }
 0xc78   :  { %v1204_v24 = vpop.f32.mrb[26].mxu1 }
 0xc79   :  { %v1208_v25 = vadd.f32 %v3610_v45, %v1207_v21  ;;  %v2796_v26 = vpop.f32.mrb[27].mxu1 }
 0xc7b   :  { %3035 = vtanh.f32 %v1208_v25  ;;  %v2555_v31 = vmul.f32 -1.442695, %v1208_v25 }
 0xc7c   :  { %3037 = vpow2.f32 %v2553_v30 }
 0xc7d   :  { %3039 = vpow2.f32 %v2555_v31 }
 0xc7e   :  { %v3034_v28 = vpop.eup %3033 }
 0xc7f   :  { %1146 = vrot.lane.b32.xlu0 %v3034_v28, %s4190_s24 }
 0xc85   :  { %v3036_v29 = vpop.eup %3035 }
 0xc86   :  { %1218 = vrot.lane.b32.xlu1 %v3036_v29, %s4190_s24  ;;  %v3038_v32 = vpop.eup %3037 }
 0xc87   :  { %v1140_v27 = vadd.f32 1.0, %v3038_v32  ;;  %v3040_v33 = vpop.eup %3039 }
 0xc88   :  { %v1212_v34 = vadd.f32 1.0, %v3040_v33 }
 0xc89   :  { %3041 = vrcp.f32 %v1140_v27 }
 0xc8a   :  { %3043 = vrcp.f32 %v1212_v34 }
 0xc93   :  { %v3042_v40 = vpop.eup %3041 }
 0xc94   :  { %v3044_v37 = vpop.eup %3043  ;;  %v1144_v42 = vmul.f32 %v3042_v40, %v3778_v51 }
 0xc95   :  { %v1216_v47 = vmul.f32 %v3044_v37, %v3780_v52 }
 0xcf1   :  { %v1147_v35 = vpop.permute.xlu0 %1146 }
 0xcf2   :  { %v1149_v36 = vmul.f32 %v3042_v40, %v1147_v35 }
 0xcf4   :  { %1151 = vrot.lane.b32.xlu0 %v1149_v36, %s4188_s5 }
 0xcf8   :  { %v1219_v38 = vpop.permute.xlu1 %1218 }
 0xcf9   :  { %v1221_v41 = vmul.f32 %v3044_v37, %v1219_v38 }
 0xcfb   :  { %1223 = vrot.lane.b32.xlu1 %v1221_v41, %s4188_s5 }
 0xd66   :  { %v1152_v43 = vpop.permute.xlu0 %1151 }
 0xd67   :  { %v3825_v44 = vadd.f32 %v1152_v43, %v1144_v42 }
 0xd69   :  { %3045 = vtanh.f32 %v3825_v44 }
 0xd6d   :  { %v1224_v48 = vpop.permute.xlu1 %1223 }
 0xd6e   :  { %v3829_v49 = vadd.f32 %v1224_v48, %v1216_v47 }
 0xd70   :  { %3047 = vtanh.f32 %v3829_v49 }
 0xd73   :  { %v3046_v50 = vpop.eup %3045 }
 0xd74   :  { %1157 = vrot.lane.b32.xlu0 %v3046_v50, %s4190_s24 }
 0xd7a   :  { %v3048_v54 = vpop.eup %3047 }
 0xd7b   :  { %1229 = vrot.lane.b32.xlu1 %v3048_v54, %s4190_s24 }
 0xde6   :  { %v1158_v55 = vpop.permute.xlu0 %1157 }
 0xde7   :  { %v3834_v51 = vmul.f32 %v3042_v40, %v1158_v55 }
 0xde9   :  { %v1234_v57 = vpack.c.bf16 %v3834_v51, %v3834_v51 }
 0xdeb   :  { %1236 = vrot.lane.b32.xlu0 %v1234_v57, %s4188_s5 }
 0xded   :  { %v1230_v52 = vpop.permute.xlu1 %1229 }
 0xdee   :  { %v1232_v53 = vmul.f32 %v3044_v37, %v1230_v52 }
 0xdf0   :  { %v1233_v56 = vpack.c.bf16 %v1232_v53, %v1232_v53 }
 0xdf2   :  { %1282 = vrot.lane.b32.xlu1 %v1233_v56, %s4188_s5  ;;  %v3890_v56 = vld [vmem:[%s4165_s6] sm:$0xff]  }
 0xe5d   :  { %v1237_v61 = vpop.permute.xlu0 %1236 }
 0xe5e   :  { %2802 = vmatmul.mubr.msk.bf16.vlgmr.msra.gmra.mrb[28].mxu0 %vm250_vm2, %v1237_v61  ;;  %v3903_v61 = vld [vmem:[%s4165_s6 + $0x8] sm:$0xff]  }
 0xe5f   :  { %2814 = vmatpush3.bf16.msra.mxu0 %v3573_v7  ;;  %2817 = vmatprep.mubr.msk.bf16.mxu0 %vm3376_vm0, %v3375_v0 }
 0xe60   :  { %2815 = vmatprep.subr.bf16.mxu0 %v3375_v0 }
 0xe63   :  { %2816 = vmatpush3.bf16.msra.mxu0 %v3583_v9 }
 0xe64   :  { %v1283_v62 = vpop.permute.xlu1 %1282  ;;  %2829 = vmatprep.subr.bf16.mxu0 %v3375_v0 }
 0xe65   :  { %2810 = vmatmul.mubr.msk.bf16.vlgmr.msra.gmra.mrb[28].mxu1 %vm250_vm2, %v1283_v62 }
 0xe66   :  { %2818 = vmatmul.mubr.msk.bf16.vlgmr.msra.gmra.mrb[32].mxu0 %vm250_vm2, %v1283_v62  ;;  %2822 = vmatpush3.bf16.msra.mxu1 %v3625_v1 }
 0xe67   :  { %2830 = vmatpush3.bf16.msra.mxu0 %v3628_v3  ;;  %2823 = vmatprep.subr.bf16.mxu1 %v3375_v0 }
 0xe68   :  { %2831 = vmatprep.subr.bf16.mxu0 %v3375_v0  ;;  %2833 = vmatprep.mubr.msk.bf16.mxu0 %vm3376_vm0, %v3375_v0 }
 0xe69   :  { %2825 = vmatprep.mubr.msk.bf16.mxu1 %vm3376_vm0, %v3375_v0 }
 0xe6a   :  { %2824 = vmatpush3.bf16.msra.mxu1 %v3634_v4 }
 0xe6b   :  { %2832 = vmatpush3.bf16.msra.mxu0 %v3638_v6  ;;  %2837 = vmatprep.subr.bf16.mxu1 %v3375_v0 }
 0xe6c   :  { %2845 = vmatprep.subr.bf16.mxu0 %v3375_v0 }
 0xf31   :  { %v1275_v7 = vpop.f32.mrb[28].mxu0 }
 0xf32   :  { %v2803_v9 = vpop.f32.mrb[29].mxu0 }
 0xf33   :  { %v1278_v60 = vpop.f32.mrb[30].mxu0 }
 0xf34   :  { %v2804_v2 = vpop.f32.mrb[31].mxu0 }
 0xf35   :  { %v314_v2 = vcombine.high %v3612_v46, %v3612_v46 }
 0xf38   :  { %v1321_v8 = vpop.f32.mrb[28].mxu1 }
 0xf39   :  { %v1322_v11 = vadd.f32 %v1321_v8, %v1275_v7  ;;  %v1392_v12 = vpop.f32.mrb[32].mxu0  ;;  %v2811_v13 = vpop.f32.mrb[29].mxu1 }
 0xf3a   :  { %v1398_v14 = vadd.f32 %v1392_v12, %v329_v63  ;;  %v2819_v15 = vpop.f32.mrb[33].mxu0  ;;  %v1324_v16 = vpop.f32.mrb[30].mxu1  ;;  %v3920_v12 = vrot.slane %v314_v2, %v3599_v39 }
 0xf3b   :  { %v1327_v17 = vadd.f32 %v3674_v22, %v1322_v11  ;;  %v1395_v18 = vpop.f32.mrb[34].mxu0  ;;  %v2812_v20 = vpop.f32.mrb[31].mxu1 }
 0xf3c   :  { %v1399_v21 = vadd.f32 %v3610_v45, %v1398_v14  ;;  %v2820_v23 = vpop.f32.mrb[35].mxu0 }
 0xf3d   :  { %3049 = vtanh.f32 %v1327_v17  ;;  %v2558_v19 = vmul.f32 -1.442695, %v1327_v17 }
 0xf3e   :  { %3051 = vtanh.f32 %v1399_v21  ;;  %v2560_v26 = vmul.f32 -1.442695, %v1399_v21 }
 0xf3f   :  { %3053 = vpow2.f32 %v2558_v19 }
 0xf40   :  { %3055 = vpow2.f32 %v2560_v26 }
 0xf47   :  { %v3050_v24 = vpop.eup %3049 }
 0xf48   :  { %v3052_v25 = vpop.eup %3051  ;;  %1337 = vrot.lane.b32.xlu0 %v3050_v24, %s4190_s24 }
 0xf49   :  { %1409 = vrot.lane.b32.xlu1 %v3052_v25, %s4190_s24  ;;  %v3054_v28 = vpop.eup %3053 }
 0xf4a   :  { %v3056_v29 = vpop.eup %3055  ;;  %v1331_v30 = vadd.f32 1.0, %v3054_v28 }
 0xf4b   :  { %v1403_v31 = vadd.f32 1.0, %v3056_v29 }
 0xf4c   :  { %3057 = vrcp.f32 %v1331_v30 }
 0xf4d   :  { %3059 = vrcp.f32 %v1403_v31 }
 0xf56   :  { %v3058_v32 = vpop.eup %3057 }
 0xf57   :  { %v3060_v33 = vpop.eup %3059  ;;  %v1335_v36 = vmul.f32 %v3058_v32, %v3825_v44 }
 0xf58   :  { %v1407_v37 = vmul.f32 %v3060_v33, %v3829_v49 }
 0xfba   :  { %v1338_v27 = vpop.permute.xlu0 %1337 }
 0xfbb   :  { %v1410_v34 = vpop.permute.xlu1 %1409  ;;  %v1340_v40 = vmul.f32 %v3058_v32, %v1338_v27 }
 0xfbc   :  { %v1412_v35 = vmul.f32 %v3060_v33, %v1410_v34 }
 0xfbd   :  { %1342 = vrot.lane.b32.xlu0 %v1340_v40, %s4188_s5 }
 0xfbe   :  { %1414 = vrot.lane.b32.xlu1 %v1412_v35, %s4188_s5 }
0x102f   :  { %v1343_v38 = vpop.permute.xlu0 %1342 }
0x1030   :  { %v1415_v41 = vpop.permute.xlu1 %1414  ;;  %v3871_v42 = vadd.f32 %v1343_v38, %v1335_v36 }
0x1031   :  { %v3873_v43 = vadd.f32 %v1415_v41, %v1407_v37 }
0x1032   :  { %3061 = vtanh.f32 %v3871_v42 }
0x1033   :  { %3063 = vtanh.f32 %v3873_v43 }
0x103c   :  { %v3062_v47 = vpop.eup %3061 }
0x103d   :  { %v3064_v48 = vpop.eup %3063  ;;  %1348 = vrot.lane.b32.xlu0 %v3062_v47, %s4190_s24 }
0x103e   :  { %1420 = vrot.lane.b32.xlu1 %v3064_v48, %s4190_s24 }
0x10af   :  { %v1349_v50 = vpop.permute.xlu0 %1348 }
0x10b0   :  { %v1421_v44 = vpop.permute.xlu1 %1420  ;;  %v3879_v54 = vmul.f32 %v3058_v32, %v1349_v50 }
0x10b1   :  { %v1423_v49 = vmul.f32 %v3060_v33, %v1421_v44 }
0x10b2   :  { %v1425_v55 = vpack.c.bf16 %v3879_v54, %v3879_v54 }
0x10b3   :  { %v1424_v57 = vpack.c.bf16 %v1423_v49, %v1423_v49  ;;  %v3119_v49 = vld [vmem:[%s4165_s6 + $0x10] sm:$0xff]  }
0x10b4   :  { %1427 = vrot.lane.b32.xlu0 %v1425_v55, %s4188_s5  ;;  %v3120_v55 = vld [vmem:[#allocation9] sm:$0xff]  }
0x10b5   :  { %1473 = vrot.lane.b32.xlu1 %v1424_v57, %s4188_s5  ;;  %v3121_v57 = vld [vmem:[%s4165_s6 + $0x18] sm:$0xff]  }
0x1126   :  { %v1428_v52 = vpop.permute.xlu0 %1427 }
0x1127   :  { %v1474_v53 = vpop.permute.xlu1 %1473  ;;  %2826 = vmatmul.mubr.msk.bf16.vlgmr.msra.gmra.mrb[32].mxu1 %vm250_vm2, %v1428_v52  ;;  %v3122_v52 = vld [vmem:[#allocation9 + $0x8] sm:$0xff]  }
0x1128   :  { %2834 = vmatmul.mubr.msk.bf16.vlgmr.msra.gmra.mrb[36].mxu0 %vm250_vm2, %v1474_v53  ;;  %2838 = vmatpush3.bf16.msra.mxu1 %v3890_v56 }
0x1129   :  { %2839 = vmatprep.subr.bf16.mxu1 %v3375_v0  ;;  %2841 = vmatprep.mubr.msk.bf16.mxu1 %vm3376_vm0, %v3375_v0 }
0x112a   :  { %2846 = vmatpush3.bf16.msra.mxu0 %v3625_v1  ;;  %2849 = vmatprep.mubr.msk.bf16.mxu0 %vm3376_vm0, %v3375_v0 }
0x112b   :  { %2847 = vmatprep.subr.bf16.mxu0 %v3375_v0 }
0x112c   :  { %2840 = vmatpush3.bf16.msra.mxu1 %v3903_v61 }
0x112d   :  { %2853 = vmatprep.subr.bf16.mxu1 %v3375_v0 }
0x112e   :  { %2848 = vmatpush3.bf16.msra.mxu0 %v3634_v4 }
0x112f   :  { %2842 = vmatmul.mubr.msk.bf16.vlgmr.msra.gmra.mrb[36].mxu1 %vm250_vm2, %v1474_v53  ;;  %2861 = vmatprep.subr.bf16.mxu0 %v3375_v0 }
0x1130   :  { %2854 = vmatpush3.bf16.msra.mxu1 %v3628_v3  ;;  %2857 = vmatprep.mubr.msk.bf16.mxu1 %vm3376_vm0, %v3375_v0 }
0x1131   :  { %2855 = vmatprep.subr.bf16.mxu1 %v3375_v0 }
0x1134   :  { %2856 = vmatpush3.bf16.msra.mxu1 %v3638_v6 }
0x1135   :  { %2869 = vmatprep.subr.bf16.mxu1 %v3375_v0 }
0x11fa   :  { %v1466_v1 = vpop.f32.mrb[32].mxu1 }
0x11fb   :  { %v1512_v62 = vpop.f32.mrb[36].mxu0  ;;  %v2827_v7 = vpop.f32.mrb[33].mxu1 }
0x11fc   :  { %v1513_v9 = vadd.f32 %v1512_v62, %v1466_v1  ;;  %v2835_v4 = vpop.f32.mrb[37].mxu0  ;;  %v1469_v60 = vpop.f32.mrb[34].mxu1  ;;  %v330_v7 = vcombine.high %v3920_v12, %v3920_v12 }
0x11fd   :  { %v1515_v8 = vpop.f32.mrb[38].mxu0  ;;  %v2828_v3 = vpop.f32.mrb[35].mxu1 }
0x11fe   :  { %v1518_v63 = vadd.f32 %v3674_v22, %v1513_v9  ;;  %v2836_v11 = vpop.f32.mrb[39].mxu0 }
0x1200   :  { %3065 = vtanh.f32 %v1518_v63  ;;  %v2563_v20 = vmul.f32 -1.442695, %v1518_v63 }
0x1202   :  { %v1583_v6 = vpop.f32.mrb[36].mxu1 }
0x1203   :  { %v1589_v13 = vadd.f32 %v1583_v6, %v3920_v12  ;;  %v2843_v14 = vpop.f32.mrb[37].mxu1 }
0x1204   :  { %v1586_v15 = vpop.f32.mrb[38].mxu1 }
0x1205   :  { %v1590_v16 = vadd.f32 %v3610_v45, %v1589_v13  ;;  %v2844_v17 = vpop.f32.mrb[39].mxu1  ;;  %v3123_v13 = vld [vmem:[%s4166_s7] ss:$0 sm:$0xff] }
0x1207   :  { %3067 = vtanh.f32 %v1590_v16  ;;  %v2565_v21 = vmul.f32 -1.442695, %v1590_v16 }
0x1208   :  { %3069 = vpow2.f32 %v2563_v20 }
0x1209   :  { %3071 = vpow2.f32 %v2565_v21 }
0x120a   :  { %v3066_v18 = vpop.eup %3065 }
0x120b   :  { %1528 = vrot.lane.b32.xlu0 %v3066_v18, %s4190_s24 }
0x1211   :  { %v3068_v46 = vpop.eup %3067 }
0x1212   :  { %1600 = vrot.lane.b32.xlu1 %v3068_v46, %s4190_s24  ;;  %v3070_v23 = vpop.eup %3069 }
0x1213   :  { %v1522_v24 = vadd.f32 1.0, %v3070_v23  ;;  %v3072_v25 = vpop.eup %3071 }
0x1214   :  { %v1594_v19 = vadd.f32 1.0, %v3072_v25 }
0x1215   :  { %3073 = vrcp.f32 %v1522_v24 }
0x1216   :  { %3075 = vrcp.f32 %v1594_v19 }
0x121f   :  { %v3074_v26 = vpop.eup %3073 }
0x1220   :  { %v3076_v29 = vpop.eup %3075  ;;  %v1526_v32 = vmul.f32 %v3074_v26, %v3871_v42 }
0x1221   :  { %v1598_v34 = vmul.f32 %v3076_v29, %v3873_v43 }
0x127d   :  { %v1529_v45 = vpop.permute.xlu0 %1528 }
0x127e   :  { %v1531_v28 = vmul.f32 %v3074_v26, %v1529_v45 }
0x1280   :  { %1533 = vrot.lane.b32.xlu0 %v1531_v28, %s4188_s5 }
0x1284   :  { %v1601_v30 = vpop.permute.xlu1 %1600 }
0x1285   :  { %v1603_v31 = vmul.f32 %v3076_v29, %v1601_v30 }
0x1287   :  { %1605 = vrot.lane.b32.xlu1 %v1603_v31, %s4188_s5 }
0x12f2   :  { %v1534_v27 = vpop.permute.xlu0 %1533 }
0x12f3   :  { %v3929_v33 = vadd.f32 %v1534_v27, %v1526_v32 }
0x12f5   :  { %3077 = vtanh.f32 %v3929_v33 }
0x12f9   :  { %v1606_v40 = vpop.permute.xlu1 %1605 }
0x12fa   :  { %v3933_v35 = vadd.f32 %v1606_v40, %v1598_v34 }
0x12fc   :  { %3079 = vtanh.f32 %v3933_v35 }
0x12ff   :  { %v3078_v36 = vpop.eup %3077 }
0x1300   :  { %1539 = vrot.lane.b32.xlu0 %v3078_v36, %s4190_s24 }
0x1306   :  { %v3080_v37 = vpop.eup %3079 }
0x1307   :  { %1611 = vrot.lane.b32.xlu1 %v3080_v37, %s4190_s24 }
0x1372   :  { %v1540_v38 = vpop.permute.xlu0 %1539 }
0x1373   :  { %v3938_v41 = vmul.f32 %v3074_v26, %v1540_v38 }
0x1375   :  { %v1616_v42 = vpack.c.bf16 %v3938_v41, %v3938_v41 }
0x1377   :  { %1618 = vrot.lane.b32.xlu0 %v1616_v42, %s4188_s5 }
0x1379   :  { %v1612_v43 = vpop.permute.xlu1 %1611 }
0x137a   :  { %v1614_v47 = vmul.f32 %v3076_v29, %v1612_v43 }
0x137c   :  { %v1615_v48 = vpack.c.bf16 %v1614_v47, %v1614_v47 }
0x137e   :  { %1664 = vrot.lane.b32.xlu1 %v1615_v48, %s4188_s5 }
0x13e9   :  { %v1619_v50 = vpop.permute.xlu0 %1618 }
0x13ea   :  { %2850 = vmatmul.mubr.msk.bf16.vlgmr.msra.gmra.mrb[40].mxu0 %vm250_vm2, %v1619_v50 }
0x13eb   :  { %2862 = vmatpush3.bf16.msra.mxu0 %v3890_v56  ;;  %2865 = vmatprep.mubr.msk.bf16.mxu0 %vm3376_vm0, %v3375_v0 }
0x13ec   :  { %2863 = vmatprep.subr.bf16.mxu0 %v3375_v0 }
0x13ef   :  { %2864 = vmatpush3.bf16.msra.mxu0 %v3903_v61 }
0x13f0   :  { %v1665_v44 = vpop.permute.xlu1 %1664  ;;  %2877 = vmatprep.subr.bf16.mxu0 %v3375_v0 }
0x13f1   :  { %2858 = vmatmul.mubr.msk.bf16.vlgmr.msra.gmra.mrb[40].mxu1 %vm250_vm2, %v1665_v44 }
0x13f2   :  { %2866 = vmatmul.mubr.msk.bf16.vlgmr.msra.gmra.mrb[44].mxu0 %vm250_vm2, %v1665_v44  ;;  %2870 = vmatpush3.bf16.msra.mxu1 %v3119_v49 }
0x13f3   :  { %2878 = vmatpush3.bf16.msra.mxu0 %v3120_v55  ;;  %2871 = vmatprep.subr.bf16.mxu1 %v3375_v0 }
0x13f4   :  { %2879 = vmatprep.subr.bf16.mxu0 %v3375_v0  ;;  %2881 = vmatprep.mubr.msk.bf16.mxu0 %vm3376_vm0, %v3375_v0 }
0x13f5   :  { %2873 = vmatprep.mubr.msk.bf16.mxu1 %vm3376_vm0, %v3375_v0 }
0x13f6   :  { %2872 = vmatpush3.bf16.msra.mxu1 %v3121_v57 }
0x13f7   :  { %2880 = vmatpush3.bf16.msra.mxu0 %v3122_v52  ;;  %2885 = vmatprep.subr.bf16.mxu1 %v3375_v0 }
0x13f8   :  { %2893 = vmatprep.subr.bf16.mxu0 %v3375_v0 }
0x14bd   :  { %v1657_v53 = vpop.f32.mrb[40].mxu0 }
0x14be   :  { %v2851_v56 = vpop.f32.mrb[41].mxu0 }
0x14bf   :  { %v1660_v61 = vpop.f32.mrb[42].mxu0  ;;  %v3124_v56 = vld [vmem:[%s4166_s7 + $0x1] ss:$0 sm:$0xff] }
0x14c0   :  { %v2852_v1 = vpop.f32.mrb[43].mxu0 }
0x14c4   :  { %v1703_v62 = vpop.f32.mrb[40].mxu1 }
0x14c5   :  { %v1704_v9 = vadd.f32 %v1703_v62, %v1657_v53  ;;  %v1774_v4 = vpop.f32.mrb[44].mxu0  ;;  %v2859_v60 = vpop.f32.mrb[41].mxu1 }
0x14c6   :  { %v1780_v2 = vadd.f32 %v1774_v4, %v330_v7  ;;  %v2867_v8 = vpop.f32.mrb[45].mxu0  ;;  %v1706_v3 = vpop.f32.mrb[42].mxu1 }
0x14c7   :  { %v1709_v63 = vadd.f32 %v3674_v22, %v1704_v9  ;;  %v1777_v11 = vpop.f32.mrb[46].mxu0  ;;  %v2860_v6 = vpop.f32.mrb[43].mxu1 }
0x14c8   :  { %v1781_v14 = vadd.f32 %v3123_v13, %v1780_v2  ;;  %v2868_v15 = vpop.f32.mrb[47].mxu0 }
0x14c9   :  { %3081 = vtanh.f32 %v1709_v63  ;;  %v2568_v17 = vmul.f32 -1.442695, %v1709_v63  ;;  %v2966_v15 = vld [vmem:[#allocation11 + $0x8] sm:$0xff]  }
0x14ca   :  { %3083 = vtanh.f32 %v1781_v14  ;;  %v2570_v18 = vmul.f32 -1.442695, %v1781_v14 }
0x14cb   :  { %3085 = vpow2.f32 %v2568_v17 }
0x14cc   :  { %3087 = vpow2.f32 %v2570_v18 }
0x14d3   :  { %v3082_v16 = vpop.eup %3081 }
0x14d4   :  { %v3084_v12 = vpop.eup %3083  ;;  %1719 = vrot.lane.b32.xlu0 %v3082_v16, %s4190_s24 }
0x14d5   :  { %1791 = vrot.lane.b32.xlu1 %v3084_v12, %s4190_s24  ;;  %v3086_v22 = vpop.eup %3085 }
0x14d6   :  { %v3088_v46 = vpop.eup %3087  ;;  %v1713_v20 = vadd.f32 1.0, %v3086_v22 }
0x14d7   :  { %v1785_v21 = vadd.f32 1.0, %v3088_v46 }
0x14d8   :  { %3089 = vrcp.f32 %v1713_v20  ;;  %v3379_v20 = vmov 1934713408  }
0x14d9   :  { %3091 = vrcp.f32 %v1785_v21  ;;  %v2007_v21 = vunpack.c.l.s4 %v3379_v20  ;;  %v2976_v20 = vld [vmem:[#allocation12 + $0x8] sm:$0xff]  }
0x14e2   :  { %v3090_v23 = vpop.eup %3089 }
0x14e3   :  { %v3092_v25 = vpop.eup %3091  ;;  %v1717_v28 = vmul.f32 %v3090_v23, %v3929_v33 }
0x14e4   :  { %v1789_v29 = vmul.f32 %v3092_v25, %v3933_v35 }
0x1546   :  { %v1720_v24 = vpop.permute.xlu0 %1719 }
0x1547   :  { %v1792_v19 = vpop.permute.xlu1 %1791  ;;  %v1722_v26 = vmul.f32 %v3090_v23, %v1720_v24 }
0x1548   :  { %v1794_v45 = vmul.f32 %v3092_v25, %v1792_v19 }
0x1549   :  { %1724 = vrot.lane.b32.xlu0 %v1722_v26, %s4188_s5 }
0x154a   :  { %1796 = vrot.lane.b32.xlu1 %v1794_v45, %s4188_s5 }
0x15bb   :  { %v1725_v30 = vpop.permute.xlu0 %1724 }
0x15bc   :  { %v1797_v31 = vpop.permute.xlu1 %1796  ;;  %v1727_v32 = vadd.f32 %v1725_v30, %v1717_v28 }
0x15bd   :  { %v3979_v27 = vadd.f32 %v1797_v31, %v1789_v29  ;;  %v2972_v31 = vld [vmem:[%s4160_s1 + $0x8] sm:$0x1f]  }
0x15be   :  { %3093 = vtanh.f32 %v1727_v32 }
0x15bf   :  { %3095 = vtanh.f32 %v3979_v27 }
0x15c8   :  { %v3094_v34 = vpop.eup %3093 }
0x15c9   :  { %v3096_v40 = vpop.eup %3095  ;;  %1730 = vrot.lane.b32.xlu0 %v3094_v34, %s4190_s24 }
0x15ca   :  { %1802 = vrot.lane.b32.xlu1 %v3096_v40, %s4190_s24 }
0x163b   :  { %v1731_v36 = vpop.permute.xlu0 %1730 }
0x163c   :  { %v1803_v37 = vpop.permute.xlu1 %1802  ;;  %v1733_v38 = vmul.f32 %v3090_v23, %v1731_v36  ;;  %v2159_v36 = vsel %vm250_vm2, %v2972_v31, 0 }
0x163d   :  { %v3984_v33 = vmul.f32 %v3092_v25, %v1803_v37  ;;  %v2008_v25 = vunpack.c.0.s8 %v2007_v21 }
0x163e   :  { %v1807_v35 = vpack.c.bf16 %v1733_v38, %v1733_v38 }
0x163f   :  { %v1806_v42 = vpack.c.bf16 %v3984_v33, %v3984_v33  ;;  %v2011_v45 = vsub.s32 %v2008_v25, %v3565_v5  ;;  %v2574_v5 = vld [vmem:[%s4168_s9] ss:$0 sm:$0xff] }
0x1640   :  { %1809 = vrot.lane.b32.xlu0 %v1807_v35, %s4188_s5 }
0x1641   :  { %1855 = vrot.lane.b32.xlu1 %v1806_v42, %s4188_s5 }
0x16b2   :  { %v1810_v43 = vpop.permute.xlu0 %1809 }
0x16b3   :  { %v1856_v47 = vpop.permute.xlu1 %1855  ;;  %2874 = vmatmul.mubr.msk.bf16.vlgmr.msra.gmra.mrb[44].mxu1 %vm250_vm2, %v1810_v43 }
0x16b4   :  { %2882 = vmatmul.mubr.msk.bf16.vlgmr.msra.gmra.mrb[48].mxu0 %vm250_vm2, %v1856_v47  ;;  %2889 = vmatprep.mubr.msk.bf16.mxu1 %vm3376_vm0, %v3375_v0 }
0x16b5   :  { %2895 = vmatprep.mubr.msk.bf16.mxu0 %vm3376_vm0, %v3375_v0 }
0x1786   :  { %v1848_v48 = vpop.f32.mrb[44].mxu1 }
0x1787   :  { %v1894_v50 = vpop.f32.mrb[48].mxu0  ;;  %v2875_v44 = vpop.f32.mrb[45].mxu1 }
0x1788   :  { %v1895_v49 = vadd.f32 %v1894_v50, %v1848_v48  ;;  %v2883_v55 = vpop.f32.mrb[49].mxu0  ;;  %v1851_v57 = vpop.f32.mrb[46].mxu1 }
0x1789   :  { %v1897_v52 = vpop.f32.mrb[50].mxu0  ;;  %v2876_v53 = vpop.f32.mrb[47].mxu1 }
0x178a   :  { %v1900_v61 = vadd.f32 %v3124_v56, %v1895_v49  ;;  %v2884_v1 = vpop.f32.mrb[51].mxu0 }
0x178c   :  { %3097 = vtanh.f32 %v1900_v61  ;;  %v2573_v7 = vmul.f32 -1.442695, %v1900_v61 }
0x178e   :  { %3099 = vpow2.f32 %v2573_v7 }
0x1796   :  { %v3098_v62 = vpop.eup %3097 }
0x1797   :  { %1910 = vrot.lane.b32.xlu0 %v3098_v62, %s4190_s24 }
0x1798   :  { %v3100_v9 = vpop.eup %3099 }
0x1799   :  { %v1904_v4 = vadd.f32 1.0, %v3100_v9 }
0x179b   :  { %3101 = vrcp.f32 %v1904_v4 }
0x17a5   :  { %v3102_v60 = vpop.eup %3101 }
0x17a6   :  { %v1908_v3 = vmul.f32 %v3102_v60, %v1727_v32 }
0x1809   :  { %v1911_v2 = vpop.permute.xlu0 %1910 }
0x180a   :  { %v1913_v8 = vmul.f32 %v3102_v60, %v1911_v2 }
0x180c   :  { %1915 = vrot.lane.b32.xlu1 %v1913_v8, %s4188_s5 }
0x1810   :  { %589 = vrot.lane.b32.xlu1 %v3692_v10, %s4188_s5 }
0x1814   :  { %971 = vrot.lane.b32.xlu1 %v3786_v58, %s4188_s5 }
0x1818   :  { %1353 = vrot.lane.b32.xlu1 %v3879_v54, %s4188_s5  ;;  %v2965_v54 = vld [vmem:[#allocation11] sm:$0xff]  }
0x1819   :  { %2886 = vmatpush3.bf16.msra.mxu1 %v2965_v54  ;;  %v2275_v54 = vsel %vm2229_vm4, %v2972_v31, 0 }
0x181a   :  { %2887 = vmatprep.subr.bf16.mxu1 %v3375_v0 }
0x181c   :  { %1735 = vrot.lane.b32.xlu1 %v1733_v38, %s4188_s5 }
0x181d   :  { %2888 = vmatpush3.bf16.msra.mxu1 %v2966_v15 }
0x181e   :  { %2899 = vmatprep.subr.bf16.mxu1 %v3375_v0 }
0x187e   :  { %v1916_v63 = vpop.permute.xlu1 %1915 }
0x187f   :  { %v4008_v11 = vadd.f32 %v1916_v63, %v1908_v3 }
0x1881   :  { %3103 = vtanh.f32 %v4008_v11 }
0x1882   :  { %v590_v6 = vpop.permute.xlu1 %589 }
0x1883   :  { %593 = vst.msk [vmem:[#allocation2] sm:$0x3] %vm140_vm1, %v590_v6 }
0x1886   :  { %v972_v13 = vpop.permute.xlu1 %971 }
0x1887   :  { %975 = vst.msk [vmem:[#allocation2 + $0x4] sm:$0x3] %vm140_vm1, %v972_v13 }
0x188a   :  { %v1354_v10 = vpop.permute.xlu1 %1353 }
0x188b   :  { %v3104_v14 = vpop.eup %3103  ;;  %1357 = vst.msk [vmem:[#allocation2 + $0x8] sm:$0x3] %vm140_vm1, %v1354_v10  ;;  %v1950_v10 = vrot.slane %v3979_v27, %v3599_v39 }
0x188c   :  { %1921 = vrot.lane.b32.xlu0 %v3104_v14, %s4190_s24  ;;  %v1938_v14 = vrot.slane %v3984_v33, %v3599_v39 }
0x188e   :  { %v1736_v58 = vpop.permute.xlu1 %1735  ;;  %v3126_v23 = vld.sshfl [vmem:[#allocation2] sm:$0xf pattern:$0x76325410] }
0x188f   :  { %1739 = vst.msk [vmem:[#allocation2 + $0xc] sm:$0x3] %vm140_vm1, %v1736_v58 }
0x1890   :  { %780 = vrot.lane.b32.xlu0 %v3741_v59, %s4188_s5 }
0x1894   :  { %1162 = vrot.lane.b32.xlu0 %v3834_v51, %s4188_s5  ;;  %v4030_v51 = vld [vmem:[%s4160_s1] sm:$0x1f]   ;;  %s3380_s1 = smov 96  }
0x1895   :  { %v2230_v58 = vsel %vm2229_vm4, %v4030_v51, 0 }
0x1896   :  { %v3127_v24 = vld.sshfl [vmem:[#allocation2 + $0x8] sm:$0xf pattern:$0x76325410] }
0x1898   :  { %1544 = vrot.lane.b32.xlu0 %v3938_v41, %s4188_s5  ;;  %v2108_v41 = vsel %vm250_vm2, %v4030_v51, 0 }
0x1899   :  { %2894 = vmatpush3.bf16.xpose.msra.mxu0 %v2108_v41 }
0x189a   :  { %2905 = vmatprep.subr.bf16.mxu0 %v3375_v0 }
0x18fe   :  { %v1922_v16 = vpop.permute.xlu0 %1921 }
0x18ff   :  { %v1924_v12 = vmul.f32 %v3102_v60, %v1922_v16 }
0x1901   :  { %1926 = vrot.lane.b32.xlu0 %v1924_v12, %s4188_s5 }
0x1902   :  { %v781_v17 = vpop.permute.xlu0 %780 }
0x1903   :  { %784 = vst.msk [vmem:[#allocation2 + $0x2] sm:$0x3] %vm140_vm1, %v781_v17 }
0x1906   :  { %v1163_v59 = vpop.permute.xlu0 %1162 }
0x1907   :  { %1166 = vst.msk [vmem:[#allocation2 + $0x6] sm:$0x3] %vm140_vm1, %v1163_v59  ;;  %v2973_v59 = vld [vmem:[%s4170_s11] sm:$0xff]  }
0x190a   :  { %v1545_v18 = vpop.permute.xlu0 %1544 }
0x190b   :  { %1548 = vst.msk [vmem:[#allocation2 + $0xa] sm:$0x3] %vm140_vm1, %v1545_v18  ;;  %v2975_v18 = vld [vmem:[#allocation12] sm:$0xff]  }
0x190e   :  { %v3125_v46 = vld.sshfl [vmem:[#allocation2 + $0x2] sm:$0xf pattern:$0x76325410] }
0x190f   :  { %v2005_v26 = vcombine.low %v3126_v23, %v3125_v46  ;;  %v2974_v46 = vld [vmem:[%s4170_s11 + $0x8] sm:$0xff]   ;;  %s3381_s11 = smov [#allocation15]  }
0x1910   :  { %s2467_s8 = sshll.u32 %s3381_s11, 4  ;;  %s2468_s8 = int_to_ptr.vmem [resolvable:$true] %s2467_s8 }
0x1911   :  { %v2012_v29 = vrot.slane %v2005_v26, %v2011_v45  ;;  %s3261_s25 = scalar_lea.vmem %s2468_s8, 256  ;;  %p3266_p7 = scmp.lt.s32.totalorder %s2468_s8, %s2468_s8 }
0x1912   :  { %p3262_p6 = scmp.ne.s32.totalorder %s2468_s8, %s3261_s25  ;;  %p3267_p8 = scmp.lt.s32.totalorder %s3261_s25, %s3261_s25 }
0x1914   :  { %p3268_p9 = por %p3267_p8, %p3266_p7 }
0x1916   :  { %p3269_p10 = pnand %p3268_p9, %p3262_p6 }
0x1973   :  { %v1927_v22 = vpop.permute.xlu0 %1926 }
0x1974   :  { %1930 = vst.msk [vmem:[#allocation2 + $0xe] sm:$0x3] %vm140_vm1, %v1927_v22  ;;  %1955 = vst.msk [vmem:[#allocation17 + $0x2] sm:$0x3] %vm140_vm1, %v1927_v22 }
0x197b   :  { %v3128_v19 = vld.sshfl [vmem:[#allocation2 + $0xa] sm:$0xf pattern:$0x76325410] }
0x197c   :  { %v2013_v28 = vcombine.low %v3127_v24, %v3128_v19 }
0x197e   :  { %v2020_v30 = vrot.slane %v2013_v28, %v2011_v45 }
0x1980   :  { %v2021_v32 = vcombine.low %v2012_v29, %v2020_v30  ;;  %v2022_v34 = vcombine.high %v2012_v29, %v2020_v30 }
0x1982   :  { %v4042_v40 = vpack.c.bf16 %v2022_v34, %v2021_v32 }
0x1984   :  { %2890 = vmatmul.mubr.msk.bf16.vlgmr.msra.gmra.mrb[48].mxu1 %vm250_vm2, %v4042_v40 }
0x1985   :  { %2900 = vmatpush3.bf16.xpose.msra.mxu1 %v2159_v36  ;;  %2901 = vmatprep.mubr.msk.bf16.mxu1 %vm3376_vm0, %v3375_v0 }
0x1986   :  { %2911 = vmatprep.subr.bf16.mxu1 %v3375_v0 }
0x1a57   :  { %v2090_v37 = vpop.f32.mrb[48].mxu1 }
0x1a58   :  { %v2091_v38 = vadd.f32 %v2574_v5, %v2090_v37  ;;  %v2891_v35 = vpop.f32.mrb[49].mxu1 }
0x1a59   :  { %v2093_v42 = vpop.f32.mrb[50].mxu1 }
0x1a5a   :  { %v2097_v43 = vpack.c.bf16 %v2091_v38, %v2091_v38  ;;  %v2094_v47 = vadd.f32 %v2574_v5, %v2093_v42  ;;  %v2892_v48 = vpop.f32.mrb[51].mxu1 }
0x1a5c   :  { %v2098_v50 = vpack.c.bf16 %v2094_v47, %v2094_v47  ;;  %2896 = vmatmul.mubr.msk.bf16.vlgmr.msra.gmra.mrb[52].mxu0 %vm250_vm2, %v2097_v43 }
0x1a5d   :  { %2907 = vmatprep.mubr.msk.bf16.mxu0 %vm3376_vm0, %v3375_v0  ;;  %2906 = vmatpush3.bf16.msra.mxu0 %v2230_v58 }
0x1a5e   :  { %2902 = vmatmul.mubr.msk.bf16.vlgmr.msra.gmra.mrb[52].mxu1 %vm250_vm2, %v2098_v50  ;;  %2917 = vmatprep.subr.bf16.mxu0 %v3375_v0 }
0x1a5f   :  { %2913 = vmatprep.mubr.msk.bf16.mxu1 %vm3376_vm0, %v3375_v0  ;;  %2912 = vmatpush3.bf16.msra.mxu1 %v2275_v54 }
0x1a60   :  { %2925 = vmatprep.subr.bf16.mxu1 %v3375_v0 }
0x1b2f   :  { %v2144_v44 = vpop.f32.mrb[52].mxu0 }
0x1b30   :  { %v2897_v49 = vpop.f32.mrb[53].mxu0  ;;  %v2202_v55 = vsel %vm2201_vm3, %v2144_v44, -inf }
0x1b31   :  { %2203 = vmax.xlane.f32.xlu1 %v2202_v55  ;;  %v2147_v57 = vpop.f32.mrb[54].mxu0  ;;  %v2195_v52 = vpop.f32.mrb[52].mxu1 }
0x1b32   :  { %v2898_v53 = vpop.f32.mrb[55].mxu0  ;;  %v2903_v56 = vpop.f32.mrb[53].mxu1  ;;  %v2205_v61 = vsel %vm2201_vm3, %v2195_v52, -inf }
0x1b33   :  { %2206 = vmax.xlane.f32.xlu0 %v2205_v61  ;;  %v2198_v1 = vpop.f32.mrb[54].mxu1 }
0x1b34   :  { %v2904_v62 = vpop.f32.mrb[55].mxu1 }
0x1bbe   :  { %v2204_v7 = vpop.xlane.xlu1 %2203 }
0x1bbf   :  { %v2208_v9 = vsub.f32 %v2144_v44, %v2204_v7 }
0x1bc0   :  { %v2207_v4 = vpop.xlane.xlu0 %2206 }
0x1bc1   :  { %v2210_v60 = vmul.f32 1.442695, %v2208_v9  ;;  %v2209_v2 = vsub.f32 %v2195_v52, %v2207_v4 }
0x1bc3   :  { %3105 = vpow2.f32 %v2210_v60  ;;  %v2212_v8 = vmul.f32 1.442695, %v2209_v2 }
0x1bc5   :  { %3107 = vpow2.f32 %v2212_v8 }
0x1bcd   :  { %v3106_v3 = vpop.eup %3105 }
0x1bce   :  { %v2214_v63 = vsel %vm2201_vm3, %v3106_v3, 0.0 }
0x1bcf   :  { %v3108_v6 = vpop.eup %3107  ;;  %2215 = vadd.xlane.f32.xlu0 %v2214_v63 }
0x1bd0   :  { %v2217_v13 = vsel %vm2201_vm3, %v3108_v6, 0.0 }
0x1bd1   :  { %2218 = vadd.xlane.f32.xlu1 %v2217_v13 }
0x1be2   :  { %1951 = vrot.lane.b32.xlu1 %v1950_v10, %s3380_s1 }
0x1be5   :  { %1939 = vrot.lane.b32.xlu0 %v1938_v14, %s4188_s5 }
0x1be6   :  { %1957 = vrot.lane.b32.xlu1 %v4008_v11, %s3380_s1 }
0x1c5c   :  { %v2216_v27 = vpop.xlane.xlu0 %2215 }
0x1c5d   :  { %3109 = vrcp.f32 %v2216_v27 }
0x1c5e   :  { %v2219_v15 = vpop.xlane.xlu1 %2218 }
0x1c5f   :  { %3111 = vrcp.f32 %v2219_v15 }
0x1c60   :  { %v1940_v16 = vpop.permute.xlu0 %1939 }
0x1c61   :  { %1942 = vst.msk [vmem:[#allocation17] sm:$0x3] %vm140_vm1, %v1940_v16 }
0x1c62   :  { %v1952_v39 = vpop.permute.xlu1 %1951 }
0x1c63   :  { %1954 = vst.msk [vmem:[#allocation18] sm:$0x3] %vm140_vm1, %v1952_v39 }
0x1c66   :  { %v1958_v33 = vpop.permute.xlu1 %1957 }
0x1c67   :  { %v3110_v11 = vpop.eup %3109  ;;  %1960 = vst.msk [vmem:[#allocation18 + $0x2] sm:$0x3] %vm140_vm1, %v1958_v33 }
0x1c68   :  { %v2221_v12 = vmul.f32 %v3110_v11, %v3106_v3 }
0x1c69   :  { %v3112_v17 = vpop.eup %3111 }
0x1c6a   :  { %2448 = vst.msk [vmem:[#allocation15] sm:$0xff] %vm2201_vm3, %v2221_v12  ;;  %v2223_v51 = vmul.f32 %v3112_v17, %v3108_v6  ;;  %v2224_v41 = vpack.c.bf16 %v2221_v12, %v2221_v12 }
0x1c6c   :  { %2449 = vst.msk [vmem:[#allocation15 + $0x8] sm:$0xff] %vm2201_vm3, %v2223_v51  ;;  %2908 = vmatmul.mubr.msk.bf16.vlgmr.msra.gmra.mrb[56].mxu0 %vm2201_vm3, %v2224_v41  ;;  %v2225_v22 = vpack.c.bf16 %v2223_v51, %v2223_v51 }
0x1c6d   :  { %2918 = vmatpush3.bf16.msra.mxu0 %v2973_v59  ;;  %2921 = vmatprep.mubr.msk.bf16.mxu0 %vm3376_vm0, %v3375_v0 }
0x1c6e   :  { %2914 = vmatmul.mubr.msk.bf16.vlgmr.msra.gmra.mrb[56].mxu1 %vm2201_vm3, %v2225_v22  ;;  %2919 = vmatprep.subr.bf16.mxu0 %v3375_v0 }
0x1c6f   :  { %2926 = vmatpush3.bf16.msra.mxu1 %v2975_v18  ;;  %2929 = vmatprep.mubr.msk.bf16.mxu1 %vm3376_vm0, %v3375_v0 }
0x1c70   :  { %2927 = vmatprep.subr.bf16.mxu1 %v3375_v0 }
0x1c71   :  { %2920 = vmatpush3.bf16.msra.mxu0 %v2974_v46 }
0x1c73   :  { %2928 = vmatpush3.bf16.msra.mxu1 %v2976_v20 }
0x1c74   :  { %2922 = vmatmul.mubr.msk.bf16.vlgmr.msra.gmra.mrb[60].mxu0 %vm250_vm2, %v4042_v40 }
0x1d3f   :  { %v2266_v21 = vpop.f32.mrb[56].mxu0 }
0x1d40   :  { %v2909_v23 = vpop.f32.mrb[57].mxu0 }
0x1d41   :  { %v2269_v24 = vpop.f32.mrb[58].mxu0  ;;  %v2311_v25 = vpop.f32.mrb[56].mxu1 }
0x1d42   :  { %v2317_v19 = vpack.c.bf16 %v2311_v25, %v2266_v21  ;;  %v2910_v26 = vpop.f32.mrb[59].mxu0  ;;  %v2915_v45 = vpop.f32.mrb[57].mxu1 }
0x1d43   :  { %v2314_v28 = vpop.f32.mrb[58].mxu1 }
0x1d44   :  { %v2916_v29 = vpop.f32.mrb[59].mxu1  ;;  %2930 = vmatmul.mubr.msk.bf16.vlgmr.msra.gmra.mrb[60].mxu1 %vm250_vm2, %v2317_v19 }
0x1d47   :  { %v2372_v30 = vpop.f32.mrb[60].mxu0 }
0x1d48   :  { %v2923_v31 = vpop.f32.mrb[61].mxu0 }
0x1d49   :  { %v2375_v0 = vpop.f32.mrb[62].mxu0 }
0x1d4a   :  { %v2924_v32 = vpop.f32.mrb[63].mxu0 }
0x1d4b   :  { %3272 = shalt.err (!%p3269_p10)
}
0x1d4c   :  { %s3273_s3 = scalar_lea.hbm %s4173_s14, 256 }
0x1d4d   :  { %p3274_p11 = scmp.ne.s32.totalorder %s4173_s14, %s3273_s3  ;;  %p3277_p12 = scmp.lt.u32.totalorder %s3273_s3, %s4173_s14 }
0x1d4f   :  { %p3279_p13 = pnand %p3277_p12, %p3274_p11 }
0x1d51   :  { %3282 = shalt.err (!%p3279_p13)
}
0x1d52   :  { %s3382_s21 = smov 128   ;;  %s3383_s18 = smov 8  }
0x1d53   :  { %2473 = dma.vmem_to_hbm [thread:$0]  %s2468_s8, 256, %s4173_s14, [#allocation16], %s3382_s21, %s3382_s21, %s3383_s18  }
0x1d54   :  { %s3384_s24 = smov [#allocation17]   ;;  %s3385_s2 = smov [#allocation18]  }
0x1d55   :  { %s2479_s19 = sshll.u32 %s3384_s24, 4  ;;  %s2491_s22 = sshll.u32 %s3385_s2, 4  ;;  %s2480_s19 = int_to_ptr.vmem [resolvable:$true] %s2479_s19  ;;  %s2492_s22 = int_to_ptr.vmem [resolvable:$true] %s2491_s22 }
0x1d56   :  { %s3283_s20 = scalar_lea.vmem %s2480_s19, 64  ;;  %p3288_p1 = scmp.lt.s32.totalorder %s2480_s19, %s2480_s19 }
0x1d57   :  { %p3284_p0 = scmp.ne.s32.totalorder %s2480_s19, %s3283_s20  ;;  %p3289_p2 = scmp.lt.s32.totalorder %s3283_s20, %s3283_s20 }
0x1d59   :  { %p3290_p3 = por %p3289_p2, %p3288_p1 }
0x1d5b   :  { %p3291_p4 = pnand %p3290_p3, %p3284_p0 }
0x1d5d   :  { %3294 = shalt.err (!%p3291_p4)
}
0x1d5e   :  { %s3295_s0 = scalar_lea.hbm %s4174_s15, 64 }
0x1d5f   :  { %p3296_p5 = scmp.ne.s32.totalorder %s4174_s15, %s3295_s0  ;;  %p3299_p6 = scmp.lt.u32.totalorder %s3295_s0, %s4174_s15 }
0x1d61   :  { %p3301_p7 = pnand %p3299_p6, %p3296_p5 }
0x1d63   :  { %3304 = shalt.err (!%p3301_p7)
}
0x1d64   :  { %2485 = dma.vmem_to_hbm [thread:$0]  %s2480_s19, 64, %s4174_s15, [#allocation16], %s4188_s5, %s4188_s5, %s4187_s26  }
0x1d65   :  { %s3305_s10 = scalar_lea.vmem %s2492_s22, 64  ;;  %p3310_p9 = scmp.lt.s32.totalorder %s2492_s22, %s2492_s22 }
0x1d66   :  { %p3306_p8 = scmp.ne.s32.totalorder %s2492_s22, %s3305_s10  ;;  %p3311_p10 = scmp.lt.s32.totalorder %s3305_s10, %s3305_s10 }
0x1d68   :  { %p3312_p11 = por %p3311_p10, %p3310_p9 }
0x1d6a   :  { %p3313_p12 = pnand %p3312_p11, %p3306_p8 }
0x1d6c   :  { %3316 = shalt.err (!%p3313_p12)
}
0x1d6d   :  { %s3317_s30 = scalar_lea.hbm %s4175_s16, 64 }
0x1d6e   :  { %p3318_p13 = scmp.ne.s32.totalorder %s4175_s16, %s3317_s30  ;;  %p3321_p0 = scmp.lt.u32.totalorder %s3317_s30, %s4175_s16 }
0x1d70   :  { %p3323_p1 = pnand %p3321_p0, %p3318_p13 }
0x1d72   :  { %3326 = shalt.err (!%p3323_p1)
}
0x1d73   :  { %2497 = dma.vmem_to_hbm [thread:$0]  %s2492_s22, 64, %s4175_s16, [#allocation19], %s4188_s5, %s4188_s5, %s4187_s26  }
0x1d74   :  { %v2591_v40 = vld [vmem:[%s4171_s12] ss:$0 sm:$0xff]  ;;  %s3386_s2 = smov [#allocation14]  }
0x1d75   :  { %s2455_s20 = sshll.u32 %s3386_s2, 4  ;;  %s2456_s20 = int_to_ptr.vmem [resolvable:$true] %s2455_s20 }
0x1d76   :  { %s3327_s16 = scalar_lea.vmem %s2456_s20, 256  ;;  %p3332_p3 = scmp.lt.s32.totalorder %s2456_s20, %s2456_s20 }
0x1d77   :  { %p3328_p2 = scmp.ne.s32.totalorder %s2456_s20, %s3327_s16  ;;  %p3333_p4 = scmp.lt.s32.totalorder %s3327_s16, %s3327_s16 }
0x1d79   :  { %p3334_p5 = por %p3333_p4, %p3332_p3 }
0x1d7b   :  { %p3335_p6 = pnand %p3334_p5, %p3328_p2 }
0x1e17   :  { %v2428_v34 = vpop.f32.mrb[60].mxu1 }
0x1e18   :  { %v2429_v36 = vadd.f32 %v2428_v34, %v2372_v30  ;;  %v2931_v5 = vpop.f32.mrb[61].mxu1 }
0x1e19   :  { %v2431_v37 = vpop.f32.mrb[62].mxu1 }
0x1e1a   :  { %v2442_v38 = vadd.f32 %v2591_v40, %v2429_v36  ;;  %v2432_v35 = vadd.f32 %v2431_v37, %v2375_v0  ;;  %v2932_v42 = vpop.f32.mrb[63].mxu1 }
0x1e1c   :  { %3113 = vtanh.f32 %v2442_v38  ;;  %v2443_v43 = vadd.f32 %v2591_v40, %v2432_v35 }
0x1e1e   :  { %3115 = vtanh.f32 %v2443_v43 }
0x1e26   :  { %v3114_v47 = vpop.eup %3113 }
0x1e27   :  { %2446 = vst.msk [vmem:[#allocation14] sm:$0xff] %vm250_vm2, %v3114_v47 }
0x1e28   :  { %v3116_v48 = vpop.eup %3115 }
0x1e29   :  { %2447 = vst.msk [vmem:[#allocation14 + $0x8] sm:$0xff] %vm250_vm2, %v3116_v48 }
0x1e2a   :  { %3338 = shalt.err (!%p3335_p6)
}
0x1e2b   :  { %s3339_s5 = scalar_lea.hbm %s4172_s13, 256 }
0x1e2c   :  { %p3340_p7 = scmp.ne.s32.totalorder %s4172_s13, %s3339_s5  ;;  %p3343_p8 = scmp.lt.u32.totalorder %s3339_s5, %s4172_s13 }
0x1e2e   :  { %p3345_p9 = pnand %p3343_p8, %p3340_p7 }
0x1e30   :  { %3348 = shalt.err (!%p3345_p9)
}
0x1e31   :  { %2461 = dma.vmem_to_hbm [thread:$0]  %s2456_s20, 256, %s4172_s13, [#allocation5], %s3382_s21, %s3382_s21, %s3383_s18  }
0x1e32   :  { %3357 = dma.done.wait [#allocation5], 256  }
0x1e33   :  { %3358 = vsyncadd [#allocation5], 4294967040 }
0x1e34   :  { %3359 = dma.done.wait [#allocation16], 320  }
0x1e35   :  { %3360 = vsyncadd [#allocation16], 4294966976 }
0x1e36   :  { %3361 = dma.done.wait [#allocation19], 64  }
0x1e37   :  { %3362 = vsyncadd [#allocation19], 4294967232 }
0x1e38   :  { %2510 = vsyncpa [#allocation4], 1 }
0x1e39   :  { %2511 = vsyncpa [#allocation7], 1 }
0x1e3a   :  { %2512 = vsyncpa [#allocation10], 1 }
0x1e3b   :  { %2513 = vsyncpa [#allocation13], 1 }
0x1e3c   :  { %2514 = vsyncpa [#allocation5], 1 }
0x1e3d   :  { %2515 = vsyncpa [#allocation16], 1 }
0x1e3e   :  { %2516 = vsyncpa [#allocation19], 1 }

</bundles_post_ra>
